<compile_context>
chip_gen: v6e
topology: v6e:2x2x1
jax: 0.10.0
libtpu: 0.0.40
codegen_flags: <defaults>
</compile_context>

<pallas_src>
import jax
import jax.numpy as jnp
from jax.experimental import pallas as pl
from jax.experimental.pallas import tpu as pltpu

# Padded feature dims (multiples of 128).
D_IN, D1, D2, D3, D_OUT = 128, 256, 512, 1024, 896


def _leaky_relu(x, slope=0.2):
    # Valid as max(x, slope*x) only because 0 < slope < 1.
    return jnp.maximum(x, slope * x)


def _layer(x_bf16, w, b_ref):
    # bf16 x bf16 on the MXU with f32 accumulation; f32 bias add on the VPU.
    return jnp.dot(x_bf16, w[...], preferred_element_type=jnp.float32) + b_ref[...]


def _mlp_kernel_tiled(z_ref,
                      w1_ref, b1_ref,
                      w2_ref, b2_ref,
                      w3_ref, b3_ref,
                      w4_ref, b4_ref,
                      o_ref):
    """Throughput path: all weights VMEM-resident via constant BlockSpecs."""
    h = _leaky_relu(_layer(z_ref[...], w1_ref, b1_ref))
    h = _leaky_relu(_layer(h.astype(jnp.bfloat16), w2_ref, b2_ref))
    h = _leaky_relu(_layer(h.astype(jnp.bfloat16), w3_ref, b3_ref))
    o_ref[...] = jnp.tanh(_layer(h.astype(jnp.bfloat16), w4_ref, b4_ref))


def _mlp_kernel_small(z_ref,
                      w1_ref, b1_ref,
                      w2_ref, b2_ref,
                      b3_ref, b4_ref,
                      w3_hbm, w4_hbm,
                      o_ref,
                      w3_vmem, w4_vmem, sem):
    """Latency path (single grid step): W3/W4 fetched with manual async DMAs
    that overlap the layer-1/2 compute; waits sit right before their matmuls."""
    cp3 = pltpu.make_async_copy(w3_hbm, w3_vmem, sem.at[0])
    cp4 = pltpu.make_async_copy(w4_hbm, w4_vmem, sem.at[1])
    cp3.start()
    cp4.start()
    h = _leaky_relu(_layer(z_ref[...], w1_ref, b1_ref))
    h = _leaky_relu(_layer(h.astype(jnp.bfloat16), w2_ref, b2_ref))
    cp3.wait()
    h = _leaky_relu(_layer(h.astype(jnp.bfloat16), w3_vmem, b3_ref))
    cp4.wait()
    o_ref[...] = jnp.tanh(_layer(h.astype(jnp.bfloat16), w4_vmem, b4_ref))


def _pad2d(x, rows, cols):
    r, c = x.shape
    return jnp.pad(x, ((0, rows - r), (0, cols - c)))


def _round_up(x, m):
    return -(-x // m) * m


def init_params(key):
    """Deterministic synthetic parameters matching nn.Linear shapes.

    Weights stored as (in_features, out_features); biases as (out_features,).
    """
    dims = [(100, 256), (256, 512), (512, 1024), (1024, 28 * 28)]
    params = []
    for i, (d_in, d_out) in enumerate(dims):
        kw, kb = jax.random.split(jax.random.fold_in(key, i))
        bound = 1.0 / (d_in ** 0.5)  # matches PyTorch nn.Linear init range
        w = jax.random.uniform(kw, (d_in, d_out), jnp.float32, -bound, bound)
        b = jax.random.uniform(kb, (d_out,), jnp.float32, -bound, bound)
        params.append((w, b))
    return tuple(params)


def prepare_params(params):
    """One-time: zero-pad to kernel dims, cast weights to bf16 (biases f32)."""
    (w1, b1), (w2, b2), (w3, b3), (w4, b4) = params

    def pw(w, r, c):
        return _pad2d(w, r, c).astype(jnp.bfloat16)

    def pb(b, c):
        return _pad2d(b[None, :], 1, c).astype(jnp.float32)

    return (pw(w1, D_IN, D1), pb(b1, D1),
            pw(w2, D1, D2), pb(b2, D2),
            pw(w3, D2, D3), pb(b3, D3),
            pw(w4, D3, D_OUT), pb(b4, D_OUT))


@jax.jit
def generator_forward(z, prepared):
    """z: (B, 100) float32, prepared = prepare_params(...) -> (B, 1, 28, 28)."""
    w1, b1, w2, b2, w3, b3, w4, b4 = prepared
    B = z.shape[0]

    # ---- Static tile selection ------------------------------------------
    b16 = _round_up(B, 16)          # bf16 z needs a multiple-of-16 batch tile
    small = b16 <= 128
    if small:
        TB, B_pad = b16, b16        # single grid step (latency path)
    else:
        # >= 2 grid steps so both v7x TensorCores get work; TB up to 512 to
        # amortize the per-grid-step overhead.
        TB = min(512, _round_up(b16 // 2, 16))
        B_pad = _round_up(B, TB)

    # Pre-pad + pre-cast z to bf16 in the wrapper (no per-step cast in kernel).
    z_p = _pad2d(z, B_pad, D_IN).astype(jnp.bfloat16)

    cparams = pltpu.CompilerParams(
        dimension_semantics=("parallel",),
        vmem_limit_bytes=32 << 20,
    )

    if small:
        out_p = pl.pallas_call(
            _mlp_kernel_small,
            out_shape=jax.ShapeDtypeStruct((B_pad, D_OUT), jnp.float32),
            grid=(1,),
            in_specs=[
                pl.BlockSpec((TB, D_IN), lambda i: (0, 0)),    # z
                pl.BlockSpec((D_IN, D1), lambda i: (0, 0)),    # w1
                pl.BlockSpec((1, D1), lambda i: (0, 0)),       # b1
                pl.BlockSpec((D1, D2), lambda i: (0, 0)),      # w2
                pl.BlockSpec((1, D2), lambda i: (0, 0)),       # b2
                pl.BlockSpec((1, D3), lambda i: (0, 0)),       # b3
                pl.BlockSpec((1, D_OUT), lambda i: (0, 0)),    # b4
                pl.BlockSpec(memory_space=pl.ANY),             # w3 stays in HBM
                pl.BlockSpec(memory_space=pl.ANY),             # w4 stays in HBM
            ],
            out_specs=pl.BlockSpec((TB, D_OUT), lambda i: (0, 0)),
            scratch_shapes=[
                pltpu.VMEM((D2, D3), jnp.bfloat16),            # w3 landing buffer
                pltpu.VMEM((D3, D_OUT), jnp.bfloat16),         # w4 landing buffer
                pltpu.SemaphoreType.DMA((2,)),
            ],
            compiler_params=cparams,
        )(z_p, w1, b1, w2, b2, b3, b4, w3, w4)
    else:
        def const(shape):
            # Constant block index: fetched once and VMEM-resident across all
            # grid steps; Buffered(1) avoids wasting VMEM double-buffering a
            # block that never changes.
            return pl.BlockSpec(shape, lambda i: (0, 0),
                                pipeline_mode=pl.Buffered(1))

        out_p = pl.pallas_call(
            _mlp_kernel_tiled,
            out_shape=jax.ShapeDtypeStruct((B_pad, D_OUT), jnp.float32),
            grid=(B_pad // TB,),
            in_specs=[
                pl.BlockSpec((TB, D_IN), lambda i: (i, 0)),    # z: batch-tiled
                const((D_IN, D1)), const((1, D1)),
                const((D1, D2)), const((1, D2)),
                const((D2, D3)), const((1, D3)),
                const((D3, D_OUT)), const((1, D_OUT)),
            ],
            out_specs=pl.BlockSpec((TB, D_OUT), lambda i: (i, 0)),
            compiler_params=cparams,
        )(z_p, w1, b1, w2, b2, w3, b3, w4, b4)

    out = out_p[:B, : 28 * 28]
    return out.reshape(B, 1, 28, 28)


def reference_forward_bf16(z, params):
    """Plain-JAX reference matching the kernel's bf16-weight numerics."""
    h = z
    for i, (w, b) in enumerate(params):
        h = jnp.dot(h.astype(jnp.bfloat16), w.astype(jnp.bfloat16),
                    preferred_element_type=jnp.float32) + b
        h = jnp.maximum(h, 0.2 * h) if i < 3 else jnp.tanh(h)
    return h.reshape(z.shape[0], 1, 28, 28)


def reference_forward_f32(z, params):
    """Full-precision reference (original module semantics)."""
    h = z
    for i, (w, b) in enumerate(params):
        h = h @ w + b
        h = jnp.where(h > 0, h, 0.2 * h) if i < 3 else jnp.tanh(h)
    return h.reshape(z.shape[0], 1, 28, 28)


if __name__ == "__main__":
    key = jax.random.PRNGKey(0)
    params = init_params(key)
    prepared = prepare_params(params)   # one-time padding + bf16 cast

    batch = 2
    z = jax.random.normal(jax.random.fold_in(key, 100), (batch, 100), jnp.float32)

    out = jax.block_until_ready(generator_forward(z, prepared))
    assert out.shape == (batch, 1, 28, 28), out.shape

    # Tight check against a reference with identical (bf16-weight) numerics.
    ref_bf16 = reference_forward_bf16(z, params)
    assert jnp.allclose(out, ref_bf16, atol=5e-3, rtol=5e-3), float(
        jnp.max(jnp.abs(out - ref_bf16)))

    # Loose check against the full-f32 PyTorch-equivalent semantics.
    ref_f32 = reference_forward_f32(z, params)
    assert jnp.allclose(out, ref_f32, atol=5e-2, rtol=5e-2), float(
        jnp.max(jnp.abs(out - ref_f32)))

    print("KERNEL_OK")
</pallas_src>

<mosaic_0001>
module attributes {stable_mosaic.version = 11 : i64} {
  func.func @_mlp_kernel_small(%arg0: i32, %arg1: memref<16x128xbf16, #tpu.memory_space<vmem>>, %arg2: memref<128x256xbf16, #tpu.memory_space<vmem>>, %arg3: memref<1x256xf32, #tpu.memory_space<vmem>>, %arg4: memref<256x512xbf16, #tpu.memory_space<vmem>>, %arg5: memref<1x512xf32, #tpu.memory_space<vmem>>, %arg6: memref<1x1024xf32, #tpu.memory_space<vmem>>, %arg7: memref<1x896xf32, #tpu.memory_space<vmem>>, %arg8: memref<512x1024xbf16, #tpu.memory_space<any>>, %arg9: memref<1024x896xbf16, #tpu.memory_space<any>>, %arg10: memref<16x896xf32, #tpu.memory_space<vmem>>, %arg11: memref<512x1024xbf16, #tpu.memory_space<vmem>>, %arg12: memref<1024x896xbf16, #tpu.memory_space<vmem>>, %arg13: memref<2x!tpu.dma_semaphore, #tpu.memory_space<semaphore_mem>>) attributes {dimension_semantics = [#tpu.dimension_semantics<parallel>], iteration_bounds = array<i64: 1>, scalar_prefetch = 0 : i64, scratch_operands = 3 : i64, tpu.core_type = #tpu.core_type<tc>, window_params = [{pipeline_mode = #tpu.pipeline_mode<synchronous>, transform_indices = @transform_0, window_bounds = array<i64: 16, 128>}, {pipeline_mode = #tpu.pipeline_mode<synchronous>, transform_indices = @transform_1, window_bounds = array<i64: 128, 256>}, {pipeline_mode = #tpu.pipeline_mode<synchronous>, transform_indices = @transform_2, window_bounds = array<i64: 1, 256>}, {pipeline_mode = #tpu.pipeline_mode<synchronous>, transform_indices = @transform_3, window_bounds = array<i64: 256, 512>}, {pipeline_mode = #tpu.pipeline_mode<synchronous>, transform_indices = @transform_4, window_bounds = array<i64: 1, 512>}, {pipeline_mode = #tpu.pipeline_mode<synchronous>, transform_indices = @transform_5, window_bounds = array<i64: 1, 1024>}, {pipeline_mode = #tpu.pipeline_mode<synchronous>, transform_indices = @transform_6, window_bounds = array<i64: 1, 896>}, {}, {}, {pipeline_mode = #tpu.pipeline_mode<synchronous>, transform_indices = @transform_9, window_bounds = array<i64: 16, 896>}]} {
    %c0_i32 = arith.constant 0 : i32
    %0 = tpu.memref_slice %arg13[%c0_i32] : memref<2x!tpu.dma_semaphore, #tpu.memory_space<semaphore_mem>> -> memref<1x!tpu.dma_semaphore, #tpu.memory_space<semaphore_mem>>
    %1 = tpu.memref_squeeze %0 : memref<1x!tpu.dma_semaphore, #tpu.memory_space<semaphore_mem>> -> memref<!tpu.dma_semaphore, #tpu.memory_space<semaphore_mem>>
    tpu.enqueue_dma source(%arg8 : memref<512x1024xbf16, #tpu.memory_space<any>>) target(%arg11 : memref<512x1024xbf16, #tpu.memory_space<vmem>>) target_semaphore(%1 : memref<!tpu.dma_semaphore, #tpu.memory_space<semaphore_mem>>)
    %c1_i32 = arith.constant 1 : i32
    %2 = tpu.memref_slice %arg13[%c1_i32] : memref<2x!tpu.dma_semaphore, #tpu.memory_space<semaphore_mem>> -> memref<1x!tpu.dma_semaphore, #tpu.memory_space<semaphore_mem>>
    %3 = tpu.memref_squeeze %2 : memref<1x!tpu.dma_semaphore, #tpu.memory_space<semaphore_mem>> -> memref<!tpu.dma_semaphore, #tpu.memory_space<semaphore_mem>>
    tpu.enqueue_dma source(%arg9 : memref<1024x896xbf16, #tpu.memory_space<any>>) target(%arg12 : memref<1024x896xbf16, #tpu.memory_space<vmem>>) target_semaphore(%3 : memref<!tpu.dma_semaphore, #tpu.memory_space<semaphore_mem>>)
    %c0 = arith.constant 0 : index
    %c0_0 = arith.constant 0 : index
    %4 = vector.load %arg1[%c0, %c0_0] : memref<16x128xbf16, #tpu.memory_space<vmem>>, vector<16x128xbf16>
    %c0_1 = arith.constant 0 : index
    %c0_2 = arith.constant 0 : index
    %5 = vector.load %arg2[%c0_1, %c0_2] : memref<128x256xbf16, #tpu.memory_space<vmem>>, vector<128x256xbf16>
    %cst = arith.constant dense<0.000000e+00> : vector<16x256xf32>
    %6 = tpu.matmul %4, %5, %cst {dimension_numbers = #tpu.dot_dimension_numbers<[1], [0], [0], [1], [0, 0, 1, 1], [], []>} : vector<16x128xbf16>, vector<128x256xbf16>, vector<16x256xf32> -> vector<16x256xf32>
    %c0_3 = arith.constant 0 : index
    %c0_4 = arith.constant 0 : index
    %7 = vector.load %arg3[%c0_3, %c0_4] : memref<1x256xf32, #tpu.memory_space<vmem>>, vector<1x256xf32>
    %8 = vector.broadcast %7 : vector<1x256xf32> to vector<16x256xf32>
    %9 = arith.addf %6, %8 : vector<16x256xf32>
    %cst_5 = arith.constant 2.000000e-01 : f32
    %10 = vector.broadcast %cst_5 : f32 to vector<16x256xf32>
    %11 = arith.mulf %10, %9 : vector<16x256xf32>
    %12 = arith.maximumf %9, %11 : vector<16x256xf32>
    %13 = arith.truncf %12 : vector<16x256xf32> to vector<16x256xbf16>
    %c0_6 = arith.constant 0 : index
    %c0_7 = arith.constant 0 : index
    %14 = vector.load %arg4[%c0_6, %c0_7] : memref<256x512xbf16, #tpu.memory_space<vmem>>, vector<256x512xbf16>
    %cst_8 = arith.constant dense<0.000000e+00> : vector<16x512xf32>
    %15 = tpu.matmul %13, %14, %cst_8 {dimension_numbers = #tpu.dot_dimension_numbers<[1], [0], [0], [1], [0, 0, 1, 1], [], []>} : vector<16x256xbf16>, vector<256x512xbf16>, vector<16x512xf32> -> vector<16x512xf32>
    %c0_9 = arith.constant 0 : index
    %c0_10 = arith.constant 0 : index
    %16 = vector.load %arg5[%c0_9, %c0_10] : memref<1x512xf32, #tpu.memory_space<vmem>>, vector<1x512xf32>
    %17 = vector.broadcast %16 : vector<1x512xf32> to vector<16x512xf32>
    %18 = arith.addf %15, %17 : vector<16x512xf32>
    %cst_11 = arith.constant 2.000000e-01 : f32
    %19 = vector.broadcast %cst_11 : f32 to vector<16x512xf32>
    %20 = arith.mulf %19, %18 : vector<16x512xf32>
    %21 = arith.maximumf %18, %20 : vector<16x512xf32>
    %c0_i32_12 = arith.constant 0 : i32
    %22 = tpu.memref_slice %arg13[%c0_i32_12] : memref<2x!tpu.dma_semaphore, #tpu.memory_space<semaphore_mem>> -> memref<1x!tpu.dma_semaphore, #tpu.memory_space<semaphore_mem>>
    %23 = tpu.memref_squeeze %22 : memref<1x!tpu.dma_semaphore, #tpu.memory_space<semaphore_mem>> -> memref<!tpu.dma_semaphore, #tpu.memory_space<semaphore_mem>>
    tpu.wait_dma2 semaphore(%23 : memref<!tpu.dma_semaphore, #tpu.memory_space<semaphore_mem>>) src(%arg8 : memref<512x1024xbf16, #tpu.memory_space<any>>) dst(%arg11 : memref<512x1024xbf16, #tpu.memory_space<vmem>>)
    %24 = arith.truncf %21 : vector<16x512xf32> to vector<16x512xbf16>
    %c0_13 = arith.constant 0 : index
    %c0_14 = arith.constant 0 : index
    %25 = vector.load %arg11[%c0_13, %c0_14] : memref<512x1024xbf16, #tpu.memory_space<vmem>>, vector<512x1024xbf16>
    %cst_15 = arith.constant dense<0.000000e+00> : vector<16x1024xf32>
    %26 = tpu.matmul %24, %25, %cst_15 {dimension_numbers = #tpu.dot_dimension_numbers<[1], [0], [0], [1], [0, 0, 1, 1], [], []>} : vector<16x512xbf16>, vector<512x1024xbf16>, vector<16x1024xf32> -> vector<16x1024xf32>
    %c0_16 = arith.constant 0 : index
    %c0_17 = arith.constant 0 : index
    %27 = vector.load %arg6[%c0_16, %c0_17] : memref<1x1024xf32, #tpu.memory_space<vmem>>, vector<1x1024xf32>
    %28 = vector.broadcast %27 : vector<1x1024xf32> to vector<16x1024xf32>
    %29 = arith.addf %26, %28 : vector<16x1024xf32>
    %cst_18 = arith.constant 2.000000e-01 : f32
    %30 = vector.broadcast %cst_18 : f32 to vector<16x1024xf32>
    %31 = arith.mulf %30, %29 : vector<16x1024xf32>
    %32 = arith.maximumf %29, %31 : vector<16x1024xf32>
    %c1_i32_19 = arith.constant 1 : i32
    %33 = tpu.memref_slice %arg13[%c1_i32_19] : memref<2x!tpu.dma_semaphore, #tpu.memory_space<semaphore_mem>> -> memref<1x!tpu.dma_semaphore, #tpu.memory_space<semaphore_mem>>
    %34 = tpu.memref_squeeze %33 : memref<1x!tpu.dma_semaphore, #tpu.memory_space<semaphore_mem>> -> memref<!tpu.dma_semaphore, #tpu.memory_space<semaphore_mem>>
    tpu.wait_dma2 semaphore(%34 : memref<!tpu.dma_semaphore, #tpu.memory_space<semaphore_mem>>) src(%arg9 : memref<1024x896xbf16, #tpu.memory_space<any>>) dst(%arg12 : memref<1024x896xbf16, #tpu.memory_space<vmem>>)
    %35 = arith.truncf %32 : vector<16x1024xf32> to vector<16x1024xbf16>
    %c0_20 = arith.constant 0 : index
    %c0_21 = arith.constant 0 : index
    %36 = vector.load %arg12[%c0_20, %c0_21] : memref<1024x896xbf16, #tpu.memory_space<vmem>>, vector<1024x896xbf16>
    %cst_22 = arith.constant dense<0.000000e+00> : vector<16x896xf32>
    %37 = tpu.matmul %35, %36, %cst_22 {dimension_numbers = #tpu.dot_dimension_numbers<[1], [0], [0], [1], [0, 0, 1, 1], [], []>} : vector<16x1024xbf16>, vector<1024x896xbf16>, vector<16x896xf32> -> vector<16x896xf32>
    %c0_23 = arith.constant 0 : index
    %c0_24 = arith.constant 0 : index
    %38 = vector.load %arg7[%c0_23, %c0_24] : memref<1x896xf32, #tpu.memory_space<vmem>>, vector<1x896xf32>
    %39 = vector.broadcast %38 : vector<1x896xf32> to vector<16x896xf32>
    %40 = arith.addf %37, %39 : vector<16x896xf32>
    %41 = math.tanh %40 : vector<16x896xf32>
    %c0_25 = arith.constant 0 : index
    %c0_26 = arith.constant 0 : index
    %42 = vector.load %arg10[%c0_25, %c0_26] : memref<16x896xf32, #tpu.memory_space<vmem>>, vector<16x896xf32>
    tpu.vector_store %arg10[%c0_25, %c0_26], %41 {strides = array<i32>} : memref<16x896xf32, #tpu.memory_space<vmem>>, vector<16x896xf32>,
    return
  }
  func.func @transform_0(%arg0: i32) -> (i32, i32) {
    %c0_i32 = arith.constant 0 : i32
    %c0_i32_0 = arith.constant 0 : i32
    %c0_i32_1 = arith.constant 0 : i32
    return %c0_i32, %c0_i32_0 : i32, i32
  }
  func.func @transform_1(%arg0: i32) -> (i32, i32) {
    %c0_i32 = arith.constant 0 : i32
    %c0_i32_0 = arith.constant 0 : i32
    %c0_i32_1 = arith.constant 0 : i32
    return %c0_i32, %c0_i32_0 : i32, i32
  }
  func.func @transform_2(%arg0: i32) -> (i32, i32) {
    %c0_i32 = arith.constant 0 : i32
    %c0_i32_0 = arith.constant 0 : i32
    %c0_i32_1 = arith.constant 0 : i32
    return %c0_i32, %c0_i32_0 : i32, i32
  }
  func.func @transform_3(%arg0: i32) -> (i32, i32) {
    %c0_i32 = arith.constant 0 : i32
    %c0_i32_0 = arith.constant 0 : i32
    %c0_i32_1 = arith.constant 0 : i32
    return %c0_i32, %c0_i32_0 : i32, i32
  }
  func.func @transform_4(%arg0: i32) -> (i32, i32) {
    %c0_i32 = arith.constant 0 : i32
    %c0_i32_0 = arith.constant 0 : i32
    %c0_i32_1 = arith.constant 0 : i32
    return %c0_i32, %c0_i32_0 : i32, i32
  }
  func.func @transform_5(%arg0: i32) -> (i32, i32) {
    %c0_i32 = arith.constant 0 : i32
    %c0_i32_0 = arith.constant 0 : i32
    %c0_i32_1 = arith.constant 0 : i32
    return %c0_i32, %c0_i32_0 : i32, i32
  }
  func.func @transform_6(%arg0: i32) -> (i32, i32) {
    %c0_i32 = arith.constant 0 : i32
    %c0_i32_0 = arith.constant 0 : i32
    %c0_i32_1 = arith.constant 0 : i32
    return %c0_i32, %c0_i32_0 : i32, i32
  }
  func.func @transform_9(%arg0: i32) -> (i32, i32) {
    %c0_i32 = arith.constant 0 : i32
    %c0_i32_0 = arith.constant 0 : i32
    %c0_i32_1 = arith.constant 0 : i32
    return %c0_i32, %c0_i32_0 : i32, i32
  }
}

</mosaic_0001>

<bundles_post_ra>
// kernel: generator_forward.1
= control target key start
LH: loop header
LB: loop body
LE: loop exit
PB: predicated region body
PF: predicated region fallthrough
CT: control target
= control target key end

     0   :  { %14 = vsyncpa [#allocation6], 0  ;;  %s8669_s0 = inlined_call_operand.vmem [shape: bf16[16,128], index: 0, kind: input, shape index: {}]   ;;  %s8670_s1 = inlined_call_operand.hbm [shape: bf16[128,256], index: 1, kind: input, shape index: {}]   ;;  %s8671_s2 = inlined_call_operand.hbm [shape: f32[1,256], index: 2, kind: input, shape index: {}]   ;;  %s8672_s3 = inlined_call_operand.hbm [shape: bf16[256,512], index: 3, kind: input, shape index: {}]   ;;  %s8673_s4 = inlined_call_operand.hbm [shape: f32[1,512], index: 4, kind: input, shape index: {}]   ;;  %s8674_s5 = inlined_call_operand.hbm [shape: f32[1,1024], index: 5, kind: input, shape index: {}]   ;;  %s8675_s6 = inlined_call_operand.hbm [shape: f32[1,896], index: 6, kind: input, shape index: {}]   ;;  %s8676_s7 = inlined_call_operand.hbm [shape: bf16[512,1024], index: 7, kind: input, shape index: {}]   ;;  %s8677_s8 = inlined_call_operand.hbm [shape: bf16[1024,896], index: 8, kind: input, shape index: {}]   ;;  %s8678_s9 = inlined_call_operand.vmem [shape: f32[16,896], index: 9, kind: output, shape index: {}]  }
   0x1   :  { %15 = vsyncpa [#allocation8], 0 }
   0x2   :  { %16 = vsyncpa [#allocation11], 0 }
   0x3   :  { %17 = vsyncpa [#allocation14], 0  ;;  %s8208_s30 = smov [#allocation7]   ;;  %s8209_s11 = smov [#allocation10]  }
   0x4   :  { %s38_s10 = sshll.u32 %s8208_s30, 4  ;;  %s60_s12 = sshll.u32 %s8209_s11, 4  ;;  %s39_s10 = int_to_ptr.vmem [resolvable:$true] %s38_s10  ;;  %s61_s12 = int_to_ptr.vmem [resolvable:$true] %s60_s12 }
   0x5   :  { %s8044_s13 = scalar_lea.vmem %s39_s10, 32  ;;  %p8049_p1 = scmp.lt.s32.totalorder %s39_s10, %s39_s10 }
   0x6   :  { %p8045_p0 = scmp.ne.s32.totalorder %s39_s10, %s8044_s13  ;;  %p8050_p2 = scmp.lt.s32.totalorder %s8044_s13, %s8044_s13 }
   0x8   :  { %p8051_p3 = por %p8050_p2, %p8049_p1 }
   0xa   :  { %p8052_p4 = pnand %p8051_p3, %p8045_p0 }
   0xc   :  { %8055 = shalt.err (!%p8052_p4)
}
   0xd   :  { %41 = dma.hbm_to_vmem [thread:$0]  %s8671_s2, 32, %s39_s10, [#allocation8]  }
   0xe   :  { %s8064_s16 = scalar_lea.vmem %s61_s12, 64  ;;  %p8069_p6 = scmp.lt.s32.totalorder %s61_s12, %s61_s12 }
   0xf   :  { %p8065_p5 = scmp.ne.s32.totalorder %s61_s12, %s8064_s16  ;;  %p8070_p7 = scmp.lt.s32.totalorder %s8064_s16, %s8064_s16 }
  0x11   :  { %p8071_p8 = por %p8070_p7, %p8069_p6 }
  0x13   :  { %p8072_p9 = pnand %p8071_p8, %p8065_p5 }
  0x15   :  { %8075 = shalt.err (!%p8072_p9)
}
  0x16   :  { %63 = dma.hbm_to_vmem [thread:$0]  %s8673_s4, 64, %s61_s12, [#allocation11]  }
  0x17   :  { %s8210_s19 = smov [#allocation5]  }
  0x18   :  { %s25_s20 = sshll.u32 %s8210_s19, 4  ;;  %s26_s20 = int_to_ptr.vmem [resolvable:$true] %s25_s20 }
  0x19   :  { %s8084_s21 = scalar_lea.vmem %s26_s20, 2048  ;;  %p8089_p11 = scmp.lt.s32.totalorder %s26_s20, %s26_s20 }
  0x1a   :  { %p8085_p10 = scmp.ne.s32.totalorder %s26_s20, %s8084_s21  ;;  %p8090_p12 = scmp.lt.s32.totalorder %s8084_s21, %s8084_s21 }
  0x1c   :  { %p8091_p13 = por %p8090_p12, %p8089_p11 }
  0x1e   :  { %p8092_p0 = pnand %p8091_p13, %p8085_p10 }
  0x20   :  { %8095 = shalt.err (!%p8092_p0)
}
  0x21   :  { %s8211_s2 = smov 128   ;;  %s8212_s22 = smov 8  }
  0x22   :  { %31 = dma.hbm_to_vmem [thread:$0]  %s8670_s1, 2048, %s26_s20, [#allocation6], %s8211_s2, %s8211_s2, %s8212_s22  }
  0x23   :  { %s8213_s25 = smov [#allocation9]  }
  0x24   :  { %s47_s26 = sshll.u32 %s8213_s25, 4  ;;  %s48_s26 = int_to_ptr.vmem [resolvable:$true] %s47_s26 }
  0x25   :  { %s8104_s4 = scalar_lea.vmem %s48_s26, 8192  ;;  %p8109_p2 = scmp.lt.s32.totalorder %s48_s26, %s48_s26 }
  0x26   :  { %p8105_p1 = scmp.ne.s32.totalorder %s48_s26, %s8104_s4  ;;  %p8110_p3 = scmp.lt.s32.totalorder %s8104_s4, %s8104_s4 }
  0x28   :  { %p8111_p4 = por %p8110_p3, %p8109_p2 }
  0x2a   :  { %p8112_p5 = pnand %p8111_p4, %p8105_p1 }
  0x2c   :  { %8115 = shalt.err (!%p8112_p5)
}
  0x2d   :  { %s8214_s27 = smov 256   ;;  %s8215_s28 = smov 16  }
  0x2e   :  { %53 = dma.hbm_to_vmem [thread:$0]  %s8672_s3, 8192, %s48_s26, [#allocation8], %s8214_s27, %s8214_s27, %s8215_s28  }
  0x2f   :  { %s8216_s10 = smov [#allocation12]   ;;  %s8217_s12 = smov [#allocation13]  }
  0x30   :  { %s70_s11 = sshll.u32 %s8216_s10, 4  ;;  %s80_s1 = sshll.u32 %s8217_s12, 4  ;;  %s71_s11 = int_to_ptr.vmem [resolvable:$true] %s70_s11  ;;  %s81_s1 = int_to_ptr.vmem [resolvable:$true] %s80_s1 }
  0x31   :  { %s8124_s13 = scalar_lea.vmem %s71_s11, 128  ;;  %p8129_p7 = scmp.lt.s32.totalorder %s71_s11, %s71_s11 }
  0x32   :  { %p8125_p6 = scmp.ne.s32.totalorder %s71_s11, %s8124_s13  ;;  %p8130_p8 = scmp.lt.s32.totalorder %s8124_s13, %s8124_s13 }
  0x34   :  { %p8131_p9 = por %p8130_p8, %p8129_p7 }
  0x36   :  { %p8132_p10 = pnand %p8131_p9, %p8125_p6 }
  0x38   :  { %8135 = shalt.err (!%p8132_p10)
}
  0x39   :  { %73 = dma.hbm_to_vmem [thread:$0]  %s8674_s5, 128, %s71_s11, [#allocation11]  }
  0x3a   :  { %s8144_s16 = scalar_lea.vmem %s81_s1, 112  ;;  %s8148_s3 = scalar_lea.vmem %s81_s1, 128 }
  0x3b   :  { %p8145_p11 = scmp.ne.s32.totalorder %s81_s1, %s8144_s16  ;;  %p8149_p12 = scmp.lt.s32.totalorder %s81_s1, %s81_s1 }
  0x3c   :  { %p8150_p13 = scmp.lt.s32.totalorder %s8148_s3, %s8144_s16 }
  0x3e   :  { %p8151_p0 = por %p8150_p13, %p8149_p12 }
  0x40   :  { %p8152_p1 = pnand %p8151_p0, %p8145_p11 }
  0x42   :  { %8155 = shalt.err (!%p8152_p1)
}
  0x43   :  { %83 = dma.hbm_to_vmem [thread:$0]  %s8675_s6, 112, %s81_s1, [#allocation14]  }
  0x44   :  { %8196 = dma.done.wait [#allocation6], 2048  }
  0x45   :  { %8197 = vsyncadd [#allocation6], 4294965248 }
  0x46   :  { %8198 = dma.done.wait [#allocation8], 8224  }
  0x47   :  { %8199 = vsyncadd [#allocation8], 4294959072 }
  0x48   :  { %8200 = dma.done.wait [#allocation11], 192  }
  0x49   :  { %8201 = vsyncadd [#allocation11], 4294967104 }
  0x4a   :  { %8202 = dma.done.wait [#allocation14], 112  }
  0x4b   :  { %8203 = vsyncadd [#allocation14], 4294967184  ;;  %v8218_v0 = vmov 0   ;;  %v7247_v1 = vld [vmem:[#allocation5 + $0x74] ss:$8 sps:$4 sm:$0xff]   ;;  %v7271_v29 = vld [vmem:[%s8669_s0] sm:$0xff]  }
  0x4c   :  { %274 = vmatprep.mubr.bf16.mxu0 %v8218_v0  ;;  %v7249_v2 = vld [vmem:[#allocation5 + $0x70] ss:$8 sps:$4 sm:$0xff]   ;;  %242 = vmatprep.subr.bf16.mxu0 %v7247_v1  ;;  %v7250_v3 = vld [vmem:[#allocation5 + $0x64] ss:$8 sps:$4 sm:$0xff]   ;;  %v7252_v4 = vld [vmem:[#allocation5 + $0x60] ss:$8 sps:$4 sm:$0xff]  }
  0x4d   :  { %243 = vmatpush1.bf16.msra.mxu0 %v7249_v2  ;;  %v7253_v5 = vld [vmem:[#allocation5 + $0x54] ss:$8 sps:$4 sm:$0xff]   ;;  %v7255_v6 = vld [vmem:[#allocation5 + $0x50] ss:$8 sps:$4 sm:$0xff]   ;;  %v7256_v7 = vld [vmem:[#allocation5 + $0x44] ss:$8 sps:$4 sm:$0xff]  }
  0x4e   :  { %244 = vmatprep.subr.bf16.mxu0 %v7250_v3  ;;  %v7258_v8 = vld [vmem:[#allocation5 + $0x40] ss:$8 sps:$4 sm:$0xff]   ;;  %v7259_v9 = vld [vmem:[#allocation5 + $0x34] ss:$8 sps:$4 sm:$0xff]   ;;  %v7261_v11 = vld [vmem:[#allocation5 + $0x30] ss:$8 sps:$4 sm:$0xff]  }
  0x4f   :  { %v7272_v10 = vld [vmem:[#allocation9 + $0xe4] ss:$16 sps:$4 sm:$0xff]   ;;  %v7277_v12 = vld [vmem:[#allocation9 + $0xe0] ss:$16 sps:$4 sm:$0xff]   ;;  %v7276_v26 = vld [vmem:[#allocation9 + $0xec] ss:$16 sps:$4 sm:$0xff]  }
  0x50   :  { %701 = vmatprep.subr.bf16.mxu1 %v7272_v10  ;;  %v7278_v13 = vld [vmem:[#allocation9 + $0xc4] ss:$16 sps:$4 sm:$0xff]   ;;  %v7283_v15 = vld [vmem:[#allocation9 + $0xc0] ss:$16 sps:$4 sm:$0xff]   ;;  %v7274_v30 = vld [vmem:[#allocation9 + $0xe8] ss:$16 sps:$4 sm:$0xff]  }
  0x51   :  { %245 = vmatpush1.bf16.msra.mxu0 %v7252_v4  ;;  %v7262_v14 = vld [vmem:[#allocation5 + $0x24] ss:$8 sps:$4 sm:$0xff]   ;;  %702 = vmatpush1.bf16.msra.mxu1 %v7277_v12  ;;  %v7264_v17 = vld [vmem:[#allocation5 + $0x20] ss:$8 sps:$4 sm:$0xff]   ;;  %v7265_v18 = vld [vmem:[#allocation5 + $0x14] ss:$8 sps:$4 sm:$0xff]  }
  0x52   :  { %246 = vmatprep.subr.bf16.mxu0 %v7253_v5  ;;  %703 = vmatprep.subr.bf16.mxu1 %v7278_v13  ;;  %v7284_v16 = vld [vmem:[#allocation9 + $0xa4] ss:$16 sps:$4 sm:$0xff]   ;;  %v7289_v19 = vld [vmem:[#allocation9 + $0xa0] ss:$16 sps:$4 sm:$0xff]   ;;  %v7282_v31 = vld [vmem:[#allocation9 + $0xcc] ss:$16 sps:$4 sm:$0xff]  }
  0x53   :  { %v7290_v20 = vld [vmem:[#allocation9 + $0x84] ss:$16 sps:$4 sm:$0xff]   ;;  %v7295_v23 = vld [vmem:[#allocation9 + $0x80] ss:$16 sps:$4 sm:$0xff]   ;;  %v7280_v34 = vld [vmem:[#allocation9 + $0xc8] ss:$16 sps:$4 sm:$0xff]  }
  0x54   :  { %v7267_v21 = vld [vmem:[#allocation5 + $0x10] ss:$8 sps:$4 sm:$0xff]   ;;  %v7268_v22 = vld [vmem:[#allocation5 + $0x4] ss:$8 sps:$4 sm:$0xff]   ;;  %v7270_v25 = vld [vmem:[#allocation5] ss:$8 sps:$4 sm:$0xff]  }
  0x55   :  { %247 = vmatpush1.bf16.msra.mxu0 %v7255_v6  ;;  %704 = vmatpush1.bf16.msra.mxu1 %v7283_v15  ;;  %v7296_v24 = vld [vmem:[#allocation9 + $0x64] ss:$16 sps:$4 sm:$0xff]   ;;  %v7301_v27 = vld [vmem:[#allocation9 + $0x60] ss:$16 sps:$4 sm:$0xff]   ;;  %v7288_v35 = vld [vmem:[#allocation9 + $0xac] ss:$16 sps:$4 sm:$0xff]  }
  0x56   :  { %248 = vmatprep.subr.bf16.mxu0 %v7256_v7  ;;  %705 = vmatprep.subr.bf16.mxu1 %v7284_v16  ;;  %v7302_v28 = vld [vmem:[#allocation9 + $0x44] ss:$16 sps:$4 sm:$0xff]   ;;  %v7307_v32 = vld [vmem:[#allocation9 + $0x40] ss:$16 sps:$4 sm:$0xff]   ;;  %v7286_v38 = vld [vmem:[#allocation9 + $0xa8] ss:$16 sps:$4 sm:$0xff]  }
  0x57   :  { %v7308_v33 = vld [vmem:[#allocation9 + $0x24] ss:$16 sps:$4 sm:$0xff]   ;;  %v7313_v36 = vld [vmem:[#allocation9 + $0x20] ss:$16 sps:$4 sm:$0xff]   ;;  %v7294_v39 = vld [vmem:[#allocation9 + $0x8c] ss:$16 sps:$4 sm:$0xff]  }
  0x58   :  { %v7314_v37 = vld [vmem:[#allocation9 + $0x4] ss:$16 sps:$4 sm:$0xff]   ;;  %v7319_v40 = vld [vmem:[#allocation9] ss:$16 sps:$4 sm:$0xff]   ;;  %v7292_v42 = vld [vmem:[#allocation9 + $0x88] ss:$16 sps:$4 sm:$0xff]  }
  0x59   :  { %249 = vmatpush1.bf16.msra.mxu0 %v7258_v8  ;;  %706 = vmatpush1.bf16.msra.mxu1 %v7289_v19  ;;  %v7320_v41 = vld [vmem:[#allocation9 + $0x1e4] ss:$16 sps:$4 sm:$0xff]   ;;  %v7300_v43 = vld [vmem:[#allocation9 + $0x6c] ss:$16 sps:$4 sm:$0xff]   ;;  %v7325_v44 = vld [vmem:[#allocation9 + $0x1e0] ss:$16 sps:$4 sm:$0xff]  }
  0x5a   :  { %250 = vmatprep.subr.bf16.mxu0 %v7259_v9  ;;  %707 = vmatprep.subr.bf16.mxu1 %v7290_v20  ;;  %v7326_v45 = vld [vmem:[#allocation9 + $0x1c4] ss:$16 sps:$4 sm:$0xff]   ;;  %v7298_v46 = vld [vmem:[#allocation9 + $0x68] ss:$16 sps:$4 sm:$0xff]   ;;  %v7306_v47 = vld [vmem:[#allocation9 + $0x4c] ss:$16 sps:$4 sm:$0xff]  }
  0x5b   :  { %v7331_v48 = vld [vmem:[#allocation9 + $0x1c0] ss:$16 sps:$4 sm:$0xff]   ;;  %v7332_v49 = vld [vmem:[#allocation9 + $0x1a4] ss:$16 sps:$4 sm:$0xff]   ;;  %v7304_v50 = vld [vmem:[#allocation9 + $0x48] ss:$16 sps:$4 sm:$0xff]  }
  0x5c   :  { %v7312_v51 = vld [vmem:[#allocation9 + $0x2c] ss:$16 sps:$4 sm:$0xff]   ;;  %v7337_v52 = vld [vmem:[#allocation9 + $0x1a0] ss:$16 sps:$4 sm:$0xff]   ;;  %v7338_v53 = vld [vmem:[#allocation9 + $0x184] ss:$16 sps:$4 sm:$0xff]  }
  0x5d   :  { %251 = vmatpush1.bf16.msra.mxu0 %v7261_v11  ;;  %708 = vmatpush1.bf16.msra.mxu1 %v7295_v23  ;;  %v7310_v54 = vld [vmem:[#allocation9 + $0x28] ss:$16 sps:$4 sm:$0xff]   ;;  %v7318_v55 = vld [vmem:[#allocation9 + $0xc] ss:$16 sps:$4 sm:$0xff]   ;;  %v7343_v56 = vld [vmem:[#allocation9 + $0x180] ss:$16 sps:$4 sm:$0xff]  }
  0x5e   :  { %252 = vmatprep.subr.bf16.mxu0 %v7262_v14  ;;  %709 = vmatprep.subr.bf16.mxu1 %v7296_v24  ;;  %v7316_v57 = vld [vmem:[#allocation9 + $0x8] ss:$16 sps:$4 sm:$0xff]   ;;  %v7324_v58 = vld [vmem:[#allocation9 + $0x1ec] ss:$16 sps:$4 sm:$0xff]   ;;  %v7344_v2 = vld [vmem:[#allocation9 + $0x164] ss:$16 sps:$4 sm:$0xff]  }
  0x5f   :  { %v7322_v59 = vld [vmem:[#allocation9 + $0x1e8] ss:$16 sps:$4 sm:$0xff]   ;;  %v7330_v60 = vld [vmem:[#allocation9 + $0x1cc] ss:$16 sps:$4 sm:$0xff]   ;;  %v7349_v5 = vld [vmem:[#allocation9 + $0x160] ss:$16 sps:$4 sm:$0xff]  }
  0x60   :  { %v7328_v61 = vld [vmem:[#allocation9 + $0x1c8] ss:$16 sps:$4 sm:$0xff]   ;;  %v7336_v62 = vld [vmem:[#allocation9 + $0x1ac] ss:$16 sps:$4 sm:$0xff]   ;;  %v7350_v6 = vld [vmem:[#allocation9 + $0x144] ss:$16 sps:$4 sm:$0xff]  }
  0x61   :  { %253 = vmatpush1.bf16.msra.mxu0 %v7264_v17  ;;  %710 = vmatpush1.bf16.msra.mxu1 %v7301_v27  ;;  %v7334_v63 = vld [vmem:[#allocation9 + $0x1a8] ss:$16 sps:$4 sm:$0xff]   ;;  %v7342_v0 = vld [vmem:[#allocation9 + $0x18c] ss:$16 sps:$4 sm:$0xff]   ;;  %v7355_v9 = vld [vmem:[#allocation9 + $0x140] ss:$16 sps:$4 sm:$0xff]  }
  0x62   :  { %254 = vmatprep.subr.bf16.mxu0 %v7265_v18  ;;  %711 = vmatprep.subr.bf16.mxu1 %v7302_v28  ;;  %v7340_v1 = vld [vmem:[#allocation9 + $0x188] ss:$16 sps:$4 sm:$0xff]   ;;  %v7348_v3 = vld [vmem:[#allocation9 + $0x16c] ss:$16 sps:$4 sm:$0xff]   ;;  %v7356_v10 = vld [vmem:[#allocation9 + $0x124] ss:$16 sps:$4 sm:$0xff]   ;;  %v146_v18 = vlaneseq }
  0x63   :  { %v7346_v4 = vld [vmem:[#allocation9 + $0x168] ss:$16 sps:$4 sm:$0xff]   ;;  %v7354_v7 = vld [vmem:[#allocation9 + $0x14c] ss:$16 sps:$4 sm:$0xff]   ;;  %v7361_v13 = vld [vmem:[#allocation9 + $0x120] ss:$16 sps:$4 sm:$0xff]  }
  0x64   :  { %v7352_v8 = vld [vmem:[#allocation9 + $0x148] ss:$16 sps:$4 sm:$0xff]   ;;  %v7360_v11 = vld [vmem:[#allocation9 + $0x12c] ss:$16 sps:$4 sm:$0xff]   ;;  %v7362_v14 = vld [vmem:[#allocation9 + $0x104] ss:$16 sps:$4 sm:$0xff]  }
  0x65   :  { %255 = vmatpush1.bf16.msra.mxu0 %v7267_v21  ;;  %712 = vmatpush1.bf16.msra.mxu1 %v7307_v32  ;;  %v7358_v12 = vld [vmem:[#allocation9 + $0x128] ss:$16 sps:$4 sm:$0xff]   ;;  %v7366_v15 = vld [vmem:[#allocation9 + $0x10c] ss:$16 sps:$4 sm:$0xff]   ;;  %v7367_v17 = vld [vmem:[#allocation9 + $0x100] ss:$16 sps:$4 sm:$0xff]  }
  0x66   :  { %256 = vmatprep.subr.bf16.mxu0 %v7268_v22  ;;  %713 = vmatprep.subr.bf16.mxu1 %v7308_v33  ;;  %v7364_v16 = vld [vmem:[#allocation9 + $0x108] ss:$16 sps:$4 sm:$0xff]   ;;  %v8292_v19 = vshrl.u32 %v146_v18, 7  ;;  %v144_v22 = vld [vmem:[#allocation7] sm:$0x3]  ;;  %s8219_s0 = smov [#allocation2]  }
  0x67   :  { %s110_s19 = sshll.u32 %s8219_s0, 4  ;;  %s8220_s20 = smov [#allocation3]   ;;  %s111_s19 = int_to_ptr.vmem [resolvable:$true] %s110_s19 }
  0x68   :  { %v8295_v20 = vsub.s32 1, %v8292_v19  ;;  %v8298_v21 = vsub.s32 0, %v8292_v19  ;;  %s122_s21 = sshll.u32 %s8220_s20, 4  ;;  %s8164_s2 = scalar_lea.vmem %s111_s19, 32768  ;;  %s123_s21 = int_to_ptr.vmem [resolvable:$true] %s122_s21 }
  0x69   :  { %257 = vmatpush1.bf16.msra.mxu0 %v7270_v25  ;;  %714 = vmatpush1.bf16.msra.mxu1 %v7313_v36  ;;  %p8165_p2 = scmp.ne.s32.totalorder %s111_s19, %s8164_s2  ;;  %p8169_p3 = scmp.lt.s32.totalorder %s111_s19, %s111_s19 }
  0x6a   :  { %744 = vmatprep.subr.bf16.mxu0 %v7276_v26  ;;  %715 = vmatprep.subr.bf16.mxu1 %v7314_v37  ;;  %v153_v23 = vrot.slane %v144_v22, %v8295_v20  ;;  %v149_v24 = vrot.slane %v144_v22, %v8298_v21  ;;  %p8170_p4 = scmp.lt.s32.totalorder %s8164_s2, %s8164_s2 }
  0x6c   :  { %275 = vmatmul.mubr.bf16.vlgmr.msra.gmra.mxu0 %v7271_v29  ;;  %p8171_p5 = por %p8170_p4, %p8169_p3 }
  0x6d   :  { %745 = vmatpush1.bf16.msra.mxu0 %v7274_v30  ;;  %716 = vmatpush1.bf16.msra.mxu1 %v7319_v40 }
  0x6e   :  { %746 = vmatprep.subr.bf16.mxu0 %v7282_v31  ;;  %717 = vmatprep.subr.bf16.mxu1 %v7320_v41  ;;  %p8172_p6 = pnand %p8171_p5, %p8165_p2 }
  0x71   :  { %747 = vmatpush1.bf16.msra.mxu0 %v7280_v34  ;;  %718 = vmatpush2.bf16.msra.mxu1 %v7325_v44 }
  0x72   :  { %748 = vmatprep.subr.bf16.mxu0 %v7288_v35  ;;  %719 = vmatprep.subr.bf16.mxu1 %v7326_v45 }
  0x75   :  { %749 = vmatpush1.bf16.msra.mxu0 %v7286_v38  ;;  %720 = vmatpush2.bf16.msra.mxu1 %v7331_v48 }
  0x76   :  { %750 = vmatprep.subr.bf16.mxu0 %v7294_v39  ;;  %721 = vmatprep.subr.bf16.mxu1 %v7332_v49 }
  0x79   :  { %751 = vmatpush1.bf16.msra.mxu0 %v7292_v42  ;;  %722 = vmatpush2.bf16.msra.mxu1 %v7337_v52 }
  0x7a   :  { %752 = vmatprep.subr.bf16.mxu0 %v7300_v43  ;;  %723 = vmatprep.subr.bf16.mxu1 %v7338_v53 }
  0x7d   :  { %753 = vmatpush1.bf16.msra.mxu0 %v7298_v46  ;;  %724 = vmatpush2.bf16.msra.mxu1 %v7343_v56 }
  0x7e   :  { %754 = vmatprep.subr.bf16.mxu0 %v7306_v47  ;;  %725 = vmatprep.subr.bf16.mxu1 %v7344_v2 }
  0x81   :  { %755 = vmatpush1.bf16.msra.mxu0 %v7304_v50  ;;  %726 = vmatpush2.bf16.msra.mxu1 %v7349_v5 }
  0x82   :  { %756 = vmatprep.subr.bf16.mxu0 %v7312_v51  ;;  %727 = vmatprep.subr.bf16.mxu1 %v7350_v6 }
  0x85   :  { %757 = vmatpush1.bf16.msra.mxu0 %v7310_v54  ;;  %728 = vmatpush2.bf16.msra.mxu1 %v7355_v9 }
  0x86   :  { %758 = vmatprep.subr.bf16.mxu0 %v7318_v55  ;;  %729 = vmatprep.subr.bf16.mxu1 %v7356_v10 }
  0x89   :  { %759 = vmatpush1.bf16.msra.mxu0 %v7316_v57  ;;  %730 = vmatpush2.bf16.msra.mxu1 %v7361_v13 }
  0x8a   :  { %760 = vmatprep.subr.bf16.mxu0 %v7324_v58  ;;  %731 = vmatprep.subr.bf16.mxu1 %v7362_v14 }
  0x8d   :  { %761 = vmatpush2.bf16.msra.mxu0 %v7322_v59  ;;  %732 = vmatpush2.bf16.msra.mxu1 %v7367_v17 }
  0x8e   :  { %762 = vmatprep.subr.bf16.mxu0 %v7330_v60 }
  0x91   :  { %763 = vmatpush2.bf16.msra.mxu0 %v7328_v61 }
  0x92   :  { %764 = vmatprep.subr.bf16.mxu0 %v7336_v62 }
  0x95   :  { %765 = vmatpush2.bf16.msra.mxu0 %v7334_v63 }
  0x96   :  { %766 = vmatprep.subr.bf16.mxu0 %v7342_v0 }
  0x99   :  { %767 = vmatpush2.bf16.msra.mxu0 %v7340_v1 }
  0x9a   :  { %768 = vmatprep.subr.bf16.mxu0 %v7348_v3 }
  0x9d   :  { %769 = vmatpush2.bf16.msra.mxu0 %v7346_v4 }
  0x9e   :  { %770 = vmatprep.subr.bf16.mxu0 %v7354_v7 }
  0xa1   :  { %771 = vmatpush2.bf16.msra.mxu0 %v7352_v8 }
  0xa2   :  { %772 = vmatprep.subr.bf16.mxu0 %v7360_v11 }
  0xa5   :  { %773 = vmatpush2.bf16.msra.mxu0 %v7358_v12 }
  0xa6   :  { %774 = vmatprep.subr.bf16.mxu0 %v7366_v15 }
  0xa9   :  { %775 = vmatpush2.bf16.msra.mxu0 %v7364_v16 }
 0x12c   :  { %v276_v25 = vpop.f32.mrf.mxu0 }
 0x12d   :  { %v277_v28 = vadd.f32 %v276_v25, %v149_v24 }
 0x12e   :  { %v278_v26 = vpop.f32.mrf.mxu0 }
 0x12f   :  { %v279_v27 = vadd.f32 %v278_v26, %v153_v23  ;;  %v285_v35 = vmul.f32 0.2, %v277_v28 }
 0x130   :  { %v280_v29 = vpop.f32.mrf.mxu0 }
 0x131   :  { %v281_v30 = vadd.f32 %v280_v29, %v149_v24  ;;  %v286_v32 = vmul.f32 0.2, %v279_v27  ;;  %v289_v40 = vmax.f32 %v277_v28, %v285_v35 }
 0x132   :  { %v282_v31 = vpop.f32.mrf.mxu0 }
 0x133   :  { %v287_v33 = vmul.f32 0.2, %v281_v30  ;;  %v283_v34 = vadd.f32 %v282_v31, %v153_v23  ;;  %v290_v38 = vmax.f32 %v279_v27, %v286_v32 }
 0x135   :  { %v288_v36 = vmul.f32 0.2, %v283_v34  ;;  %v291_v37 = vmax.f32 %v281_v30, %v287_v33 }
 0x137   :  { %v292_v39 = vmax.f32 %v283_v34, %v288_v36  ;;  %v293_v42 = vpack.c.bf16 %v291_v37, %v289_v40 }
 0x139   :  { %v294_v41 = vpack.c.bf16 %v292_v39, %v290_v38 }
 0x13b   :  { %733 = vmatprep.mubr.bf16.mxu1 %v294_v41  ;;  %776 = vmatprep.mubr.bf16.mxu0 %v294_v41 }
 0x13c   :  { %734 = vmatmul.mubr.bf16.vlgmr.msra.gmra.mxu1 %v293_v42  ;;  %777 = vmatmul.mubr.bf16.vlgmr.msra.gmra.mxu0 %v293_v42 }
 0x13d   :  { %8175 = shalt.err (!%p8172_p6)  }
 0x13e   :  { %113 = dma.hbm_to_vmem [thread:$0]  %s8676_s7, 32768, %s111_s19, [#allocation4] }
 0x13f   :  { %s8184_s24 = scalar_lea.vmem %s123_s21, 57344  ;;  %p8189_p8 = scmp.lt.s32.totalorder %s123_s21, %s123_s21 }
 0x140   :  { %p8185_p7 = scmp.ne.s32.totalorder %s123_s21, %s8184_s24  ;;  %p8190_p9 = scmp.lt.s32.totalorder %s8184_s24, %s8184_s24 }
 0x142   :  { %p8191_p10 = por %p8190_p9, %p8189_p8 }
 0x144   :  { %p8192_p11 = pnand %p8191_p10, %p8185_p7 }
 0x146   :  { %8195 = shalt.err (!%p8192_p11)  }
 0x147   :  { %125 = dma.hbm_to_vmem [thread:$0]  %s8677_s8, 57344, %s123_s21, [#allocation4 + $0x1]  ;;  %v8309_v43 = vsub.s32 2, %v8292_v19  ;;  %v359_v44 = vld [vmem:[#allocation10] sm:$0xf]  ;;  %v8312_v45 = vsub.s32 3, %v8292_v19 }
 0x148   :  { %v364_v46 = vrot.slane %v359_v44, %v8298_v21  ;;  %v368_v48 = vrot.slane %v359_v44, %v8295_v20 }
 0x149   :  { %v372_v47 = vrot.slane %v359_v44, %v8309_v43  ;;  %v376_v49 = vrot.slane %v359_v44, %v8312_v45 }
 0x1fc   :  { %v735_v50 = vpop.f32.mrf.mxu1  ;;  %v778_v51 = vpop.f32.mrf.mxu0 }
 0x1fd   :  { %v8318_v52 = vadd.f32 %v735_v50, %v364_v46  ;;  %v8320_v53 = vadd.f32 %v778_v51, %v372_v47 }
 0x1fe   :  { %v737_v54 = vpop.f32.mrf.mxu1  ;;  %v780_v55 = vpop.f32.mrf.mxu0 }
 0x1ff   :  { %v8323_v56 = vmul.f32 0.2, %v8318_v52  ;;  %v8326_v57 = vmul.f32 0.2, %v8320_v53  ;;  %v738_v58 = vadd.f32 %v737_v54, %v368_v48  ;;  %v781_v59 = vadd.f32 %v780_v55, %v376_v49 }
 0x200   :  { %v739_v60 = vpop.f32.mrf.mxu1  ;;  %v782_v61 = vpop.f32.mrf.mxu0 }
 0x201   :  { %v795_v62 = vmax.f32 %v8318_v52, %v8323_v56  ;;  %v797_v63 = vmax.f32 %v8320_v53, %v8326_v57  ;;  %v788_v0 = vmul.f32 0.2, %v738_v58  ;;  %v790_v1 = vmul.f32 0.2, %v781_v59 }
 0x202   :  { %v8332_v2 = vadd.f32 %v739_v60, %v364_v46  ;;  %v8334_v3 = vadd.f32 %v782_v61, %v372_v47  ;;  %v741_v4 = vpop.f32.mrf.mxu1  ;;  %v784_v5 = vpop.f32.mrf.mxu0 }
 0x203   :  { %v796_v6 = vmax.f32 %v738_v58, %v788_v0  ;;  %v798_v7 = vmax.f32 %v781_v59, %v790_v1  ;;  %v742_v8 = vadd.f32 %v741_v4, %v368_v48  ;;  %v785_v9 = vadd.f32 %v784_v5, %v376_v49 }
 0x204   :  { %v8337_v10 = vmul.f32 0.2, %v8332_v2  ;;  %v8340_v11 = vmul.f32 0.2, %v8334_v3 }
 0x205   :  { %v792_v12 = vmul.f32 0.2, %v742_v8  ;;  %v794_v13 = vmul.f32 0.2, %v785_v9 }
 0x206   :  { %v799_v14 = vmax.f32 %v8332_v2, %v8337_v10  ;;  %v801_v15 = vmax.f32 %v8334_v3, %v8340_v11 }
 0x207   :  { %v800_v16 = vmax.f32 %v742_v8, %v792_v12  ;;  %v802_v17 = vmax.f32 %v785_v9, %v794_v13 }
 0x208   :  { %8204 = dma.done.wait [#allocation4], 32768 }
 0x209   :  { %8205 = vsyncadd [#allocation4], 4294934528  ;;  %v8346_v18 = vpack.c.bf16 %v800_v16, %v796_v6  ;;  %v8348_v22 = vpack.c.bf16 %v802_v17, %v798_v7  ;;  %v867_v23 = vld [vmem:[#allocation2 + $0x1c0] sm:$0xff]  ;;  %v856_v10 = vld [vmem:[#allocation2 + $0x168] sm:$0xff] }
 0x20a   :  { %v871_v24 = vld [vmem:[#allocation2 + $0x1e0] sm:$0xff]  ;;  %v844_v11 = vld [vmem:[#allocation2 + $0x108] sm:$0xff] }
 0x20b   :  { %2421 = vmatprep.mubr.bf16.mxu1 %v8346_v18  ;;  %2464 = vmatprep.mubr.bf16.mxu0 %v8348_v22  ;;  %v995_v25 = vld [vmem:[#allocation2 + $0x5c0] sm:$0xff]  ;;  %v6497_v26 = vcombine.high %v867_v23, %v871_v24  ;;  %v6496_v28 = vcombine.low %v867_v23, %v871_v24 }
 0x20c   :  { %v999_v27 = vld [vmem:[#allocation2 + $0x5e0] sm:$0xff] }
 0x20d   :  { %v859_v29 = vld [vmem:[#allocation2 + $0x180] sm:$0xff]  ;;  %v6625_v31 = vcombine.high %v995_v25, %v999_v27  ;;  %v6624_v32 = vcombine.low %v995_v25, %v999_v27  ;;  %2389 = vmatprep.subr.bf16.mxu1 %v6497_v26 }
 0x20e   :  { %v863_v30 = vld [vmem:[#allocation2 + $0x1a0] sm:$0xff]  ;;  %2390 = vmatpush1.bf16.msra.mxu1 %v6496_v28 }
 0x20f   :  { %v6489_v33 = vcombine.high %v859_v29, %v863_v30  ;;  %v987_v34 = vld [vmem:[#allocation2 + $0x580] sm:$0xff]  ;;  %2432 = vmatprep.subr.bf16.mxu0 %v6625_v31  ;;  %v6488_v41 = vcombine.low %v859_v29, %v863_v30 }
 0x210   :  { %v991_v35 = vld [vmem:[#allocation2 + $0x5a0] sm:$0xff]  ;;  %2433 = vmatpush1.bf16.msra.mxu0 %v6624_v32 }
 0x211   :  { %v851_v36 = vld [vmem:[#allocation2 + $0x140] sm:$0xff]  ;;  %v6617_v37 = vcombine.high %v987_v34, %v991_v35  ;;  %2391 = vmatprep.subr.bf16.mxu1 %v6489_v33  ;;  %v6616_v42 = vcombine.low %v987_v34, %v991_v35 }
 0x212   :  { %v855_v38 = vld [vmem:[#allocation2 + $0x160] sm:$0xff]  ;;  %2392 = vmatpush1.bf16.msra.mxu1 %v6488_v41 }
 0x213   :  { %v979_v39 = vld [vmem:[#allocation2 + $0x540] sm:$0xff]  ;;  %v6481_v44 = vcombine.high %v851_v36, %v855_v38  ;;  %2434 = vmatprep.subr.bf16.mxu0 %v6617_v37  ;;  %v6480_v51 = vcombine.low %v851_v36, %v855_v38 }
 0x214   :  { %v983_v40 = vld [vmem:[#allocation2 + $0x560] sm:$0xff]  ;;  %2435 = vmatpush1.bf16.msra.mxu0 %v6616_v42 }
 0x215   :  { %v6609_v46 = vcombine.high %v979_v39, %v983_v40  ;;  %v843_v47 = vld [vmem:[#allocation2 + $0x100] sm:$0xff]  ;;  %2393 = vmatprep.subr.bf16.mxu1 %v6481_v44  ;;  %v6608_v54 = vcombine.low %v979_v39, %v983_v40 }
 0x216   :  { %v847_v48 = vld [vmem:[#allocation2 + $0x120] sm:$0xff]  ;;  %2394 = vmatpush1.bf16.msra.mxu1 %v6480_v51 }
 0x217   :  { %v971_v49 = vld [vmem:[#allocation2 + $0x500] sm:$0xff]  ;;  %v6473_v55 = vcombine.high %v843_v47, %v847_v48  ;;  %2436 = vmatprep.subr.bf16.mxu0 %v6609_v46  ;;  %v6472_v1 = vcombine.low %v843_v47, %v847_v48 }
 0x218   :  { %v975_v50 = vld [vmem:[#allocation2 + $0x520] sm:$0xff]  ;;  %2437 = vmatpush1.bf16.msra.mxu0 %v6608_v54 }
 0x219   :  { %v6601_v58 = vcombine.high %v971_v49, %v975_v50  ;;  %v835_v59 = vld [vmem:[#allocation2 + $0xc0] sm:$0xff]  ;;  %2395 = vmatprep.subr.bf16.mxu1 %v6473_v55  ;;  %v6600_v4 = vcombine.low %v971_v49, %v975_v50 }
 0x21a   :  { %v839_v60 = vld [vmem:[#allocation2 + $0xe0] sm:$0xff]  ;;  %2396 = vmatpush1.bf16.msra.mxu1 %v6472_v1 }
 0x21b   :  { %v963_v61 = vld [vmem:[#allocation2 + $0x4c0] sm:$0xff]  ;;  %v6465_v5 = vcombine.high %v835_v59, %v839_v60  ;;  %2438 = vmatprep.subr.bf16.mxu0 %v6601_v58  ;;  %v6464_v13 = vcombine.low %v835_v59, %v839_v60 }
 0x21c   :  { %v967_v0 = vld [vmem:[#allocation2 + $0x4e0] sm:$0xff]  ;;  %2439 = vmatpush1.bf16.msra.mxu0 %v6600_v4 }
 0x21d   :  { %v6593_v6 = vcombine.high %v963_v61, %v967_v0  ;;  %v827_v7 = vld [vmem:[#allocation2 + $0x80] sm:$0xff]  ;;  %2397 = vmatprep.subr.bf16.mxu1 %v6465_v5  ;;  %v6592_v16 = vcombine.low %v963_v61, %v967_v0 }
 0x21e   :  { %v831_v8 = vld [vmem:[#allocation2 + $0xa0] sm:$0xff]  ;;  %2398 = vmatpush1.bf16.msra.mxu1 %v6464_v13 }
 0x21f   :  { %v955_v9 = vld [vmem:[#allocation2 + $0x480] sm:$0xff]  ;;  %v6457_v17 = vcombine.high %v827_v7, %v831_v8  ;;  %2440 = vmatprep.subr.bf16.mxu0 %v6593_v6  ;;  %v6456_v28 = vcombine.low %v827_v7, %v831_v8 }
 0x220   :  { %v959_v12 = vld [vmem:[#allocation2 + $0x4a0] sm:$0xff]  ;;  %2441 = vmatpush1.bf16.msra.mxu0 %v6592_v16 }
 0x221   :  { %v6585_v23 = vcombine.high %v955_v9, %v959_v12  ;;  %v819_v24 = vld [vmem:[#allocation2 + $0x40] sm:$0xff]  ;;  %2399 = vmatprep.subr.bf16.mxu1 %v6457_v17  ;;  %v6584_v29 = vcombine.low %v955_v9, %v959_v12 }
 0x222   :  { %v823_v25 = vld [vmem:[#allocation2 + $0x60] sm:$0xff]  ;;  %2400 = vmatpush1.bf16.msra.mxu1 %v6456_v28 }
 0x223   :  { %v947_v26 = vld [vmem:[#allocation2 + $0x440] sm:$0xff]  ;;  %v6449_v30 = vcombine.high %v819_v24, %v823_v25  ;;  %2442 = vmatprep.subr.bf16.mxu0 %v6585_v23  ;;  %v6448_v36 = vcombine.low %v819_v24, %v823_v25 }
 0x224   :  { %v951_v27 = vld [vmem:[#allocation2 + $0x460] sm:$0xff]  ;;  %2443 = vmatpush1.bf16.msra.mxu0 %v6584_v29 }
 0x225   :  { %v6577_v31 = vcombine.high %v947_v26, %v951_v27  ;;  %v811_v32 = vld [vmem:[#allocation2] sm:$0xff]  ;;  %2401 = vmatprep.subr.bf16.mxu1 %v6449_v30  ;;  %v6576_v37 = vcombine.low %v947_v26, %v951_v27 }
 0x226   :  { %v815_v33 = vld [vmem:[#allocation2 + $0x20] sm:$0xff]  ;;  %2402 = vmatpush1.bf16.msra.mxu1 %v6448_v36 }
 0x227   :  { %v939_v34 = vld [vmem:[#allocation2 + $0x400] sm:$0xff]  ;;  %v6441_v38 = vcombine.high %v811_v32, %v815_v33  ;;  %2444 = vmatprep.subr.bf16.mxu0 %v6577_v31  ;;  %v6440_v46 = vcombine.low %v811_v32, %v815_v33 }
 0x228   :  { %v943_v35 = vld [vmem:[#allocation2 + $0x420] sm:$0xff]  ;;  %2445 = vmatpush1.bf16.msra.mxu0 %v6576_v37 }
 0x229   :  { %v6569_v39 = vcombine.high %v939_v34, %v943_v35  ;;  %v931_v40 = vld [vmem:[#allocation2 + $0x3c0] sm:$0xff]  ;;  %2403 = vmatprep.subr.bf16.mxu1 %v6441_v38  ;;  %v6568_v47 = vcombine.low %v939_v34, %v943_v35 }
 0x22a   :  { %v935_v41 = vld [vmem:[#allocation2 + $0x3e0] sm:$0xff]  ;;  %2404 = vmatpush1.bf16.msra.mxu1 %v6440_v46 }
 0x22b   :  { %v1059_v42 = vld [vmem:[#allocation2 + $0x7c0] sm:$0xff]  ;;  %v6561_v48 = vcombine.high %v931_v40, %v935_v41  ;;  %2446 = vmatprep.subr.bf16.mxu0 %v6569_v39  ;;  %v6560_v58 = vcombine.low %v931_v40, %v935_v41 }
 0x22c   :  { %v1063_v44 = vld [vmem:[#allocation2 + $0x7e0] sm:$0xff]  ;;  %2447 = vmatpush1.bf16.msra.mxu0 %v6568_v47 }
 0x22d   :  { %v6689_v49 = vcombine.high %v1059_v42, %v1063_v44  ;;  %v923_v50 = vld [vmem:[#allocation2 + $0x380] sm:$0xff]  ;;  %2405 = vmatprep.subr.bf16.mxu1 %v6561_v48  ;;  %v6688_v59 = vcombine.low %v1059_v42, %v1063_v44 }
 0x22e   :  { %v927_v51 = vld [vmem:[#allocation2 + $0x3a0] sm:$0xff]  ;;  %2406 = vmatpush2.bf16.msra.mxu1 %v6560_v58 }
 0x22f   :  { %v1051_v54 = vld [vmem:[#allocation2 + $0x780] sm:$0xff]  ;;  %v6553_v60 = vcombine.high %v923_v50, %v927_v51  ;;  %2448 = vmatprep.subr.bf16.mxu0 %v6689_v49  ;;  %v6552_v6 = vcombine.low %v923_v50, %v927_v51 }
 0x230   :  { %v1055_v55 = vld [vmem:[#allocation2 + $0x7a0] sm:$0xff]  ;;  %2449 = vmatpush2.bf16.msra.mxu0 %v6688_v59 }
 0x231   :  { %v6681_v61 = vcombine.high %v1051_v54, %v1055_v55  ;;  %v915_v0 = vld [vmem:[#allocation2 + $0x340] sm:$0xff]  ;;  %2407 = vmatprep.subr.bf16.mxu1 %v6553_v60  ;;  %v6680_v7 = vcombine.low %v1051_v54, %v1055_v55 }
 0x232   :  { %v919_v1 = vld [vmem:[#allocation2 + $0x360] sm:$0xff]  ;;  %2408 = vmatpush2.bf16.msra.mxu1 %v6552_v6  ;;  %v872_v6 = vld [vmem:[#allocation2 + $0x1e8] sm:$0xff] }
 0x233   :  { %v1043_v4 = vld [vmem:[#allocation2 + $0x740] sm:$0xff]  ;;  %v6545_v8 = vcombine.high %v915_v0, %v919_v1  ;;  %2450 = vmatprep.subr.bf16.mxu0 %v6681_v61  ;;  %v6544_v23 = vcombine.low %v915_v0, %v919_v1 }
 0x234   :  { %v1047_v5 = vld [vmem:[#allocation2 + $0x760] sm:$0xff]  ;;  %2451 = vmatpush2.bf16.msra.mxu0 %v6680_v7  ;;  %v996_v7 = vld [vmem:[#allocation2 + $0x5c8] sm:$0xff] }
 0x235   :  { %v6673_v9 = vcombine.high %v1043_v4, %v1047_v5  ;;  %v907_v12 = vld [vmem:[#allocation2 + $0x300] sm:$0xff]  ;;  %2409 = vmatprep.subr.bf16.mxu1 %v6545_v8  ;;  %v6672_v24 = vcombine.low %v1043_v4, %v1047_v5  ;;  %v868_v5 = vld [vmem:[#allocation2 + $0x1c8] sm:$0xff] }
 0x236   :  { %v911_v13 = vld [vmem:[#allocation2 + $0x320] sm:$0xff]  ;;  %2410 = vmatpush2.bf16.msra.mxu1 %v6544_v23  ;;  %v1000_v8 = vld [vmem:[#allocation2 + $0x5e8] sm:$0xff] }
 0x237   :  { %v1035_v16 = vld [vmem:[#allocation2 + $0x700] sm:$0xff]  ;;  %v6537_v25 = vcombine.high %v907_v12, %v911_v13  ;;  %2452 = vmatprep.subr.bf16.mxu0 %v6673_v9  ;;  %v6536_v31 = vcombine.low %v907_v12, %v911_v13  ;;  %v6499_v13 = vcombine.high %v868_v5, %v872_v6  ;;  %v864_v23 = vld [vmem:[#allocation2 + $0x1a8] sm:$0xff]  ;;  %v6626_v52 = vcombine.low %v996_v7, %v1000_v8 }
 0x238   :  { %v1039_v17 = vld [vmem:[#allocation2 + $0x720] sm:$0xff]  ;;  %2453 = vmatpush2.bf16.msra.mxu0 %v6672_v24  ;;  %v8358_v24 = vpack.c.bf16 %v799_v14, %v795_v62  ;;  %v852_v62 = vld [vmem:[#allocation2 + $0x148] sm:$0xff] }
 0x239   :  { %v6665_v26 = vcombine.high %v1035_v16, %v1039_v17  ;;  %v899_v27 = vld [vmem:[#allocation2 + $0x2c0] sm:$0xff]  ;;  %2411 = vmatprep.subr.bf16.mxu1 %v6537_v25  ;;  %v6664_v32 = vcombine.low %v1035_v16, %v1039_v17  ;;  %v6627_v16 = vcombine.high %v996_v7, %v1000_v8  ;;  %v860_v17 = vld [vmem:[#allocation2 + $0x188] sm:$0xff] }
 0x23a   :  { %v903_v28 = vld [vmem:[#allocation2 + $0x2e0] sm:$0xff]  ;;  %2412 = vmatpush2.bf16.msra.mxu1 %v6536_v31  ;;  %v988_v25 = vld [vmem:[#allocation2 + $0x588] sm:$0xff]  ;;  %v6491_v56 = vcombine.high %v860_v17, %v864_v23  ;;  %v6490_v53 = vcombine.low %v860_v17, %v864_v23 }
 0x23b   :  { %v1027_v29 = vld [vmem:[#allocation2 + $0x6c0] sm:$0xff]  ;;  %v6529_v33 = vcombine.high %v899_v27, %v903_v28  ;;  %2454 = vmatprep.subr.bf16.mxu0 %v6665_v26  ;;  %v6528_v39 = vcombine.low %v899_v27, %v903_v28  ;;  %v992_v26 = vld [vmem:[#allocation2 + $0x5a8] sm:$0xff]  ;;  %v8366_v27 = vpack.c.bf16 %v801_v15, %v797_v63  ;;  %v6498_v28 = vcombine.low %v868_v5, %v872_v6 }
 0x23c   :  { %v1031_v30 = vld [vmem:[#allocation2 + $0x6e0] sm:$0xff]  ;;  %2455 = vmatpush2.bf16.msra.mxu0 %v6664_v32  ;;  %v6619_v2 = vcombine.high %v988_v25, %v992_v26  ;;  %v980_v14 = vld [vmem:[#allocation2 + $0x548] sm:$0xff]  ;;  %v6618_v57 = vcombine.low %v988_v25, %v992_v26  ;;  %v6483_v63 = vcombine.high %v852_v62, %v856_v10  ;;  %v6482_v32 = vcombine.low %v852_v62, %v856_v10 }
 0x23d   :  { %v6657_v34 = vcombine.high %v1027_v29, %v1031_v30  ;;  %v891_v35 = vld [vmem:[#allocation2 + $0x280] sm:$0xff]  ;;  %2413 = vmatprep.subr.bf16.mxu1 %v6529_v33  ;;  %v6656_v40 = vcombine.low %v1027_v29, %v1031_v30  ;;  %v984_v29 = vld [vmem:[#allocation2 + $0x568] sm:$0xff] }
 0x23e   :  { %v895_v36 = vld [vmem:[#allocation2 + $0x2a0] sm:$0xff]  ;;  %2414 = vmatpush2.bf16.msra.mxu1 %v6528_v39  ;;  %v6611_v3 = vcombine.high %v980_v14, %v984_v29  ;;  %v848_v15 = vld [vmem:[#allocation2 + $0x128] sm:$0xff]  ;;  %v6610_v33 = vcombine.low %v980_v14, %v984_v29 }
 0x23f   :  { %v1019_v37 = vld [vmem:[#allocation2 + $0x680] sm:$0xff]  ;;  %v6521_v41 = vcombine.high %v891_v35, %v895_v36  ;;  %2456 = vmatprep.subr.bf16.mxu0 %v6657_v34  ;;  %v6520_v49 = vcombine.low %v891_v35, %v895_v36  ;;  %v972_v30 = vld [vmem:[#allocation2 + $0x508] sm:$0xff]  ;;  %v6475_v34 = vcombine.high %v844_v11, %v848_v15 }
 0x240   :  { %v1023_v38 = vld [vmem:[#allocation2 + $0x6a0] sm:$0xff]  ;;  %2457 = vmatpush2.bf16.msra.mxu0 %v6656_v40  ;;  %v976_v31 = vld [vmem:[#allocation2 + $0x528] sm:$0xff]  ;;  %v6474_v40 = vcombine.low %v844_v11, %v848_v15 }
 0x241   :  { %v6649_v42 = vcombine.high %v1019_v37, %v1023_v38  ;;  %v883_v44 = vld [vmem:[#allocation2 + $0x240] sm:$0xff]  ;;  %2415 = vmatprep.subr.bf16.mxu1 %v6521_v41  ;;  %v6648_v50 = vcombine.low %v1019_v37, %v1023_v38  ;;  %v6603_v35 = vcombine.high %v972_v30, %v976_v31  ;;  %v836_v36 = vld [vmem:[#allocation2 + $0xc8] sm:$0xff]  ;;  %v6602_v41 = vcombine.low %v972_v30, %v976_v31 }
 0x242   :  { %v887_v46 = vld [vmem:[#allocation2 + $0x260] sm:$0xff]  ;;  %2416 = vmatpush2.bf16.msra.mxu1 %v6520_v49  ;;  %v840_v37 = vld [vmem:[#allocation2 + $0xe8] sm:$0xff] }
 0x243   :  { %v1011_v47 = vld [vmem:[#allocation2 + $0x640] sm:$0xff]  ;;  %v6513_v51 = vcombine.high %v883_v44, %v887_v46  ;;  %2458 = vmatprep.subr.bf16.mxu0 %v6649_v42  ;;  %v6512_v61 = vcombine.low %v883_v44, %v887_v46  ;;  %v964_v38 = vld [vmem:[#allocation2 + $0x4c8] sm:$0xff]  ;;  %v6467_v42 = vcombine.high %v836_v36, %v840_v37 }
 0x244   :  { %v1015_v48 = vld [vmem:[#allocation2 + $0x660] sm:$0xff]  ;;  %2459 = vmatpush2.bf16.msra.mxu0 %v6648_v50  ;;  %v968_v39 = vld [vmem:[#allocation2 + $0x4e8] sm:$0xff]  ;;  %v6466_v50 = vcombine.low %v836_v36, %v840_v37 }
 0x245   :  { %v6641_v54 = vcombine.high %v1011_v47, %v1015_v48  ;;  %v875_v55 = vld [vmem:[#allocation2 + $0x200] sm:$0xff]  ;;  %2417 = vmatprep.subr.bf16.mxu1 %v6513_v51  ;;  %v6640_v0 = vcombine.low %v1011_v47, %v1015_v48  ;;  %v6595_v44 = vcombine.high %v964_v38, %v968_v39  ;;  %v828_v46 = vld [vmem:[#allocation2 + $0x88] sm:$0xff]  ;;  %v6594_v51 = vcombine.low %v964_v38, %v968_v39 }
 0x246   :  { %v879_v58 = vld [vmem:[#allocation2 + $0x220] sm:$0xff]  ;;  %2418 = vmatpush2.bf16.msra.mxu1 %v6512_v61  ;;  %v832_v47 = vld [vmem:[#allocation2 + $0xa8] sm:$0xff] }
 0x247   :  { %v1003_v59 = vld [vmem:[#allocation2 + $0x600] sm:$0xff]  ;;  %v6505_v1 = vcombine.high %v875_v55, %v879_v58  ;;  %2460 = vmatprep.subr.bf16.mxu0 %v6641_v54  ;;  %v6504_v9 = vcombine.low %v875_v55, %v879_v58  ;;  %v956_v48 = vld [vmem:[#allocation2 + $0x488] sm:$0xff]  ;;  %v6459_v54 = vcombine.high %v828_v46, %v832_v47 }
 0x248   :  { %v1007_v60 = vld [vmem:[#allocation2 + $0x620] sm:$0xff]  ;;  %2461 = vmatpush2.bf16.msra.mxu0 %v6640_v0  ;;  %v960_v49 = vld [vmem:[#allocation2 + $0x4a8] sm:$0xff]  ;;  %v6458_v0 = vcombine.low %v828_v46, %v832_v47 }
 0x249   :  { %v6633_v4 = vcombine.high %v1003_v59, %v1007_v60  ;;  %2419 = vmatprep.subr.bf16.mxu1 %v6505_v1  ;;  %v6632_v12 = vcombine.low %v1003_v59, %v1007_v60  ;;  %v6587_v55 = vcombine.high %v956_v48, %v960_v49  ;;  %v820_v58 = vld [vmem:[#allocation2 + $0x48] sm:$0xff]  ;;  %v6586_v1 = vcombine.low %v956_v48, %v960_v49 }
 0x24a   :  { %2420 = vmatpush2.bf16.msra.mxu1 %v6504_v9  ;;  %v824_v59 = vld [vmem:[#allocation2 + $0x68] sm:$0xff] }
 0x24b   :  { %2462 = vmatprep.subr.bf16.mxu0 %v6633_v4  ;;  %2475 = vmatprep.subr.bf16.mxu1 %v6499_v13  ;;  %v948_v60 = vld [vmem:[#allocation2 + $0x448] sm:$0xff]  ;;  %v6451_v4 = vcombine.high %v820_v58, %v824_v59 }
 0x24c   :  { %2463 = vmatpush2.bf16.msra.mxu0 %v6632_v12  ;;  %v952_v61 = vld [vmem:[#allocation2 + $0x468] sm:$0xff]  ;;  %v6450_v12 = vcombine.low %v820_v58, %v824_v59 }
 0x24d   :  { %2518 = vmatprep.subr.bf16.mxu0 %v6627_v16  ;;  %2422 = vmatmul.mubr.bf16.vlgmr.msra.gmra.mxu1 %v8358_v24  ;;  %v6579_v5 = vcombine.high %v948_v60, %v952_v61  ;;  %v812_v6 = vld [vmem:[#allocation2 + $0x8] sm:$0xff]  ;;  %v6578_v13 = vcombine.low %v948_v60, %v952_v61 }
 0x24e   :  { %2476 = vmatpush1.bf16.msra.mxu1 %v6498_v28  ;;  %2507 = vmatprep.mubr.bf16.mxu1 %v8346_v18  ;;  %v816_v7 = vld [vmem:[#allocation2 + $0x28] sm:$0xff] }
 0x24f   :  { %2465 = vmatmul.mubr.bf16.vlgmr.msra.gmra.mxu0 %v8366_v27  ;;  %2477 = vmatprep.subr.bf16.mxu1 %v6491_v56  ;;  %v940_v8 = vld [vmem:[#allocation2 + $0x408] sm:$0xff]  ;;  %v6443_v16 = vcombine.high %v812_v6, %v816_v7 }
 0x250   :  { %2519 = vmatpush1.bf16.msra.mxu0 %v6626_v52  ;;  %2550 = vmatprep.mubr.bf16.mxu0 %v8348_v22  ;;  %v944_v9 = vld [vmem:[#allocation2 + $0x428] sm:$0xff]  ;;  %v6442_v52 = vcombine.low %v812_v6, %v816_v7 }
 0x251   :  { %2520 = vmatprep.subr.bf16.mxu0 %v6619_v2  ;;  %v6571_v17 = vcombine.high %v940_v8, %v944_v9  ;;  %v932_v23 = vld [vmem:[#allocation2 + $0x3c8] sm:$0xff]  ;;  %v6570_v56 = vcombine.low %v940_v8, %v944_v9 }
 0x252   :  { %2478 = vmatpush1.bf16.msra.mxu1 %v6490_v53  ;;  %v936_v25 = vld [vmem:[#allocation2 + $0x3e8] sm:$0xff] }
 0x253   :  { %2479 = vmatprep.subr.bf16.mxu1 %v6483_v63  ;;  %v1060_v26 = vld [vmem:[#allocation2 + $0x7c8] sm:$0xff]  ;;  %v6563_v2 = vcombine.high %v932_v23, %v936_v25 }
 0x254   :  { %2521 = vmatpush1.bf16.msra.mxu0 %v6618_v57  ;;  %v1064_v28 = vld [vmem:[#allocation2 + $0x7e8] sm:$0xff]  ;;  %v6562_v57 = vcombine.low %v932_v23, %v936_v25 }
 0x255   :  { %2522 = vmatprep.subr.bf16.mxu0 %v6611_v3  ;;  %v6691_v62 = vcombine.high %v1060_v26, %v1064_v28  ;;  %v924_v10 = vld [vmem:[#allocation2 + $0x388] sm:$0xff]  ;;  %v6690_v63 = vcombine.low %v1060_v26, %v1064_v28 }
 0x256   :  { %2480 = vmatpush1.bf16.msra.mxu1 %v6482_v32  ;;  %v928_v14 = vld [vmem:[#allocation2 + $0x3a8] sm:$0xff] }
 0x257   :  { %2481 = vmatprep.subr.bf16.mxu1 %v6475_v34  ;;  %v1052_v29 = vld [vmem:[#allocation2 + $0x788] sm:$0xff]  ;;  %v6555_v3 = vcombine.high %v924_v10, %v928_v14 }
 0x258   :  { %2523 = vmatpush1.bf16.msra.mxu0 %v6610_v33  ;;  %v1056_v53 = vld [vmem:[#allocation2 + $0x7a8] sm:$0xff]  ;;  %v6554_v33 = vcombine.low %v924_v10, %v928_v14  ;;  %v869_v14 = vld [vmem:[#allocation2 + $0x1d0] sm:$0xff] }
 0x259   :  { %2524 = vmatprep.subr.bf16.mxu0 %v6603_v35  ;;  %v6683_v11 = vcombine.high %v1052_v29, %v1056_v53  ;;  %v916_v15 = vld [vmem:[#allocation2 + $0x348] sm:$0xff]  ;;  %v6682_v34 = vcombine.low %v1052_v29, %v1056_v53  ;;  %v873_v29 = vld [vmem:[#allocation2 + $0x1f0] sm:$0xff] }
 0x25a   :  { %2482 = vmatpush1.bf16.msra.mxu1 %v6474_v40  ;;  %v920_v30 = vld [vmem:[#allocation2 + $0x368] sm:$0xff]  ;;  %v997_v53 = vld [vmem:[#allocation2 + $0x5d0] sm:$0xff] }
 0x25b   :  { %2483 = vmatprep.subr.bf16.mxu1 %v6467_v42  ;;  %v1044_v31 = vld [vmem:[#allocation2 + $0x748] sm:$0xff]  ;;  %v6547_v35 = vcombine.high %v916_v15, %v920_v30 }
 0x25c   :  { %2525 = vmatpush1.bf16.msra.mxu0 %v6602_v41  ;;  %v1048_v32 = vld [vmem:[#allocation2 + $0x768] sm:$0xff]  ;;  %v6546_v41 = vcombine.low %v916_v15, %v920_v30  ;;  %v861_v30 = vld [vmem:[#allocation2 + $0x190] sm:$0xff] }
 0x25d   :  { %2526 = vmatprep.subr.bf16.mxu0 %v6595_v44  ;;  %v6675_v36 = vcombine.high %v1044_v31, %v1048_v32  ;;  %v908_v37 = vld [vmem:[#allocation2 + $0x308] sm:$0xff]  ;;  %v6674_v42 = vcombine.low %v1044_v31, %v1048_v32  ;;  %v865_v31 = vld [vmem:[#allocation2 + $0x1b0] sm:$0xff] }
 0x25e   :  { %2484 = vmatpush1.bf16.msra.mxu1 %v6466_v50  ;;  %v912_v38 = vld [vmem:[#allocation2 + $0x328] sm:$0xff]  ;;  %v989_v32 = vld [vmem:[#allocation2 + $0x590] sm:$0xff] }
 0x25f   :  { %2485 = vmatprep.subr.bf16.mxu1 %v6459_v54  ;;  %v1036_v39 = vld [vmem:[#allocation2 + $0x708] sm:$0xff]  ;;  %v6539_v44 = vcombine.high %v908_v37, %v912_v38 }
 0x260   :  { %2527 = vmatpush1.bf16.msra.mxu0 %v6594_v51  ;;  %v1040_v40 = vld [vmem:[#allocation2 + $0x728] sm:$0xff]  ;;  %v6538_v51 = vcombine.low %v908_v37, %v912_v38  ;;  %v853_v38 = vld [vmem:[#allocation2 + $0x150] sm:$0xff] }
 0x261   :  { %2528 = vmatprep.subr.bf16.mxu0 %v6587_v55  ;;  %v6667_v46 = vcombine.high %v1036_v39, %v1040_v40  ;;  %v900_v47 = vld [vmem:[#allocation2 + $0x2c8] sm:$0xff]  ;;  %v6666_v54 = vcombine.low %v1036_v39, %v1040_v40  ;;  %v857_v39 = vld [vmem:[#allocation2 + $0x170] sm:$0xff] }
 0x262   :  { %2486 = vmatpush1.bf16.msra.mxu1 %v6458_v0  ;;  %v904_v48 = vld [vmem:[#allocation2 + $0x2e8] sm:$0xff]  ;;  %v981_v40 = vld [vmem:[#allocation2 + $0x550] sm:$0xff] }
 0x263   :  { %2487 = vmatprep.subr.bf16.mxu1 %v6451_v4  ;;  %v1028_v49 = vld [vmem:[#allocation2 + $0x6c8] sm:$0xff]  ;;  %v6531_v55 = vcombine.high %v900_v47, %v904_v48 }
 0x264   :  { %2529 = vmatpush1.bf16.msra.mxu0 %v6586_v1  ;;  %v1032_v50 = vld [vmem:[#allocation2 + $0x6e8] sm:$0xff]  ;;  %v6530_v1 = vcombine.low %v900_v47, %v904_v48  ;;  %v845_v48 = vld [vmem:[#allocation2 + $0x110] sm:$0xff] }
 0x265   :  { %2530 = vmatprep.subr.bf16.mxu0 %v6579_v5  ;;  %v6659_v58 = vcombine.high %v1028_v49, %v1032_v50  ;;  %v892_v59 = vld [vmem:[#allocation2 + $0x288] sm:$0xff]  ;;  %v6658_v4 = vcombine.low %v1028_v49, %v1032_v50  ;;  %v849_v49 = vld [vmem:[#allocation2 + $0x130] sm:$0xff] }
 0x266   :  { %2488 = vmatpush1.bf16.msra.mxu1 %v6450_v12  ;;  %v896_v60 = vld [vmem:[#allocation2 + $0x2a8] sm:$0xff]  ;;  %v973_v50 = vld [vmem:[#allocation2 + $0x510] sm:$0xff] }
 0x267   :  { %2489 = vmatprep.subr.bf16.mxu1 %v6443_v16  ;;  %v1020_v61 = vld [vmem:[#allocation2 + $0x688] sm:$0xff]  ;;  %v6523_v5 = vcombine.high %v892_v59, %v896_v60 }
 0x268   :  { %2531 = vmatpush1.bf16.msra.mxu0 %v6578_v13  ;;  %v1024_v0 = vld [vmem:[#allocation2 + $0x6a8] sm:$0xff]  ;;  %v6522_v13 = vcombine.low %v892_v59, %v896_v60  ;;  %v837_v60 = vld [vmem:[#allocation2 + $0xd0] sm:$0xff] }
 0x269   :  { %2532 = vmatprep.subr.bf16.mxu0 %v6571_v17  ;;  %v6651_v6 = vcombine.high %v1020_v61, %v1024_v0  ;;  %v884_v7 = vld [vmem:[#allocation2 + $0x248] sm:$0xff]  ;;  %v6650_v16 = vcombine.low %v1020_v61, %v1024_v0  ;;  %v841_v61 = vld [vmem:[#allocation2 + $0xf0] sm:$0xff] }
 0x26a   :  { %2490 = vmatpush1.bf16.msra.mxu1 %v6442_v52  ;;  %v888_v8 = vld [vmem:[#allocation2 + $0x268] sm:$0xff]  ;;  %v965_v0 = vld [vmem:[#allocation2 + $0x4d0] sm:$0xff] }
 0x26b   :  { %2491 = vmatprep.subr.bf16.mxu1 %v6563_v2  ;;  %v1012_v9 = vld [vmem:[#allocation2 + $0x648] sm:$0xff]  ;;  %v6515_v17 = vcombine.high %v884_v7, %v888_v8 }
 0x26c   :  { %2533 = vmatpush1.bf16.msra.mxu0 %v6570_v56  ;;  %v1016_v12 = vld [vmem:[#allocation2 + $0x668] sm:$0xff]  ;;  %v6514_v56 = vcombine.low %v884_v7, %v888_v8  ;;  %v829_v8 = vld [vmem:[#allocation2 + $0x90] sm:$0xff] }
 0x26d   :  { %2534 = vmatprep.subr.bf16.mxu0 %v6691_v62  ;;  %v6643_v23 = vcombine.high %v1012_v9, %v1016_v12  ;;  %v876_v25 = vld [vmem:[#allocation2 + $0x208] sm:$0xff]  ;;  %v6642_v2 = vcombine.low %v1012_v9, %v1016_v12  ;;  %v833_v9 = vld [vmem:[#allocation2 + $0xb0] sm:$0xff] }
 0x26e   :  { %2492 = vmatpush2.bf16.msra.mxu1 %v6562_v57  ;;  %v880_v26 = vld [vmem:[#allocation2 + $0x228] sm:$0xff]  ;;  %v1001_v57 = vld [vmem:[#allocation2 + $0x5f0] sm:$0xff] }
 0x26f   :  { %2493 = vmatprep.subr.bf16.mxu1 %v6555_v3  ;;  %v1004_v28 = vld [vmem:[#allocation2 + $0x608] sm:$0xff]  ;;  %v6507_v62 = vcombine.high %v876_v25, %v880_v26  ;;  %v6629_v15 = vcombine.high %v997_v53, %v1001_v57  ;;  %v957_v12 = vld [vmem:[#allocation2 + $0x490] sm:$0xff] }
 0x270   :  { %2535 = vmatpush2.bf16.msra.mxu0 %v6690_v63  ;;  %v1008_v52 = vld [vmem:[#allocation2 + $0x628] sm:$0xff]  ;;  %v6506_v63 = vcombine.low %v876_v25, %v880_v26  ;;  %v821_v26 = vld [vmem:[#allocation2 + $0x50] sm:$0xff] }
 0x271   :  { %2536 = vmatprep.subr.bf16.mxu0 %v6683_v11  ;;  %v6635_v10 = vcombine.high %v1004_v28, %v1008_v52  ;;  %v6634_v3 = vcombine.low %v1004_v28, %v1008_v52  ;;  %v6501_v11 = vcombine.high %v869_v14, %v873_v29  ;;  %v825_v28 = vld [vmem:[#allocation2 + $0x70] sm:$0xff] }
 0x272   :  { %2494 = vmatpush2.bf16.msra.mxu1 %v6554_v33  ;;  %v993_v33 = vld [vmem:[#allocation2 + $0x5b0] sm:$0xff] }
 0x273   :  { %2495 = vmatprep.subr.bf16.mxu1 %v6547_v35  ;;  %v6628_v35 = vcombine.low %v997_v53, %v1001_v57  ;;  %v6621_v37 = vcombine.high %v989_v32, %v993_v33  ;;  %v949_v52 = vld [vmem:[#allocation2 + $0x450] sm:$0xff] }
 0x274   :  { %2537 = vmatpush2.bf16.msra.mxu0 %v6682_v34  ;;  %v6500_v34 = vcombine.low %v869_v14, %v873_v29  ;;  %v813_v29 = vld [vmem:[#allocation2 + $0x10] sm:$0xff] }
 0x275   :  { %2538 = vmatprep.subr.bf16.mxu0 %v6675_v36  ;;  %v6493_v36 = vcombine.high %v861_v30, %v865_v31  ;;  %v817_v53 = vld [vmem:[#allocation2 + $0x30] sm:$0xff] }
 0x276   :  { %2496 = vmatpush2.bf16.msra.mxu1 %v6546_v41  ;;  %v985_v41 = vld [vmem:[#allocation2 + $0x570] sm:$0xff] }
 0x277   :  { %2497 = vmatprep.subr.bf16.mxu1 %v6539_v44  ;;  %v6620_v44 = vcombine.low %v989_v32, %v993_v33  ;;  %v6613_v47 = vcombine.high %v981_v40, %v985_v41  ;;  %v941_v57 = vld [vmem:[#allocation2 + $0x410] sm:$0xff] }
 0x278   :  { %2539 = vmatpush2.bf16.msra.mxu0 %v6674_v42  ;;  %v6492_v42 = vcombine.low %v861_v30, %v865_v31  ;;  %v933_v31 = vld [vmem:[#allocation2 + $0x3d0] sm:$0xff] }
 0x279   :  { %2540 = vmatprep.subr.bf16.mxu0 %v6667_v46  ;;  %v6485_v46 = vcombine.high %v853_v38, %v857_v39  ;;  %v937_v32 = vld [vmem:[#allocation2 + $0x3f0] sm:$0xff] }
 0x27a   :  { %2498 = vmatpush2.bf16.msra.mxu1 %v6538_v51  ;;  %v977_v51 = vld [vmem:[#allocation2 + $0x530] sm:$0xff] }
 0x27b   :  { %2499 = vmatprep.subr.bf16.mxu1 %v6531_v55  ;;  %v6612_v55 = vcombine.low %v981_v40, %v985_v41  ;;  %v6605_v59 = vcombine.high %v973_v50, %v977_v51  ;;  %v1061_v33 = vld [vmem:[#allocation2 + $0x7d0] sm:$0xff] }
 0x27c   :  { %2541 = vmatpush2.bf16.msra.mxu0 %v6666_v54  ;;  %v6484_v54 = vcombine.low %v853_v38, %v857_v39  ;;  %v925_v39 = vld [vmem:[#allocation2 + $0x390] sm:$0xff] }
 0x27d   :  { %2542 = vmatprep.subr.bf16.mxu0 %v6659_v58  ;;  %v6477_v58 = vcombine.high %v845_v48, %v849_v49  ;;  %v929_v40 = vld [vmem:[#allocation2 + $0x3b0] sm:$0xff] }
 0x27e   :  { %2500 = vmatpush2.bf16.msra.mxu1 %v6530_v1  ;;  %v969_v1 = vld [vmem:[#allocation2 + $0x4f0] sm:$0xff] }
 0x27f   :  { %2501 = vmatprep.subr.bf16.mxu1 %v6523_v5  ;;  %v6604_v5 = vcombine.low %v973_v50, %v977_v51  ;;  %v6597_v7 = vcombine.high %v965_v0, %v969_v1  ;;  %v1053_v41 = vld [vmem:[#allocation2 + $0x790] sm:$0xff] }
 0x280   :  { %2543 = vmatpush2.bf16.msra.mxu0 %v6658_v4  ;;  %v6476_v4 = vcombine.low %v845_v48, %v849_v49  ;;  %v917_v49 = vld [vmem:[#allocation2 + $0x350] sm:$0xff] }
 0x281   :  { %2544 = vmatprep.subr.bf16.mxu0 %v6651_v6  ;;  %v6469_v6 = vcombine.high %v837_v60, %v841_v61  ;;  %v921_v50 = vld [vmem:[#allocation2 + $0x370] sm:$0xff] }
 0x282   :  { %2502 = vmatpush2.bf16.msra.mxu1 %v6522_v13  ;;  %v961_v13 = vld [vmem:[#allocation2 + $0x4b0] sm:$0xff] }
 0x283   :  { %2503 = vmatprep.subr.bf16.mxu1 %v6515_v17  ;;  %v6596_v17 = vcombine.low %v965_v0, %v969_v1  ;;  %v6589_v25 = vcombine.high %v957_v12, %v961_v13  ;;  %v1045_v51 = vld [vmem:[#allocation2 + $0x750] sm:$0xff] }
 0x284   :  { %2545 = vmatpush2.bf16.msra.mxu0 %v6650_v16  ;;  %v6468_v16 = vcombine.low %v837_v60, %v841_v61  ;;  %v909_v61 = vld [vmem:[#allocation2 + $0x310] sm:$0xff] }
 0x285   :  { %2546 = vmatprep.subr.bf16.mxu0 %v6643_v23  ;;  %v6461_v23 = vcombine.high %v829_v8, %v833_v9  ;;  %v913_v0 = vld [vmem:[#allocation2 + $0x330] sm:$0xff] }
 0x286   :  { %2504 = vmatpush2.bf16.msra.mxu1 %v6514_v56  ;;  %v953_v56 = vld [vmem:[#allocation2 + $0x470] sm:$0xff] }
 0x287   :  { %2505 = vmatprep.subr.bf16.mxu1 %v6507_v62  ;;  %v6588_v62 = vcombine.low %v957_v12, %v961_v13  ;;  %v6581_v14 = vcombine.high %v949_v52, %v953_v56  ;;  %v1037_v1 = vld [vmem:[#allocation2 + $0x710] sm:$0xff] }
 0x288   :  { %2547 = vmatpush2.bf16.msra.mxu0 %v6642_v2  ;;  %v6460_v2 = vcombine.low %v829_v8, %v833_v9  ;;  %v901_v9 = vld [vmem:[#allocation2 + $0x2d0] sm:$0xff] }
 0x289   :  { %2548 = vmatprep.subr.bf16.mxu0 %v6635_v10  ;;  %v6453_v10 = vcombine.high %v821_v26, %v825_v28  ;;  %v905_v12 = vld [vmem:[#allocation2 + $0x2f0] sm:$0xff] }
 0x28a   :  { %2506 = vmatpush2.bf16.msra.mxu1 %v6506_v63  ;;  %v945_v63 = vld [vmem:[#allocation2 + $0x430] sm:$0xff] }
 0x28b   :  { %2561 = vmatprep.subr.bf16.mxu1 %v6501_v11  ;;  %v6580_v11 = vcombine.low %v949_v52, %v953_v56  ;;  %v6573_v30 = vcombine.high %v941_v57, %v945_v63  ;;  %v1029_v13 = vld [vmem:[#allocation2 + $0x6d0] sm:$0xff] }
 0x28c   :  { %2549 = vmatpush2.bf16.msra.mxu0 %v6634_v3  ;;  %v6452_v3 = vcombine.low %v821_v26, %v825_v28  ;;  %v893_v28 = vld [vmem:[#allocation2 + $0x290] sm:$0xff] }
 0x28d   :  { %2604 = vmatprep.subr.bf16.mxu0 %v6629_v15  ;;  %2508 = vmatmul.mubr.bf16.vlgmr.msra.gmra.mxu1 %v8358_v24  ;;  %v6445_v15 = vcombine.high %v813_v29, %v817_v53  ;;  %v897_v52 = vld [vmem:[#allocation2 + $0x2b0] sm:$0xff] }
 0x28e   :  { %2562 = vmatpush1.bf16.msra.mxu1 %v6500_v34  ;;  %2593 = vmatprep.mubr.bf16.mxu1 %v8346_v18  ;;  %v1065_v34 = vld [vmem:[#allocation2 + $0x7f0] sm:$0xff] }
 0x28f   :  { %2551 = vmatmul.mubr.bf16.vlgmr.msra.gmra.mxu0 %v8366_v27  ;;  %2563 = vmatprep.subr.bf16.mxu1 %v6493_v36  ;;  %v6572_v36 = vcombine.low %v941_v57, %v945_v63  ;;  %v6693_v38 = vcombine.high %v1061_v33, %v1065_v34  ;;  %v1021_v56 = vld [vmem:[#allocation2 + $0x690] sm:$0xff] }
 0x290   :  { %2605 = vmatpush1.bf16.msra.mxu0 %v6628_v35  ;;  %2636 = vmatprep.mubr.bf16.mxu0 %v8348_v22  ;;  %v6444_v35 = vcombine.low %v813_v29, %v817_v53  ;;  %v885_v53 = vld [vmem:[#allocation2 + $0x250] sm:$0xff] }
 0x291   :  { %2606 = vmatprep.subr.bf16.mxu0 %v6621_v37  ;;  %v6565_v37 = vcombine.high %v933_v31, %v937_v32  ;;  %v889_v57 = vld [vmem:[#allocation2 + $0x270] sm:$0xff] }
 0x292   :  { %2564 = vmatpush1.bf16.msra.mxu1 %v6492_v42  ;;  %v1057_v42 = vld [vmem:[#allocation2 + $0x7b0] sm:$0xff] }
 0x293   :  { %2565 = vmatprep.subr.bf16.mxu1 %v6485_v46  ;;  %v6692_v46 = vcombine.low %v1061_v33, %v1065_v34  ;;  %v6685_v48 = vcombine.high %v1053_v41, %v1057_v42  ;;  %v1013_v63 = vld [vmem:[#allocation2 + $0x650] sm:$0xff] }
 0x294   :  { %2607 = vmatpush1.bf16.msra.mxu0 %v6620_v44  ;;  %v6564_v44 = vcombine.low %v933_v31, %v937_v32  ;;  %v877_v32 = vld [vmem:[#allocation2 + $0x210] sm:$0xff] }
 0x295   :  { %2608 = vmatprep.subr.bf16.mxu0 %v6613_v47  ;;  %v6557_v47 = vcombine.high %v925_v39, %v929_v40  ;;  %v881_v33 = vld [vmem:[#allocation2 + $0x230] sm:$0xff] }
 0x296   :  { %2566 = vmatpush1.bf16.msra.mxu1 %v6484_v54  ;;  %v1049_v54 = vld [vmem:[#allocation2 + $0x770] sm:$0xff] }
 0x297   :  { %2567 = vmatprep.subr.bf16.mxu1 %v6477_v58  ;;  %v6684_v58 = vcombine.low %v1053_v41, %v1057_v42  ;;  %v6677_v60 = vcombine.high %v1045_v51, %v1049_v54  ;;  %v1005_v34 = vld [vmem:[#allocation2 + $0x610] sm:$0xff]  ;;  %v874_v41 = vld [vmem:[#allocation2 + $0x1f8] sm:$0xff] }
 0x298   :  { %2609 = vmatpush1.bf16.msra.mxu0 %v6612_v55  ;;  %v6556_v55 = vcombine.low %v925_v39, %v929_v40  ;;  %v870_v40 = vld [vmem:[#allocation2 + $0x1d8] sm:$0xff] }
 0x299   :  { %2610 = vmatprep.subr.bf16.mxu0 %v6605_v59  ;;  %v6549_v59 = vcombine.high %v917_v49, %v921_v50  ;;  %v998_v42 = vld [vmem:[#allocation2 + $0x5d8] sm:$0xff] }
 0x29a   :  { %2568 = vmatpush1.bf16.msra.mxu1 %v6476_v4  ;;  %v1041_v4 = vld [vmem:[#allocation2 + $0x730] sm:$0xff] }
 0x29b   :  { %2569 = vmatprep.subr.bf16.mxu1 %v6469_v6  ;;  %v6676_v6 = vcombine.low %v1045_v51, %v1049_v54  ;;  %v6669_v8 = vcombine.high %v1037_v1, %v1041_v4  ;;  %v866_v51 = vld [vmem:[#allocation2 + $0x1b8] sm:$0xff] }
 0x29c   :  { %2611 = vmatpush1.bf16.msra.mxu0 %v6604_v5  ;;  %v6548_v5 = vcombine.low %v917_v49, %v921_v50  ;;  %v862_v50 = vld [vmem:[#allocation2 + $0x198] sm:$0xff] }
 0x29d   :  { %2612 = vmatprep.subr.bf16.mxu0 %v6597_v7  ;;  %v6541_v7 = vcombine.high %v909_v61, %v913_v0  ;;  %v990_v54 = vld [vmem:[#allocation2 + $0x598] sm:$0xff] }
 0x29e   :  { %2570 = vmatpush1.bf16.msra.mxu1 %v6468_v16  ;;  %v1033_v16 = vld [vmem:[#allocation2 + $0x6f0] sm:$0xff] }
 0x29f   :  { %2571 = vmatprep.subr.bf16.mxu1 %v6461_v23  ;;  %v6668_v23 = vcombine.low %v1037_v1, %v1041_v4  ;;  %v6661_v26 = vcombine.high %v1029_v13, %v1033_v16  ;;  %v858_v1 = vld [vmem:[#allocation2 + $0x178] sm:$0xff] }
 0x2a0   :  { %2613 = vmatpush1.bf16.msra.mxu0 %v6596_v17  ;;  %v6540_v17 = vcombine.low %v909_v61, %v913_v0  ;;  %v854_v0 = vld [vmem:[#allocation2 + $0x158] sm:$0xff] }
 0x2a1   :  { %2614 = vmatprep.subr.bf16.mxu0 %v6589_v25  ;;  %v6533_v25 = vcombine.high %v901_v9, %v905_v12  ;;  %v982_v4 = vld [vmem:[#allocation2 + $0x558] sm:$0xff] }
 0x2a2   :  { %2572 = vmatpush1.bf16.msra.mxu1 %v6460_v2  ;;  %v1025_v2 = vld [vmem:[#allocation2 + $0x6b0] sm:$0xff] }
 0x2a3   :  { %2573 = vmatprep.subr.bf16.mxu1 %v6453_v10  ;;  %v6660_v10 = vcombine.low %v1029_v13, %v1033_v16  ;;  %v6653_v29 = vcombine.high %v1021_v56, %v1025_v2  ;;  %v850_v13 = vld [vmem:[#allocation2 + $0x138] sm:$0xff] }
 0x2a4   :  { %2615 = vmatpush1.bf16.msra.mxu0 %v6588_v62  ;;  %v6532_v62 = vcombine.low %v901_v9, %v905_v12  ;;  %v846_v12 = vld [vmem:[#allocation2 + $0x118] sm:$0xff] }
 0x2a5   :  { %2616 = vmatprep.subr.bf16.mxu0 %v6581_v14  ;;  %v6525_v14 = vcombine.high %v893_v28, %v897_v52  ;;  %v974_v16 = vld [vmem:[#allocation2 + $0x518] sm:$0xff] }
 0x2a6   :  { %2574 = vmatpush1.bf16.msra.mxu1 %v6452_v3  ;;  %v1017_v3 = vld [vmem:[#allocation2 + $0x670] sm:$0xff] }
 0x2a7   :  { %2575 = vmatprep.subr.bf16.mxu1 %v6445_v15  ;;  %v6652_v15 = vcombine.low %v1021_v56, %v1025_v2  ;;  %v6645_v31 = vcombine.high %v1013_v63, %v1017_v3  ;;  %v842_v56 = vld [vmem:[#allocation2 + $0xf8] sm:$0xff] }
 0x2a8   :  { %2617 = vmatpush1.bf16.msra.mxu0 %v6580_v11  ;;  %v6524_v11 = vcombine.low %v893_v28, %v897_v52  ;;  %v838_v52 = vld [vmem:[#allocation2 + $0xd8] sm:$0xff] }
 0x2a9   :  { %2618 = vmatprep.subr.bf16.mxu0 %v6573_v30  ;;  %v6517_v30 = vcombine.high %v885_v53, %v889_v57  ;;  %v966_v2 = vld [vmem:[#allocation2 + $0x4d8] sm:$0xff] }
 0x2aa   :  { %2576 = vmatpush1.bf16.msra.mxu1 %v6444_v35  ;;  %v1009_v35 = vld [vmem:[#allocation2 + $0x630] sm:$0xff] }
 0x2ab   :  { %2577 = vmatprep.subr.bf16.mxu1 %v6565_v37  ;;  %v6644_v37 = vcombine.low %v1013_v63, %v1017_v3  ;;  %v6637_v39 = vcombine.high %v1005_v34, %v1009_v35  ;;  %v962_v63 = vld [vmem:[#allocation2 + $0x4b8] sm:$0xff]  ;;  %v6470_v3 = vcombine.low %v838_v52, %v842_v56 }
 0x2ac   :  { %2619 = vmatpush1.bf16.msra.mxu0 %v6572_v36  ;;  %v6516_v36 = vcombine.low %v885_v53, %v889_v57  ;;  %v834_v53 = vld [vmem:[#allocation2 + $0xb8] sm:$0xff] }
 0x2ad   :  { %2620 = vmatprep.subr.bf16.mxu0 %v6693_v38  ;;  %v6509_v38 = vcombine.high %v877_v32, %v881_v33  ;;  %v958_v57 = vld [vmem:[#allocation2 + $0x498] sm:$0xff] }
 0x2ae   :  { %2578 = vmatpush2.bf16.msra.mxu1 %v6564_v44  ;;  %v1002_v44 = vld [vmem:[#allocation2 + $0x5f8] sm:$0xff] }
 0x2af   :  { %2579 = vmatprep.subr.bf16.mxu1 %v6557_v47  ;;  %v6636_v47 = vcombine.low %v1005_v34, %v1009_v35  ;;  %v6631_v49 = vcombine.high %v998_v42, %v1002_v44  ;;  %v954_v34 = vld [vmem:[#allocation2 + $0x478] sm:$0xff] }
 0x2b0   :  { %2621 = vmatpush2.bf16.msra.mxu0 %v6692_v46  ;;  %v6508_v46 = vcombine.low %v877_v32, %v881_v33  ;;  %v826_v32 = vld [vmem:[#allocation2 + $0x78] sm:$0xff] }
 0x2b1   :  { %2622 = vmatprep.subr.bf16.mxu0 %v6685_v48  ;;  %v6503_v48 = vcombine.high %v870_v40, %v874_v41  ;;  %v950_v33 = vld [vmem:[#allocation2 + $0x458] sm:$0xff] }
 0x2b2   :  { %2580 = vmatpush2.bf16.msra.mxu1 %v6556_v55  ;;  %v994_v55 = vld [vmem:[#allocation2 + $0x5b8] sm:$0xff] }
 0x2b3   :  { %2581 = vmatprep.subr.bf16.mxu1 %v6549_v59  ;;  %v6630_v59 = vcombine.low %v998_v42, %v1002_v44  ;;  %v6623_v61 = vcombine.high %v990_v54, %v994_v55  ;;  %v946_v42 = vld [vmem:[#allocation2 + $0x438] sm:$0xff] }
 0x2b4   :  { %2623 = vmatpush2.bf16.msra.mxu0 %v6684_v58  ;;  %v6502_v58 = vcombine.low %v870_v40, %v874_v41  ;;  %v818_v40 = vld [vmem:[#allocation2 + $0x38] sm:$0xff] }
 0x2b5   :  { %2624 = vmatprep.subr.bf16.mxu0 %v6677_v60  ;;  %v6495_v60 = vcombine.high %v862_v50, %v866_v51  ;;  %v942_v41 = vld [vmem:[#allocation2 + $0x418] sm:$0xff] }
 0x2b6   :  { %2582 = vmatpush2.bf16.msra.mxu1 %v6548_v5  ;;  %v986_v5 = vld [vmem:[#allocation2 + $0x578] sm:$0xff] }
 0x2b7   :  { %2583 = vmatprep.subr.bf16.mxu1 %v6541_v7  ;;  %v6622_v7 = vcombine.low %v990_v54, %v994_v55  ;;  %v6615_v9 = vcombine.high %v982_v4, %v986_v5  ;;  %v1066_v54 = vld [vmem:[#allocation2 + $0x7f8] sm:$0xff] }
 0x2b8   :  { %2625 = vmatpush2.bf16.msra.mxu0 %v6676_v6  ;;  %v6494_v6 = vcombine.low %v862_v50, %v866_v51  ;;  %v938_v50 = vld [vmem:[#allocation2 + $0x3f8] sm:$0xff] }
 0x2b9   :  { %2626 = vmatprep.subr.bf16.mxu0 %v6669_v8  ;;  %v6487_v8 = vcombine.high %v854_v0, %v858_v1  ;;  %v1062_v51 = vld [vmem:[#allocation2 + $0x7d8] sm:$0xff] }
 0x2ba   :  { %2584 = vmatpush2.bf16.msra.mxu1 %v6540_v17  ;;  %v978_v17 = vld [vmem:[#allocation2 + $0x538] sm:$0xff] }
 0x2bb   :  { %2585 = vmatprep.subr.bf16.mxu1 %v6533_v25  ;;  %v6614_v25 = vcombine.low %v982_v4, %v986_v5  ;;  %v6607_v28 = vcombine.high %v974_v16, %v978_v17  ;;  %v1058_v4 = vld [vmem:[#allocation2 + $0x7b8] sm:$0xff] }
 0x2bc   :  { %2627 = vmatpush2.bf16.msra.mxu0 %v6668_v23  ;;  %v6486_v23 = vcombine.low %v854_v0, %v858_v1  ;;  %v930_v0 = vld [vmem:[#allocation2 + $0x3b8] sm:$0xff] }
 0x2bd   :  { %2628 = vmatprep.subr.bf16.mxu0 %v6661_v26  ;;  %v6479_v26 = vcombine.high %v846_v12, %v850_v13  ;;  %v1054_v1 = vld [vmem:[#allocation2 + $0x798] sm:$0xff] }
 0x2be   :  { %2586 = vmatpush2.bf16.msra.mxu1 %v6532_v62  ;;  %v970_v62 = vld [vmem:[#allocation2 + $0x4f8] sm:$0xff] }
 0x2bf   :  { %2587 = vmatprep.subr.bf16.mxu1 %v6525_v14  ;;  %v6471_v14 = vcombine.high %v838_v52, %v842_v56  ;;  %v914_v52 = vld [vmem:[#allocation2 + $0x338] sm:$0xff] }
 0x2c0   :  { %2629 = vmatpush2.bf16.msra.mxu0 %v6660_v10  ;;  %v6478_v10 = vcombine.low %v846_v12, %v850_v13  ;;  %v922_v12 = vld [vmem:[#allocation2 + $0x378] sm:$0xff] }
 0x2c1   :  { %2630 = vmatprep.subr.bf16.mxu0 %v6653_v29  ;;  %v830_v29 = vld [vmem:[#allocation2 + $0x98] sm:$0xff] }
 0x2c2   :  { %2588 = vmatpush2.bf16.msra.mxu1 %v6524_v11  ;;  %v6598_v11 = vcombine.low %v966_v2, %v970_v62  ;;  %v6462_v35 = vcombine.low %v830_v29, %v834_v53  ;;  %v1046_v13 = vld [vmem:[#allocation2 + $0x758] sm:$0xff] }
 0x2c3   :  { %2589 = vmatprep.subr.bf16.mxu1 %v6517_v30  ;;  %v6591_v30 = vcombine.high %v958_v57, %v962_v63  ;;  %v1038_v56 = vld [vmem:[#allocation2 + $0x718] sm:$0xff] }
 0x2c4   :  { %2631 = vmatpush2.bf16.msra.mxu0 %v6652_v15  ;;  %v6463_v15 = vcombine.high %v830_v29, %v834_v53  ;;  %v906_v29 = vld [vmem:[#allocation2 + $0x2f8] sm:$0xff] }
 0x2c5   :  { %2632 = vmatprep.subr.bf16.mxu0 %v6645_v31  ;;  %v822_v31 = vld [vmem:[#allocation2 + $0x58] sm:$0xff] }
 0x2c6   :  { %2590 = vmatpush2.bf16.msra.mxu1 %v6516_v36  ;;  %v6590_v36 = vcombine.low %v958_v57, %v962_v63  ;;  %v6454_v44 = vcombine.low %v822_v31, %v826_v32  ;;  %v1030_v53 = vld [vmem:[#allocation2 + $0x6d8] sm:$0xff] }
 0x2c7   :  { %2591 = vmatprep.subr.bf16.mxu1 %v6509_v38  ;;  %v6583_v38 = vcombine.high %v950_v33, %v954_v34  ;;  %v1034_v57 = vld [vmem:[#allocation2 + $0x6f8] sm:$0xff] }
 0x2c8   :  { %2633 = vmatpush2.bf16.msra.mxu0 %v6644_v37  ;;  %v6455_v37 = vcombine.high %v822_v31, %v826_v32  ;;  %v898_v31 = vld [vmem:[#allocation2 + $0x2b8] sm:$0xff] }
 0x2c9   :  { %2634 = vmatprep.subr.bf16.mxu0 %v6637_v39  ;;  %v814_v39 = vld [vmem:[#allocation2 + $0x18] sm:$0xff] }
 0x2ca   :  { %2592 = vmatpush2.bf16.msra.mxu1 %v6508_v46  ;;  %v6582_v46 = vcombine.low %v950_v33, %v954_v34  ;;  %v6446_v55 = vcombine.low %v814_v39, %v818_v40  ;;  %v1022_v32 = vld [vmem:[#allocation2 + $0x698] sm:$0xff] }
 0x2cb   :  { %2647 = vmatprep.subr.bf16.mxu1 %v6503_v48  ;;  %v6575_v48 = vcombine.high %v942_v41, %v946_v42  ;;  %v1026_v33 = vld [vmem:[#allocation2 + $0x6b8] sm:$0xff] }
 0x2cc   :  { %2635 = vmatpush2.bf16.msra.mxu0 %v6636_v47  ;;  %v6447_v47 = vcombine.high %v814_v39, %v818_v40  ;;  %v890_v39 = vld [vmem:[#allocation2 + $0x278] sm:$0xff] }
 0x2cd   :  { %2690 = vmatprep.subr.bf16.mxu0 %v6631_v49  ;;  %2594 = vmatmul.mubr.bf16.vlgmr.msra.gmra.mxu1 %v8358_v24  ;;  %v934_v49 = vld [vmem:[#allocation2 + $0x3d8] sm:$0xff] }
 0x2ce   :  { %2648 = vmatpush1.bf16.msra.mxu1 %v6502_v58  ;;  %2679 = vmatprep.mubr.bf16.mxu1 %v8346_v18  ;;  %v6606_v18 = vcombine.low %v974_v16, %v978_v17  ;;  %v6574_v58 = vcombine.low %v942_v41, %v946_v42  ;;  %v6566_v5 = vcombine.low %v934_v49, %v938_v50  ;;  %v1050_v16 = vld [vmem:[#allocation2 + $0x778] sm:$0xff] }
 0x2cf   :  { %2637 = vmatmul.mubr.bf16.vlgmr.msra.gmra.mxu0 %v8366_v27  ;;  %2649 = vmatprep.subr.bf16.mxu1 %v6495_v60  ;;  %v6695_v60 = vcombine.high %v1062_v51, %v1066_v54  ;;  %v1014_v40 = vld [vmem:[#allocation2 + $0x658] sm:$0xff] }
 0x2d0   :  { %2691 = vmatpush1.bf16.msra.mxu0 %v6630_v59  ;;  %2722 = vmatprep.mubr.bf16.mxu0 %v8348_v22  ;;  %v6599_v22 = vcombine.high %v966_v2, %v970_v62  ;;  %v6567_v59 = vcombine.high %v934_v49, %v938_v50  ;;  %v1042_v2 = vld [vmem:[#allocation2 + $0x738] sm:$0xff] }
 0x2d1   :  { %2692 = vmatprep.subr.bf16.mxu0 %v6623_v61  ;;  %v926_v61 = vld [vmem:[#allocation2 + $0x398] sm:$0xff] }
 0x2d2   :  { %2650 = vmatpush1.bf16.msra.mxu1 %v6494_v6  ;;  %v6694_v6 = vcombine.low %v1062_v51, %v1066_v54  ;;  %v6558_v17 = vcombine.low %v926_v61, %v930_v0  ;;  %v1018_v41 = vld [vmem:[#allocation2 + $0x678] sm:$0xff] }
 0x2d3   :  { %2651 = vmatprep.subr.bf16.mxu1 %v6487_v8  ;;  %v6687_v8 = vcombine.high %v1054_v1, %v1058_v4  ;;  %v882_v49 = vld [vmem:[#allocation2 + $0x238] sm:$0xff] }
 0x2d4   :  { %2693 = vmatpush1.bf16.msra.mxu0 %v6622_v7  ;;  %v6559_v7 = vcombine.high %v926_v61, %v930_v0  ;;  %v1006_v50 = vld [vmem:[#allocation2 + $0x618] sm:$0xff]  ;;  %v8380_v0 = vld [vmem:[#allocation12] sm:$0xff] }
 0x2d5   :  { %2694 = vmatprep.subr.bf16.mxu0 %v6615_v9  ;;  %v918_v9 = vld [vmem:[#allocation2 + $0x358] sm:$0xff] }
 0x2d6   :  { %2652 = vmatpush1.bf16.msra.mxu1 %v6486_v23  ;;  %v6686_v23 = vcombine.low %v1054_v1, %v1058_v4  ;;  %v6550_v62 = vcombine.low %v918_v9, %v922_v12  ;;  %v1010_v51 = vld [vmem:[#allocation2 + $0x638] sm:$0xff]  ;;  %v1072_v1 = vrot.slane %v8380_v0, %v8298_v21  ;;  %v1076_v4 = vrot.slane %v8380_v0, %v8295_v20 }
 0x2d7   :  { %2653 = vmatprep.subr.bf16.mxu1 %v6479_v26  ;;  %v6679_v26 = vcombine.high %v1046_v13, %v1050_v16  ;;  %v6638_v61 = vcombine.low %v1006_v50, %v1010_v51 }
 0x2d8   :  { %2695 = vmatpush1.bf16.msra.mxu0 %v6614_v25  ;;  %v6551_v25 = vcombine.high %v918_v9, %v922_v12 }
 0x2d9   :  { %2696 = vmatprep.subr.bf16.mxu0 %v6607_v28  ;;  %v910_v28 = vld [vmem:[#allocation2 + $0x318] sm:$0xff] }
 0x2da   :  { %2654 = vmatpush1.bf16.msra.mxu1 %v6478_v10  ;;  %v6678_v10 = vcombine.low %v1046_v13, %v1050_v16  ;;  %v6542_v63 = vcombine.low %v910_v28, %v914_v52 }
 0x2db   :  { %2655 = vmatprep.subr.bf16.mxu1 %v6471_v14  ;;  %v6671_v14 = vcombine.high %v1038_v56, %v1042_v2 }
 0x2dc   :  { %2697 = vmatpush1.bf16.msra.mxu0 %v6606_v18  ;;  %v6543_v18 = vcombine.high %v910_v28, %v914_v52 }
 0x2dd   :  { %2698 = vmatprep.subr.bf16.mxu0 %v6599_v22  ;;  %v902_v22 = vld [vmem:[#allocation2 + $0x2d8] sm:$0xff] }
 0x2de   :  { %2656 = vmatpush1.bf16.msra.mxu1 %v6470_v3  ;;  %v6670_v3 = vcombine.low %v1038_v56, %v1042_v2  ;;  %v6534_v34 = vcombine.low %v902_v22, %v906_v29 }
 0x2df   :  { %2657 = vmatprep.subr.bf16.mxu1 %v6463_v15  ;;  %v6663_v15 = vcombine.high %v1030_v53, %v1034_v57 }
 0x2e0   :  { %2699 = vmatpush1.bf16.msra.mxu0 %v6598_v11  ;;  %v6535_v11 = vcombine.high %v902_v22, %v906_v29 }
 0x2e1   :  { %2700 = vmatprep.subr.bf16.mxu0 %v6591_v30  ;;  %v894_v30 = vld [vmem:[#allocation2 + $0x298] sm:$0xff] }
 0x2e2   :  { %2658 = vmatpush1.bf16.msra.mxu1 %v6462_v35  ;;  %v6662_v35 = vcombine.low %v1030_v53, %v1034_v57  ;;  %v6526_v42 = vcombine.low %v894_v30, %v898_v31  ;;  %v1080_v53 = vrot.slane %v8380_v0, %v8309_v43  ;;  %v1084_v57 = vrot.slane %v8380_v0, %v8312_v45 }
 0x2e3   :  { %2659 = vmatprep.subr.bf16.mxu1 %v6455_v37  ;;  %v6655_v37 = vcombine.high %v1022_v32, %v1026_v33 }
 0x2e4   :  { %2701 = vmatpush1.bf16.msra.mxu0 %v6590_v36  ;;  %v6527_v36 = vcombine.high %v894_v30, %v898_v31 }
 0x2e5   :  { %2702 = vmatprep.subr.bf16.mxu0 %v6583_v38  ;;  %v886_v38 = vld [vmem:[#allocation2 + $0x258] sm:$0xff] }
 0x2e6   :  { %2660 = vmatpush1.bf16.msra.mxu1 %v6454_v44  ;;  %v6654_v44 = vcombine.low %v1022_v32, %v1026_v33  ;;  %v6518_v54 = vcombine.low %v886_v38, %v890_v39 }
 0x2e7   :  { %2661 = vmatprep.subr.bf16.mxu1 %v6447_v47  ;;  %v6647_v47 = vcombine.high %v1014_v40, %v1018_v41 }
 0x2e8   :  { %2703 = vmatpush1.bf16.msra.mxu0 %v6582_v46  ;;  %v6519_v46 = vcombine.high %v886_v38, %v890_v39 }
 0x2e9   :  { %2704 = vmatprep.subr.bf16.mxu0 %v6575_v48  ;;  %v878_v48 = vld [vmem:[#allocation2 + $0x218] sm:$0xff] }
 0x2ea   :  { %2662 = vmatpush1.bf16.msra.mxu1 %v6446_v55  ;;  %v6646_v55 = vcombine.low %v1014_v40, %v1018_v41 }
 0x2eb   :  { %2663 = vmatprep.subr.bf16.mxu1 %v6567_v59  ;;  %v6639_v59 = vcombine.high %v1006_v50, %v1010_v51 }
 0x2ec   :  { %2705 = vmatpush1.bf16.msra.mxu0 %v6574_v58  ;;  %v6511_v58 = vcombine.high %v878_v48, %v882_v49 }
 0x2ed   :  { %2706 = vmatprep.subr.bf16.mxu0 %v6695_v60  ;;  %v6510_v60 = vcombine.low %v878_v48, %v882_v49 }
 0x2ee   :  { %2664 = vmatpush2.bf16.msra.mxu1 %v6566_v5 }
 0x2ef   :  { %2665 = vmatprep.subr.bf16.mxu1 %v6559_v7 }
 0x2f0   :  { %2707 = vmatpush2.bf16.msra.mxu0 %v6694_v6 }
 0x2f1   :  { %2708 = vmatprep.subr.bf16.mxu0 %v6687_v8 }
 0x2f2   :  { %2666 = vmatpush2.bf16.msra.mxu1 %v6558_v17 }
 0x2f3   :  { %2667 = vmatprep.subr.bf16.mxu1 %v6551_v25 }
 0x2f4   :  { %2709 = vmatpush2.bf16.msra.mxu0 %v6686_v23 }
 0x2f5   :  { %2710 = vmatprep.subr.bf16.mxu0 %v6679_v26 }
 0x2f6   :  { %2668 = vmatpush2.bf16.msra.mxu1 %v6550_v62 }
 0x2f7   :  { %2669 = vmatprep.subr.bf16.mxu1 %v6543_v18 }
 0x2f8   :  { %2711 = vmatpush2.bf16.msra.mxu0 %v6678_v10 }
 0x2f9   :  { %2712 = vmatprep.subr.bf16.mxu0 %v6671_v14 }
 0x2fa   :  { %2670 = vmatpush2.bf16.msra.mxu1 %v6542_v63 }
 0x2fb   :  { %2671 = vmatprep.subr.bf16.mxu1 %v6535_v11 }
 0x2fc   :  { %2713 = vmatpush2.bf16.msra.mxu0 %v6670_v3 }
 0x2fd   :  { %2714 = vmatprep.subr.bf16.mxu0 %v6663_v15 }
 0x2fe   :  { %2672 = vmatpush2.bf16.msra.mxu1 %v6534_v34 }
 0x2ff   :  { %2673 = vmatprep.subr.bf16.mxu1 %v6527_v36 }
 0x300   :  { %2715 = vmatpush2.bf16.msra.mxu0 %v6662_v35 }
 0x301   :  { %2716 = vmatprep.subr.bf16.mxu0 %v6655_v37 }
 0x302   :  { %2674 = vmatpush2.bf16.msra.mxu1 %v6526_v42 }
 0x303   :  { %2675 = vmatprep.subr.bf16.mxu1 %v6519_v46 }
 0x304   :  { %2717 = vmatpush2.bf16.msra.mxu0 %v6654_v44 }
 0x305   :  { %2718 = vmatprep.subr.bf16.mxu0 %v6647_v47 }
 0x306   :  { %2676 = vmatpush2.bf16.msra.mxu1 %v6518_v54  ;;  %v1087_v54 = vsub.s32 4, %v8292_v19 }
 0x307   :  { %2677 = vmatprep.subr.bf16.mxu1 %v6511_v58 }
 0x308   :  { %2719 = vmatpush2.bf16.msra.mxu0 %v6646_v55  ;;  %v1091_v55 = vsub.s32 5, %v8292_v19  ;;  %v1088_v58 = vrot.slane %v8380_v0, %v1087_v54 }
 0x309   :  { %2720 = vmatprep.subr.bf16.mxu0 %v6639_v59 }
 0x30a   :  { %2678 = vmatpush2.bf16.msra.mxu1 %v6510_v60  ;;  %v1092_v59 = vrot.slane %v8380_v0, %v1091_v55 }
 0x30c   :  { %2721 = vmatpush2.bf16.msra.mxu0 %v6638_v61 }
 0x30d   :  { %v2423_v5 = vpop.f32.mrf.mxu1  ;;  %2680 = vmatmul.mubr.bf16.vlgmr.msra.gmra.mxu1 %v8358_v24 }
 0x30e   :  { %v2424_v6 = vadd.f32 %v2423_v5, %v1072_v1 }
 0x30f   :  { %v2466_v7 = vpop.f32.mrf.mxu0  ;;  %2723 = vmatmul.mubr.bf16.vlgmr.msra.gmra.mxu0 %v8366_v27  ;;  %v2425_v8 = vpop.f32.mrf.mxu1 }
 0x310   :  { %v8388_v9 = vadd.f32 %v2466_v7, %v2424_v6  ;;  %v2426_v12 = vadd.f32 %v2425_v8, %v1076_v4 }
 0x311   :  { %v2468_v13 = vpop.f32.mrf.mxu0  ;;  %v2427_v16 = vpop.f32.mrf.mxu1 }
 0x312   :  { %v8391_v17 = vmul.f32 0.2, %v8388_v9  ;;  %v8393_v23 = vadd.f32 %v2468_v13, %v2426_v12  ;;  %v2428_v25 = vadd.f32 %v2427_v16, %v1072_v1 }
 0x313   :  { %v2470_v26 = vpop.f32.mrf.mxu0  ;;  %v2429_v28 = vpop.f32.mrf.mxu1 }
 0x314   :  { %v2749_v24 = vmax.f32 %v8388_v9, %v8391_v17  ;;  %v8398_v52 = vmul.f32 0.2, %v8393_v23  ;;  %v8400_v27 = vadd.f32 %v2470_v26, %v2428_v25  ;;  %v2430_v56 = vadd.f32 %v2429_v28, %v1076_v4 }
 0x315   :  { %v2472_v2 = vpop.f32.mrf.mxu0 }
 0x316   :  { %v2750_v62 = vmax.f32 %v8393_v23, %v8398_v52  ;;  %v8405_v10 = vmul.f32 0.2, %v8400_v27  ;;  %v8407_v18 = vadd.f32 %v2472_v2, %v2430_v56 }
 0x318   :  { %v2757_v14 = vmax.f32 %v8400_v27, %v8405_v10  ;;  %v8412_v22 = vmul.f32 0.2, %v8407_v18 }
 0x31a   :  { %v2758_v29 = vmax.f32 %v8407_v18, %v8412_v22 }
 0x34d   :  { %v2509_v63 = vpop.f32.mrf.mxu1 }
 0x34e   :  { %v2510_v3 = vadd.f32 %v2509_v63, %v1080_v53 }
 0x34f   :  { %v2552_v11 = vpop.f32.mrf.mxu0  ;;  %v2511_v15 = vpop.f32.mrf.mxu1 }
 0x350   :  { %v8420_v30 = vadd.f32 %v2552_v11, %v2510_v3  ;;  %v2512_v31 = vadd.f32 %v2511_v15, %v1084_v57 }
 0x351   :  { %v2554_v32 = vpop.f32.mrf.mxu0  ;;  %v2513_v33 = vpop.f32.mrf.mxu1 }
 0x352   :  { %v8423_v34 = vmul.f32 0.2, %v8420_v30  ;;  %v8425_v35 = vadd.f32 %v2554_v32, %v2512_v31  ;;  %v2514_v36 = vadd.f32 %v2513_v33, %v1080_v53  ;;  %v1095_v33 = vsub.s32 6, %v8292_v19 }
 0x353   :  { %v2556_v37 = vpop.f32.mrf.mxu0  ;;  %v2515_v38 = vpop.f32.mrf.mxu1 }
 0x354   :  { %v2751_v39 = vmax.f32 %v8420_v30, %v8423_v34  ;;  %v8430_v40 = vmul.f32 0.2, %v8425_v35  ;;  %v8432_v41 = vadd.f32 %v2556_v37, %v2514_v36  ;;  %v2516_v42 = vadd.f32 %v2515_v38, %v1084_v57 }
 0x355   :  { %v2558_v44 = vpop.f32.mrf.mxu0  ;;  %v1099_v36 = vsub.s32 7, %v8292_v19  ;;  %v1096_v37 = vrot.slane %v8380_v0, %v1095_v33 }
 0x356   :  { %v2752_v46 = vmax.f32 %v8425_v35, %v8430_v40  ;;  %v8437_v47 = vmul.f32 0.2, %v8432_v41  ;;  %v8439_v48 = vadd.f32 %v2558_v44, %v2516_v42 }
 0x357   :  { %v1100_v38 = vrot.slane %v8380_v0, %v1099_v36 }
 0x358   :  { %v2759_v49 = vmax.f32 %v8432_v41, %v8437_v47  ;;  %v2744_v50 = vmul.f32 0.2, %v8439_v48 }
 0x35a   :  { %v2760_v51 = vmax.f32 %v8439_v48, %v2744_v50 }
 0x38d   :  { %v2595_v60 = vpop.f32.mrf.mxu1 }
 0x38e   :  { %v2596_v61 = vadd.f32 %v2595_v60, %v1088_v58 }
 0x38f   :  { %v2638_v1 = vpop.f32.mrf.mxu0  ;;  %v2597_v4 = vpop.f32.mrf.mxu1 }
 0x390   :  { %v8453_v5 = vadd.f32 %v2638_v1, %v2596_v61  ;;  %v2598_v6 = vadd.f32 %v2597_v4, %v1092_v59 }
 0x391   :  { %v2640_v7 = vpop.f32.mrf.mxu0  ;;  %v2599_v8 = vpop.f32.mrf.mxu1 }
 0x392   :  { %v8456_v12 = vmul.f32 0.2, %v8453_v5  ;;  %v8458_v13 = vadd.f32 %v2640_v7, %v2598_v6  ;;  %v2600_v16 = vadd.f32 %v2599_v8, %v1088_v58 }
 0x393   :  { %v2642_v25 = vpop.f32.mrf.mxu0  ;;  %v2601_v26 = vpop.f32.mrf.mxu1 }
 0x394   :  { %v2753_v28 = vmax.f32 %v8453_v5, %v8456_v12  ;;  %v8463_v56 = vmul.f32 0.2, %v8458_v13  ;;  %v8465_v2 = vadd.f32 %v2642_v25, %v2600_v16  ;;  %v2602_v53 = vadd.f32 %v2601_v26, %v1092_v59 }
 0x395   :  { %v2644_v57 = vpop.f32.mrf.mxu0 }
 0x396   :  { %v2754_v63 = vmax.f32 %v8458_v13, %v8463_v56  ;;  %v8470_v3 = vmul.f32 0.2, %v8465_v2  ;;  %v8472_v11 = vadd.f32 %v2644_v57, %v2602_v53 }
 0x398   :  { %v2761_v15 = vmax.f32 %v8465_v2, %v8470_v3  ;;  %v8477_v31 = vmul.f32 0.2, %v8472_v11 }
 0x39a   :  { %v2762_v32 = vmax.f32 %v8472_v11, %v8477_v31 }
 0x3cd   :  { %v2681_v42 = vpop.f32.mrf.mxu1 }
 0x3ce   :  { %v2682_v44 = vadd.f32 %v2681_v42, %v1096_v37 }
 0x3cf   :  { %v2724_v48 = vpop.f32.mrf.mxu0  ;;  %v2683_v50 = vpop.f32.mrf.mxu1 }
 0x3d0   :  { %v8487_v58 = vadd.f32 %v2724_v48, %v2682_v44  ;;  %v2684_v59 = vadd.f32 %v2683_v50, %v1100_v38 }
 0x3d1   :  { %v2726_v60 = vpop.f32.mrf.mxu0  ;;  %v2685_v61 = vpop.f32.mrf.mxu1 }
 0x3d2   :  { %v8490_v1 = vmul.f32 0.2, %v8487_v58  ;;  %v8492_v4 = vadd.f32 %v2726_v60, %v2684_v59  ;;  %v2686_v6 = vadd.f32 %v2685_v61, %v1096_v37 }
 0x3d3   :  { %v2728_v7 = vpop.f32.mrf.mxu0  ;;  %v2687_v8 = vpop.f32.mrf.mxu1 }
 0x3d4   :  { %v2755_v0 = vmax.f32 %v8487_v58, %v8490_v1  ;;  %v8497_v16 = vmul.f32 0.2, %v8492_v4  ;;  %v8499_v25 = vadd.f32 %v2728_v7, %v2686_v6  ;;  %v2688_v26 = vadd.f32 %v2687_v8, %v1100_v38 }
 0x3d5   :  { %v2730_v53 = vpop.f32.mrf.mxu0 }
 0x3d6   :  { %v2756_v57 = vmax.f32 %v8492_v4, %v8497_v16  ;;  %v8504_v36 = vmul.f32 0.2, %v8499_v25  ;;  %v8506_v42 = vadd.f32 %v2730_v53, %v2688_v26 }
 0x3d8   :  { %v2763_v37 = vmax.f32 %v8499_v25, %v8504_v36  ;;  %v8511_v44 = vmul.f32 0.2, %v8506_v42 }
 0x3da   :  { %v2764_v48 = vmax.f32 %v8506_v42, %v8511_v44 }
 0x3db   :  { %8206 = dma.done.wait [#allocation4 + $0x1], 57344 }
 0x3dc   :  { %8207 = vsyncadd [#allocation4 + $0x1], 4294909952  ;;  %v8521_v38 = vpack.c.bf16 %v2758_v29, %v2750_v62  ;;  %v8526_v50 = vpack.c.bf16 %v2760_v51, %v2752_v46  ;;  %v7368_v59 = vld [vmem:[#allocation3 + $0x18c] ss:$28 sps:$4 sm:$0xff]   ;;  %v7374_v23 = vld [vmem:[#allocation3 + $0x154] ss:$28 sps:$4 sm:$0xff]   ;;  %v8552_v17 = vpack.c.bf16 %v2762_v32, %v2754_v63 }
 0x3dd   :  { %v7370_v60 = vld [vmem:[#allocation3 + $0x50c] ss:$28 sps:$4 sm:$0xff]   ;;  %5630 = vmatprep.subr.bf16.mxu1 %v7368_v59  ;;  %v7376_v52 = vld [vmem:[#allocation3 + $0x4d4] ss:$28 sps:$4 sm:$0xff]   ;;  %v7380_v22 = vld [vmem:[#allocation3 + $0x11c] ss:$28 sps:$4 sm:$0xff]  }
 0x3de   :  { %5662 = vmatprep.mubr.bf16.mxu1 %v8521_v38  ;;  %5705 = vmatprep.mubr.bf16.mxu0 %v8526_v50  ;;  %v7372_v61 = vld [vmem:[#allocation3 + $0x188] ss:$28 sps:$4 sm:$0xff]   ;;  %v7378_v62 = vld [vmem:[#allocation3 + $0x150] ss:$28 sps:$4 sm:$0xff]   ;;  %v7382_v29 = vld [vmem:[#allocation3 + $0x49c] ss:$28 sps:$4 sm:$0xff]  }
 0x3df   :  { %v7373_v6 = vld [vmem:[#allocation3 + $0x508] ss:$28 sps:$4 sm:$0xff]   ;;  %5673 = vmatprep.subr.bf16.mxu0 %v7370_v60  ;;  %5631 = vmatpush1.bf16.msra.mxu1 %v7372_v61  ;;  %v7379_v18 = vld [vmem:[#allocation3 + $0x4d0] ss:$28 sps:$4 sm:$0xff]   ;;  %v7384_v35 = vld [vmem:[#allocation3 + $0x118] ss:$28 sps:$4 sm:$0xff]  }
 0x3e0   :  { %5674 = vmatpush1.bf16.msra.mxu0 %v7373_v6  ;;  %5632 = vmatprep.subr.bf16.mxu1 %v7374_v23  ;;  %v7385_v40 = vld [vmem:[#allocation3 + $0x498] ss:$28 sps:$4 sm:$0xff]   ;;  %v7386_v46 = vld [vmem:[#allocation3 + $0xe4] ss:$28 sps:$4 sm:$0xff]   ;;  %v7392_v26 = vld [vmem:[#allocation3 + $0xac] ss:$28 sps:$4 sm:$0xff]  }
 0x3e1   :  { %5675 = vmatprep.subr.bf16.mxu0 %v7376_v52  ;;  %v7388_v51 = vld [vmem:[#allocation3 + $0x464] ss:$28 sps:$4 sm:$0xff]   ;;  %v7394_v53 = vld [vmem:[#allocation3 + $0x42c] ss:$28 sps:$4 sm:$0xff]   ;;  %v7398_v61 = vld [vmem:[#allocation3 + $0x74] ss:$28 sps:$4 sm:$0xff]  }
 0x3e2   :  { %v7390_v7 = vld [vmem:[#allocation3 + $0xe0] ss:$28 sps:$4 sm:$0xff]   ;;  %v7396_v59 = vld [vmem:[#allocation3 + $0xa8] ss:$28 sps:$4 sm:$0xff]   ;;  %v7400_v6 = vld [vmem:[#allocation3 + $0x3f4] ss:$28 sps:$4 sm:$0xff]  }
 0x3e3   :  { %5633 = vmatpush1.bf16.msra.mxu1 %v7378_v62  ;;  %v7391_v8 = vld [vmem:[#allocation3 + $0x460] ss:$28 sps:$4 sm:$0xff]   ;;  %v7397_v60 = vld [vmem:[#allocation3 + $0x428] ss:$28 sps:$4 sm:$0xff]   ;;  %v7402_v23 = vld [vmem:[#allocation3 + $0x70] ss:$28 sps:$4 sm:$0xff]  }
 0x3e4   :  { %5676 = vmatpush1.bf16.msra.mxu0 %v7379_v18  ;;  %5634 = vmatprep.subr.bf16.mxu1 %v7380_v22  ;;  %v7403_v52 = vld [vmem:[#allocation3 + $0x3f0] ss:$28 sps:$4 sm:$0xff]   ;;  %v7404_v62 = vld [vmem:[#allocation3 + $0x3c] ss:$28 sps:$4 sm:$0xff]   ;;  %v7484_v41 = vld [vmem:[#allocation3 + $0x7e4] ss:$28 sps:$4 sm:$0xff]  }
 0x3e5   :  { %5677 = vmatprep.subr.bf16.mxu0 %v7382_v29  ;;  %v7406_v18 = vld [vmem:[#allocation3 + $0x3bc] ss:$28 sps:$4 sm:$0xff]   ;;  %v7475_v9 = vld [vmem:[#allocation3 + $0xbd4] ss:$28 sps:$4 sm:$0xff]   ;;  %v7487_v47 = vld [vmem:[#allocation3 + $0xb64] ss:$28 sps:$4 sm:$0xff]  }
 0x3e6   :  { %v7408_v22 = vld [vmem:[#allocation3 + $0x38] ss:$28 sps:$4 sm:$0xff]   ;;  %v7470_v27 = vld [vmem:[#allocation3 + $0x850] ss:$28 sps:$4 sm:$0xff]   ;;  %v7485_v13 = vld [vmem:[#allocation3 + $0xb60] ss:$28 sps:$4 sm:$0xff]  }
 0x3e7   :  { %5635 = vmatpush1.bf16.msra.mxu1 %v7384_v35  ;;  %v7409_v29 = vld [vmem:[#allocation3 + $0x3b8] ss:$28 sps:$4 sm:$0xff]   ;;  %v7410_v35 = vld [vmem:[#allocation3 + $0x4] ss:$28 sps:$4 sm:$0xff]   ;;  %v7473_v10 = vld [vmem:[#allocation3 + $0xbd0] ss:$28 sps:$4 sm:$0xff]  }
 0x3e8   :  { %5678 = vmatpush1.bf16.msra.mxu0 %v7385_v40  ;;  %5636 = vmatprep.subr.bf16.mxu1 %v7386_v46  ;;  %v7412_v40 = vld [vmem:[#allocation3 + $0x384] ss:$28 sps:$4 sm:$0xff]   ;;  %v7481_v30 = vld [vmem:[#allocation3 + $0xb9c] ss:$28 sps:$4 sm:$0xff]   ;;  %v7490_v56 = vld [vmem:[#allocation3 + $0x7ac] ss:$28 sps:$4 sm:$0xff]  }
 0x3e9   :  { %5679 = vmatprep.subr.bf16.mxu0 %v7388_v51  ;;  %v7414_v46 = vld [vmem:[#allocation3] ss:$28 sps:$4 sm:$0xff]   ;;  %v7476_v34 = vld [vmem:[#allocation3 + $0x818] ss:$28 sps:$4 sm:$0xff]   ;;  %v7493_v63 = vld [vmem:[#allocation3 + $0xb2c] ss:$28 sps:$4 sm:$0xff]  }
 0x3ea   :  { %v7415_v51 = vld [vmem:[#allocation3 + $0x380] ss:$28 sps:$4 sm:$0xff]   ;;  %v7488_v11 = vld [vmem:[#allocation3 + $0x7a8] ss:$28 sps:$4 sm:$0xff]   ;;  %v7496_v32 = vld [vmem:[#allocation3 + $0x774] ss:$28 sps:$4 sm:$0xff]  }
 0x3eb   :  { %5637 = vmatpush1.bf16.msra.mxu1 %v7390_v7  ;;  %v7416_v7 = vld [vmem:[#allocation3 + $0x34c] ss:$28 sps:$4 sm:$0xff]   ;;  %v7499_v4 = vld [vmem:[#allocation3 + $0xaf4] ss:$28 sps:$4 sm:$0xff]   ;;  %v7502_v42 = vld [vmem:[#allocation3 + $0x73c] ss:$28 sps:$4 sm:$0xff]  }
 0x3ec   :  { %5680 = vmatpush1.bf16.msra.mxu0 %v7391_v8  ;;  %5638 = vmatprep.subr.bf16.mxu1 %v7392_v26  ;;  %v7418_v8 = vld [vmem:[#allocation3 + $0x6cc] ss:$28 sps:$4 sm:$0xff]   ;;  %v7505_v44 = vld [vmem:[#allocation3 + $0xabc] ss:$28 sps:$4 sm:$0xff]   ;;  %v7574_v2 = vld [vmem:[#allocation3 + $0x124] ss:$28 sps:$4 sm:$0xff]  }
 0x3ed   :  { %5681 = vmatprep.subr.bf16.mxu0 %v7394_v53  ;;  %v7420_v26 = vld [vmem:[#allocation3 + $0x348] ss:$28 sps:$4 sm:$0xff]   ;;  %v7494_v16 = vld [vmem:[#allocation3 + $0x770] ss:$28 sps:$4 sm:$0xff]   ;;  %v7571_v5 = vld [vmem:[#allocation3 + $0x4dc] ss:$28 sps:$4 sm:$0xff]  }
 0x3ee   :  { %v7421_v53 = vld [vmem:[#allocation3 + $0x6c8] ss:$28 sps:$4 sm:$0xff]   ;;  %v7566_v12 = vld [vmem:[#allocation3 + $0x158] ss:$28 sps:$4 sm:$0xff]   ;;  %v7575_v58 = vld [vmem:[#allocation3 + $0x4a0] ss:$28 sps:$4 sm:$0xff]  }
 0x3ef   :  { %5639 = vmatpush1.bf16.msra.mxu1 %v7396_v59  ;;  %v7422_v59 = vld [vmem:[#allocation3 + $0x314] ss:$28 sps:$4 sm:$0xff]   ;;  %v7491_v31 = vld [vmem:[#allocation3 + $0xb28] ss:$28 sps:$4 sm:$0xff]  }
 0x3f0   :  { %5682 = vmatpush1.bf16.msra.mxu0 %v7397_v60  ;;  %5640 = vmatprep.subr.bf16.mxu1 %v7398_v61  ;;  %v7424_v60 = vld [vmem:[#allocation3 + $0x694] ss:$28 sps:$4 sm:$0xff]   ;;  %v7577_v3 = vld [vmem:[#allocation3 + $0x4a4] ss:$28 sps:$4 sm:$0xff]   ;;  %v7580_v1 = vld [vmem:[#allocation3 + $0xec] ss:$28 sps:$4 sm:$0xff]  }
 0x3f1   :  { %5683 = vmatprep.subr.bf16.mxu0 %v7400_v6  ;;  %v7426_v61 = vld [vmem:[#allocation3 + $0x310] ss:$28 sps:$4 sm:$0xff]   ;;  %v7578_v25 = vld [vmem:[#allocation3 + $0xe8] ss:$28 sps:$4 sm:$0xff]  }
 0x3f2   :  { %v7427_v6 = vld [vmem:[#allocation3 + $0x690] ss:$28 sps:$4 sm:$0xff]   ;;  %v7581_v36 = vld [vmem:[#allocation3 + $0x468] ss:$28 sps:$4 sm:$0xff]  }
 0x3f3   :  { %5641 = vmatpush1.bf16.msra.mxu1 %v7402_v23  ;;  %v7428_v23 = vld [vmem:[#allocation3 + $0x2dc] ss:$28 sps:$4 sm:$0xff]  }
 0x3f4   :  { %5684 = vmatpush1.bf16.msra.mxu0 %v7403_v52  ;;  %5642 = vmatprep.subr.bf16.mxu1 %v7404_v62  ;;  %v7430_v52 = vld [vmem:[#allocation3 + $0x65c] ss:$28 sps:$4 sm:$0xff]  }
 0x3f5   :  { %5685 = vmatprep.subr.bf16.mxu0 %v7406_v18  ;;  %v7432_v62 = vld [vmem:[#allocation3 + $0x2d8] ss:$28 sps:$4 sm:$0xff]  }
 0x3f6   :  { %v7433_v18 = vld [vmem:[#allocation3 + $0x658] ss:$28 sps:$4 sm:$0xff]  }
 0x3f7   :  { %5643 = vmatpush1.bf16.msra.mxu1 %v7408_v22  ;;  %v7434_v22 = vld [vmem:[#allocation3 + $0x2a4] ss:$28 sps:$4 sm:$0xff]  }
 0x3f8   :  { %5686 = vmatpush1.bf16.msra.mxu0 %v7409_v29  ;;  %5644 = vmatprep.subr.bf16.mxu1 %v7410_v35  ;;  %v7436_v29 = vld [vmem:[#allocation3 + $0x624] ss:$28 sps:$4 sm:$0xff]  }
 0x3f9   :  { %5687 = vmatprep.subr.bf16.mxu0 %v7412_v40  ;;  %v7438_v35 = vld [vmem:[#allocation3 + $0x2a0] ss:$28 sps:$4 sm:$0xff]  }
 0x3fa   :  { %v7439_v40 = vld [vmem:[#allocation3 + $0x620] ss:$28 sps:$4 sm:$0xff]  }
 0x3fb   :  { %5645 = vmatpush1.bf16.msra.mxu1 %v7414_v46  ;;  %v7440_v46 = vld [vmem:[#allocation3 + $0x26c] ss:$28 sps:$4 sm:$0xff]  }
 0x3fc   :  { %5688 = vmatpush1.bf16.msra.mxu0 %v7415_v51  ;;  %5646 = vmatprep.subr.bf16.mxu1 %v7416_v7  ;;  %v7442_v51 = vld [vmem:[#allocation3 + $0x5ec] ss:$28 sps:$4 sm:$0xff]  }
 0x3fd   :  { %5689 = vmatprep.subr.bf16.mxu0 %v7418_v8  ;;  %v7444_v7 = vld [vmem:[#allocation3 + $0x268] ss:$28 sps:$4 sm:$0xff]  }
 0x3fe   :  { %v7445_v8 = vld [vmem:[#allocation3 + $0x5e8] ss:$28 sps:$4 sm:$0xff]  }
 0x3ff   :  { %5647 = vmatpush2.bf16.msra.mxu1 %v7420_v26  ;;  %v7446_v26 = vld [vmem:[#allocation3 + $0x234] ss:$28 sps:$4 sm:$0xff]  }
 0x400   :  { %5690 = vmatpush2.bf16.msra.mxu0 %v7421_v53  ;;  %5648 = vmatprep.subr.bf16.mxu1 %v7422_v59  ;;  %v7448_v53 = vld [vmem:[#allocation3 + $0x5b4] ss:$28 sps:$4 sm:$0xff]  }
 0x401   :  { %5691 = vmatprep.subr.bf16.mxu0 %v7424_v60  ;;  %v7450_v59 = vld [vmem:[#allocation3 + $0x230] ss:$28 sps:$4 sm:$0xff]  }
 0x402   :  { %v7451_v60 = vld [vmem:[#allocation3 + $0x5b0] ss:$28 sps:$4 sm:$0xff]  }
 0x403   :  { %5649 = vmatpush2.bf16.msra.mxu1 %v7426_v61  ;;  %v7452_v61 = vld [vmem:[#allocation3 + $0x1fc] ss:$28 sps:$4 sm:$0xff]  }
 0x404   :  { %5692 = vmatpush2.bf16.msra.mxu0 %v7427_v6  ;;  %5650 = vmatprep.subr.bf16.mxu1 %v7428_v23  ;;  %v7454_v6 = vld [vmem:[#allocation3 + $0x57c] ss:$28 sps:$4 sm:$0xff]  }
 0x405   :  { %5693 = vmatprep.subr.bf16.mxu0 %v7430_v52  ;;  %v7456_v23 = vld [vmem:[#allocation3 + $0x1f8] ss:$28 sps:$4 sm:$0xff]  }
 0x406   :  { %v7457_v52 = vld [vmem:[#allocation3 + $0x578] ss:$28 sps:$4 sm:$0xff]  }
 0x407   :  { %5651 = vmatpush2.bf16.msra.mxu1 %v7432_v62  ;;  %v7458_v62 = vld [vmem:[#allocation3 + $0x1c4] ss:$28 sps:$4 sm:$0xff]  }
 0x408   :  { %5694 = vmatpush2.bf16.msra.mxu0 %v7433_v18  ;;  %5652 = vmatprep.subr.bf16.mxu1 %v7434_v22  ;;  %v7460_v18 = vld [vmem:[#allocation3 + $0x544] ss:$28 sps:$4 sm:$0xff]  }
 0x409   :  { %5695 = vmatprep.subr.bf16.mxu0 %v7436_v29  ;;  %v7462_v22 = vld [vmem:[#allocation3 + $0x1c0] ss:$28 sps:$4 sm:$0xff]  }
 0x40a   :  { %v7463_v29 = vld [vmem:[#allocation3 + $0x540] ss:$28 sps:$4 sm:$0xff]  }
 0x40b   :  { %5653 = vmatpush2.bf16.msra.mxu1 %v7438_v35  ;;  %v7466_v35 = vld [vmem:[#allocation3 + $0x88c] ss:$28 sps:$4 sm:$0xff]  }
 0x40c   :  { %5696 = vmatpush2.bf16.msra.mxu0 %v7439_v40  ;;  %5654 = vmatprep.subr.bf16.mxu1 %v7440_v46  ;;  %v7469_v40 = vld [vmem:[#allocation3 + $0xc0c] ss:$28 sps:$4 sm:$0xff]   ;;  %v8536_v46 = vpack.c.bf16 %v2757_v14, %v2749_v24  ;;  %v8560_v24 = vpack.c.bf16 %v2764_v48, %v2756_v57  ;;  %v7478_v14 = vld [vmem:[#allocation3 + $0x81c] ss:$28 sps:$4 sm:$0xff]  }
 0x40d   :  { %5697 = vmatprep.subr.bf16.mxu0 %v7442_v51  ;;  %v8544_v51 = vpack.c.bf16 %v2759_v49, %v2751_v39  ;;  %v7479_v39 = vld [vmem:[#allocation3 + $0xb98] ss:$28 sps:$4 sm:$0xff]   ;;  %v7482_v49 = vld [vmem:[#allocation3 + $0x7e0] ss:$28 sps:$4 sm:$0xff]   ;;  %v7497_v57 = vld [vmem:[#allocation3 + $0xaf0] ss:$28 sps:$4 sm:$0xff]  }
 0x40e   :  { %v7500_v48 = vld [vmem:[#allocation3 + $0x738] ss:$28 sps:$4 sm:$0xff]  }
 0x40f   :  { %5655 = vmatpush2.bf16.msra.mxu1 %v7444_v7  ;;  %v7464_v7 = vld [vmem:[#allocation3 + $0x888] ss:$28 sps:$4 sm:$0xff]  }
 0x410   :  { %5698 = vmatpush2.bf16.msra.mxu0 %v7445_v8  ;;  %5656 = vmatprep.subr.bf16.mxu1 %v7446_v26  ;;  %v7467_v8 = vld [vmem:[#allocation3 + $0xc08] ss:$28 sps:$4 sm:$0xff]   ;;  %v7472_v26 = vld [vmem:[#allocation3 + $0x854] ss:$28 sps:$4 sm:$0xff]  }
 0x411   :  { %5699 = vmatprep.subr.bf16.mxu0 %v7448_v53  ;;  %v7503_v53 = vld [vmem:[#allocation3 + $0xab8] ss:$28 sps:$4 sm:$0xff]  }
 0x413   :  { %5657 = vmatpush2.bf16.msra.mxu1 %v7450_v59  ;;  %v7508_v59 = vld [vmem:[#allocation3 + $0x704] ss:$28 sps:$4 sm:$0xff]  }
 0x414   :  { %5700 = vmatpush2.bf16.msra.mxu0 %v7451_v60  ;;  %5658 = vmatprep.subr.bf16.mxu1 %v7452_v61  ;;  %v7511_v60 = vld [vmem:[#allocation3 + $0xa84] ss:$28 sps:$4 sm:$0xff]  }
 0x415   :  { %5701 = vmatprep.subr.bf16.mxu0 %v7454_v6  ;;  %v7506_v61 = vld [vmem:[#allocation3 + $0x700] ss:$28 sps:$4 sm:$0xff]  }
 0x416   :  { %v7509_v6 = vld [vmem:[#allocation3 + $0xa80] ss:$28 sps:$4 sm:$0xff]  }
 0x417   :  { %5659 = vmatpush2.bf16.msra.mxu1 %v7456_v23  ;;  %v7514_v23 = vld [vmem:[#allocation3 + $0xa4c] ss:$28 sps:$4 sm:$0xff]  }
 0x418   :  { %5702 = vmatpush2.bf16.msra.mxu0 %v7457_v52  ;;  %5660 = vmatprep.subr.bf16.mxu1 %v7458_v62  ;;  %v7517_v52 = vld [vmem:[#allocation3 + $0xdcc] ss:$28 sps:$4 sm:$0xff]  }
 0x419   :  { %5703 = vmatprep.subr.bf16.mxu0 %v7460_v18  ;;  %v7512_v62 = vld [vmem:[#allocation3 + $0xa48] ss:$28 sps:$4 sm:$0xff]  }
 0x41a   :  { %v7515_v18 = vld [vmem:[#allocation3 + $0xdc8] ss:$28 sps:$4 sm:$0xff]  }
 0x41b   :  { %5661 = vmatpush2.bf16.msra.mxu1 %v7462_v22  ;;  %v7520_v22 = vld [vmem:[#allocation3 + $0xa14] ss:$28 sps:$4 sm:$0xff]  }
 0x41c   :  { %5704 = vmatpush2.bf16.msra.mxu0 %v7463_v29  ;;  %5716 = vmatprep.subr.bf16.mxu1 %v7466_v35  ;;  %v7523_v29 = vld [vmem:[#allocation3 + $0xd94] ss:$28 sps:$4 sm:$0xff]  }
 0x41d   :  { %5759 = vmatprep.subr.bf16.mxu0 %v7469_v40  ;;  %v7518_v35 = vld [vmem:[#allocation3 + $0xa10] ss:$28 sps:$4 sm:$0xff]  }
 0x41e   :  { %5663 = vmatmul.mubr.bf16.vlgmr.msra.gmra.mxu1 %v8536_v46  ;;  %v7521_v40 = vld [vmem:[#allocation3 + $0xd90] ss:$28 sps:$4 sm:$0xff]  }
 0x41f   :  { %5706 = vmatmul.mubr.bf16.vlgmr.msra.gmra.mxu0 %v8544_v51  ;;  %5717 = vmatpush1.bf16.msra.mxu1 %v7464_v7  ;;  %v7526_v7 = vld [vmem:[#allocation3 + $0x9dc] ss:$28 sps:$4 sm:$0xff]  }
 0x420   :  { %5760 = vmatpush1.bf16.msra.mxu0 %v7467_v8  ;;  %5718 = vmatprep.subr.bf16.mxu1 %v7472_v26  ;;  %v7529_v8 = vld [vmem:[#allocation3 + $0xd5c] ss:$28 sps:$4 sm:$0xff]  }
 0x421   :  { %5761 = vmatprep.subr.bf16.mxu0 %v7475_v9  ;;  %5748 = vmatprep.mubr.bf16.mxu1 %v8552_v17  ;;  %v7524_v26 = vld [vmem:[#allocation3 + $0x9d8] ss:$28 sps:$4 sm:$0xff]  }
 0x422   :  { %5791 = vmatprep.mubr.bf16.mxu0 %v8560_v24  ;;  %v7527_v9 = vld [vmem:[#allocation3 + $0xd58] ss:$28 sps:$4 sm:$0xff]  }
 0x423   :  { %5719 = vmatpush1.bf16.msra.mxu1 %v7470_v27  ;;  %v7532_v27 = vld [vmem:[#allocation3 + $0x9a4] ss:$28 sps:$4 sm:$0xff]  }
 0x424   :  { %5762 = vmatpush1.bf16.msra.mxu0 %v7473_v10  ;;  %5720 = vmatprep.subr.bf16.mxu1 %v7478_v14  ;;  %v7535_v10 = vld [vmem:[#allocation3 + $0xd24] ss:$28 sps:$4 sm:$0xff]  }
 0x425   :  { %5763 = vmatprep.subr.bf16.mxu0 %v7481_v30  ;;  %v7530_v14 = vld [vmem:[#allocation3 + $0x9a0] ss:$28 sps:$4 sm:$0xff]  }
 0x426   :  { %v7533_v30 = vld [vmem:[#allocation3 + $0xd20] ss:$28 sps:$4 sm:$0xff]  }
 0x427   :  { %5721 = vmatpush1.bf16.msra.mxu1 %v7476_v34  ;;  %v7538_v34 = vld [vmem:[#allocation3 + $0x96c] ss:$28 sps:$4 sm:$0xff]  }
 0x428   :  { %5764 = vmatpush1.bf16.msra.mxu0 %v7479_v39  ;;  %5722 = vmatprep.subr.bf16.mxu1 %v7484_v41  ;;  %v7541_v39 = vld [vmem:[#allocation3 + $0xcec] ss:$28 sps:$4 sm:$0xff]  }
 0x429   :  { %5765 = vmatprep.subr.bf16.mxu0 %v7487_v47  ;;  %v7536_v41 = vld [vmem:[#allocation3 + $0x968] ss:$28 sps:$4 sm:$0xff]  }
 0x42a   :  { %v7539_v47 = vld [vmem:[#allocation3 + $0xce8] ss:$28 sps:$4 sm:$0xff]  }
 0x42b   :  { %5723 = vmatpush1.bf16.msra.mxu1 %v7482_v49  ;;  %v7544_v49 = vld [vmem:[#allocation3 + $0x934] ss:$28 sps:$4 sm:$0xff]  }
 0x42c   :  { %5766 = vmatpush1.bf16.msra.mxu0 %v7485_v13  ;;  %5724 = vmatprep.subr.bf16.mxu1 %v7490_v56  ;;  %v7547_v13 = vld [vmem:[#allocation3 + $0xcb4] ss:$28 sps:$4 sm:$0xff]  }
 0x42d   :  { %5767 = vmatprep.subr.bf16.mxu0 %v7493_v63  ;;  %v7542_v56 = vld [vmem:[#allocation3 + $0x930] ss:$28 sps:$4 sm:$0xff]  }
 0x42e   :  { %v7545_v63 = vld [vmem:[#allocation3 + $0xcb0] ss:$28 sps:$4 sm:$0xff]  }
 0x42f   :  { %5725 = vmatpush1.bf16.msra.mxu1 %v7488_v11  ;;  %v7550_v11 = vld [vmem:[#allocation3 + $0x8fc] ss:$28 sps:$4 sm:$0xff]  }
 0x430   :  { %5768 = vmatpush1.bf16.msra.mxu0 %v7491_v31  ;;  %5726 = vmatprep.subr.bf16.mxu1 %v7496_v32  ;;  %v7553_v31 = vld [vmem:[#allocation3 + $0xc7c] ss:$28 sps:$4 sm:$0xff]  }
 0x431   :  { %5769 = vmatprep.subr.bf16.mxu0 %v7499_v4  ;;  %v7548_v32 = vld [vmem:[#allocation3 + $0x8f8] ss:$28 sps:$4 sm:$0xff]  }
 0x432   :  { %v7551_v4 = vld [vmem:[#allocation3 + $0xc78] ss:$28 sps:$4 sm:$0xff]  }
 0x433   :  { %5727 = vmatpush1.bf16.msra.mxu1 %v7494_v16  ;;  %v7556_v16 = vld [vmem:[#allocation3 + $0x8c4] ss:$28 sps:$4 sm:$0xff]  }
 0x434   :  { %5770 = vmatpush1.bf16.msra.mxu0 %v7497_v57  ;;  %5728 = vmatprep.subr.bf16.mxu1 %v7502_v42  ;;  %v7559_v57 = vld [vmem:[#allocation3 + $0xc44] ss:$28 sps:$4 sm:$0xff]  }
 0x435   :  { %5771 = vmatprep.subr.bf16.mxu0 %v7505_v44  ;;  %v7554_v42 = vld [vmem:[#allocation3 + $0x8c0] ss:$28 sps:$4 sm:$0xff]  }
 0x436   :  { %v7557_v44 = vld [vmem:[#allocation3 + $0xc40] ss:$28 sps:$4 sm:$0xff]  }
 0x437   :  { %5729 = vmatpush1.bf16.msra.mxu1 %v7500_v48  ;;  %v7562_v48 = vld [vmem:[#allocation3 + $0x194] ss:$28 sps:$4 sm:$0xff]  }
 0x438   :  { %5772 = vmatpush1.bf16.msra.mxu0 %v7503_v53  ;;  %5730 = vmatprep.subr.bf16.mxu1 %v7508_v59  ;;  %v7565_v53 = vld [vmem:[#allocation3 + $0x514] ss:$28 sps:$4 sm:$0xff]   ;;  %v8572_v59 = vpack.c.bf16 %v2761_v15, %v2753_v28  ;;  %v7572_v15 = vld [vmem:[#allocation3 + $0x120] ss:$28 sps:$4 sm:$0xff]  }
 0x439   :  { %5773 = vmatprep.subr.bf16.mxu0 %v7511_v60  ;;  %v8580_v60 = vpack.c.bf16 %v2763_v37, %v2755_v0  ;;  %v7569_v28 = vld [vmem:[#allocation3 + $0x4d8] ss:$28 sps:$4 sm:$0xff]   ;;  %v7583_v0 = vld [vmem:[#allocation3 + $0x46c] ss:$28 sps:$4 sm:$0xff]  }
 0x43a   :  { %v7586_v37 = vld [vmem:[#allocation3 + $0xb4] ss:$28 sps:$4 sm:$0xff]  }
 0x43b   :  { %5731 = vmatpush1.bf16.msra.mxu1 %v7506_v61  ;;  %v7560_v61 = vld [vmem:[#allocation3 + $0x190] ss:$28 sps:$4 sm:$0xff]  }
 0x43c   :  { %5774 = vmatpush1.bf16.msra.mxu0 %v7509_v6  ;;  %5732 = vmatprep.subr.bf16.mxu1 %v7514_v23  ;;  %v7563_v6 = vld [vmem:[#allocation3 + $0x510] ss:$28 sps:$4 sm:$0xff]   ;;  %v7568_v23 = vld [vmem:[#allocation3 + $0x15c] ss:$28 sps:$4 sm:$0xff]  }
 0x43d   :  { %5775 = vmatprep.subr.bf16.mxu0 %v7517_v52  ;;  %v7589_v52 = vld [vmem:[#allocation3 + $0x434] ss:$28 sps:$4 sm:$0xff]  }
 0x43f   :  { %5733 = vmatpush2.bf16.msra.mxu1 %v7512_v62  ;;  %v7584_v62 = vld [vmem:[#allocation3 + $0xb0] ss:$28 sps:$4 sm:$0xff]  }
 0x440   :  { %5776 = vmatpush2.bf16.msra.mxu0 %v7515_v18  ;;  %5734 = vmatprep.subr.bf16.mxu1 %v7520_v22  ;;  %v7587_v18 = vld [vmem:[#allocation3 + $0x430] ss:$28 sps:$4 sm:$0xff]   ;;  %v7592_v22 = vld [vmem:[#allocation3 + $0x7c] ss:$28 sps:$4 sm:$0xff]  }
 0x441   :  { %5777 = vmatprep.subr.bf16.mxu0 %v7523_v29  ;;  %v7595_v29 = vld [vmem:[#allocation3 + $0x3fc] ss:$28 sps:$4 sm:$0xff]  }
 0x443   :  { %5735 = vmatpush2.bf16.msra.mxu1 %v7518_v35  ;;  %v7590_v35 = vld [vmem:[#allocation3 + $0x78] ss:$28 sps:$4 sm:$0xff]  }
 0x444   :  { %5778 = vmatpush2.bf16.msra.mxu0 %v7521_v40  ;;  %5736 = vmatprep.subr.bf16.mxu1 %v7526_v7  ;;  %v7593_v40 = vld [vmem:[#allocation3 + $0x3f8] ss:$28 sps:$4 sm:$0xff]   ;;  %v7598_v7 = vld [vmem:[#allocation3 + $0x44] ss:$28 sps:$4 sm:$0xff]  }
 0x445   :  { %5779 = vmatprep.subr.bf16.mxu0 %v7529_v8  ;;  %v7601_v8 = vld [vmem:[#allocation3 + $0x3c4] ss:$28 sps:$4 sm:$0xff]  }
 0x447   :  { %5737 = vmatpush2.bf16.msra.mxu1 %v7524_v26  ;;  %v7596_v26 = vld [vmem:[#allocation3 + $0x40] ss:$28 sps:$4 sm:$0xff]  }
 0x448   :  { %5780 = vmatpush2.bf16.msra.mxu0 %v7527_v9  ;;  %5738 = vmatprep.subr.bf16.mxu1 %v7532_v27  ;;  %v7599_v9 = vld [vmem:[#allocation3 + $0x3c0] ss:$28 sps:$4 sm:$0xff]   ;;  %v7604_v27 = vld [vmem:[#allocation3 + $0xc] ss:$28 sps:$4 sm:$0xff]  }
 0x449   :  { %5781 = vmatprep.subr.bf16.mxu0 %v7535_v10  ;;  %v7607_v10 = vld [vmem:[#allocation3 + $0x38c] ss:$28 sps:$4 sm:$0xff]  }
 0x44b   :  { %5739 = vmatpush2.bf16.msra.mxu1 %v7530_v14  ;;  %v7602_v14 = vld [vmem:[#allocation3 + $0x8] ss:$28 sps:$4 sm:$0xff]  }
 0x44c   :  { %5782 = vmatpush2.bf16.msra.mxu0 %v7533_v30  ;;  %5740 = vmatprep.subr.bf16.mxu1 %v7538_v34  ;;  %v7605_v30 = vld [vmem:[#allocation3 + $0x388] ss:$28 sps:$4 sm:$0xff]   ;;  %v7610_v34 = vld [vmem:[#allocation3 + $0x354] ss:$28 sps:$4 sm:$0xff]  }
 0x44d   :  { %5783 = vmatprep.subr.bf16.mxu0 %v7541_v39  ;;  %v7613_v39 = vld [vmem:[#allocation3 + $0x6d4] ss:$28 sps:$4 sm:$0xff]  }
 0x44f   :  { %5741 = vmatpush2.bf16.msra.mxu1 %v7536_v41  ;;  %v7608_v41 = vld [vmem:[#allocation3 + $0x350] ss:$28 sps:$4 sm:$0xff]  }
 0x450   :  { %5784 = vmatpush2.bf16.msra.mxu0 %v7539_v47  ;;  %5742 = vmatprep.subr.bf16.mxu1 %v7544_v49  ;;  %v7611_v47 = vld [vmem:[#allocation3 + $0x6d0] ss:$28 sps:$4 sm:$0xff]   ;;  %v7616_v49 = vld [vmem:[#allocation3 + $0x31c] ss:$28 sps:$4 sm:$0xff]  }
 0x451   :  { %5785 = vmatprep.subr.bf16.mxu0 %v7547_v13  ;;  %v7619_v13 = vld [vmem:[#allocation3 + $0x69c] ss:$28 sps:$4 sm:$0xff]  }
 0x453   :  { %5743 = vmatpush2.bf16.msra.mxu1 %v7542_v56  ;;  %v7614_v56 = vld [vmem:[#allocation3 + $0x318] ss:$28 sps:$4 sm:$0xff]  }
 0x454   :  { %5786 = vmatpush2.bf16.msra.mxu0 %v7545_v63  ;;  %5744 = vmatprep.subr.bf16.mxu1 %v7550_v11  ;;  %v7617_v63 = vld [vmem:[#allocation3 + $0x698] ss:$28 sps:$4 sm:$0xff]   ;;  %v7622_v11 = vld [vmem:[#allocation3 + $0x2e4] ss:$28 sps:$4 sm:$0xff]  }
 0x455   :  { %5787 = vmatprep.subr.bf16.mxu0 %v7553_v31  ;;  %v7625_v31 = vld [vmem:[#allocation3 + $0x664] ss:$28 sps:$4 sm:$0xff]  }
 0x457   :  { %5745 = vmatpush2.bf16.msra.mxu1 %v7548_v32  ;;  %v7620_v32 = vld [vmem:[#allocation3 + $0x2e0] ss:$28 sps:$4 sm:$0xff]  }
 0x458   :  { %5788 = vmatpush2.bf16.msra.mxu0 %v7551_v4  ;;  %5746 = vmatprep.subr.bf16.mxu1 %v7556_v16  ;;  %v7623_v4 = vld [vmem:[#allocation3 + $0x660] ss:$28 sps:$4 sm:$0xff]   ;;  %v7628_v16 = vld [vmem:[#allocation3 + $0x2ac] ss:$28 sps:$4 sm:$0xff]  }
 0x459   :  { %5789 = vmatprep.subr.bf16.mxu0 %v7559_v57  ;;  %v7631_v57 = vld [vmem:[#allocation3 + $0x62c] ss:$28 sps:$4 sm:$0xff]  }
 0x45b   :  { %5747 = vmatpush2.bf16.msra.mxu1 %v7554_v42  ;;  %v7626_v42 = vld [vmem:[#allocation3 + $0x2a8] ss:$28 sps:$4 sm:$0xff]  }
 0x45c   :  { %5790 = vmatpush2.bf16.msra.mxu0 %v7557_v44  ;;  %5802 = vmatprep.subr.bf16.mxu1 %v7562_v48  ;;  %v7629_v44 = vld [vmem:[#allocation3 + $0x628] ss:$28 sps:$4 sm:$0xff]   ;;  %v7634_v48 = vld [vmem:[#allocation3 + $0x274] ss:$28 sps:$4 sm:$0xff]  }
 0x45d   :  { %5845 = vmatprep.subr.bf16.mxu0 %v7565_v53  ;;  %v7637_v53 = vld [vmem:[#allocation3 + $0x5f4] ss:$28 sps:$4 sm:$0xff]  }
 0x45e   :  { %5749 = vmatmul.mubr.bf16.vlgmr.msra.gmra.mxu1 %v8572_v59 }
 0x45f   :  { %5792 = vmatmul.mubr.bf16.vlgmr.msra.gmra.mxu0 %v8580_v60  ;;  %5803 = vmatpush1.bf16.msra.mxu1 %v7560_v61  ;;  %v7632_v61 = vld [vmem:[#allocation3 + $0x270] ss:$28 sps:$4 sm:$0xff]  }
 0x460   :  { %5846 = vmatpush1.bf16.msra.mxu0 %v7563_v6  ;;  %5804 = vmatprep.subr.bf16.mxu1 %v7568_v23  ;;  %v7635_v6 = vld [vmem:[#allocation3 + $0x5f0] ss:$28 sps:$4 sm:$0xff]   ;;  %v7640_v23 = vld [vmem:[#allocation3 + $0x23c] ss:$28 sps:$4 sm:$0xff]  }
 0x461   :  { %5847 = vmatprep.subr.bf16.mxu0 %v7571_v5  ;;  %5834 = vmatprep.mubr.bf16.mxu1 %v8521_v38  ;;  %v7643_v5 = vld [vmem:[#allocation3 + $0x5bc] ss:$28 sps:$4 sm:$0xff]  }
 0x462   :  { %5877 = vmatprep.mubr.bf16.mxu0 %v8526_v50 }
 0x463   :  { %5805 = vmatpush1.bf16.msra.mxu1 %v7566_v12  ;;  %v7638_v12 = vld [vmem:[#allocation3 + $0x238] ss:$28 sps:$4 sm:$0xff]  }
 0x464   :  { %5848 = vmatpush1.bf16.msra.mxu0 %v7569_v28  ;;  %5806 = vmatprep.subr.bf16.mxu1 %v7574_v2  ;;  %v7641_v28 = vld [vmem:[#allocation3 + $0x5b8] ss:$28 sps:$4 sm:$0xff]   ;;  %v7646_v2 = vld [vmem:[#allocation3 + $0x204] ss:$28 sps:$4 sm:$0xff]  }
 0x465   :  { %5849 = vmatprep.subr.bf16.mxu0 %v7577_v3  ;;  %v7649_v3 = vld [vmem:[#allocation3 + $0x584] ss:$28 sps:$4 sm:$0xff]  }
 0x467   :  { %5807 = vmatpush1.bf16.msra.mxu1 %v7572_v15  ;;  %v7644_v15 = vld [vmem:[#allocation3 + $0x200] ss:$28 sps:$4 sm:$0xff]  }
 0x468   :  { %5850 = vmatpush1.bf16.msra.mxu0 %v7575_v58  ;;  %5808 = vmatprep.subr.bf16.mxu1 %v7580_v1  ;;  %v7647_v58 = vld [vmem:[#allocation3 + $0x580] ss:$28 sps:$4 sm:$0xff]   ;;  %v7652_v1 = vld [vmem:[#allocation3 + $0x1cc] ss:$28 sps:$4 sm:$0xff]  }
 0x469   :  { %5851 = vmatprep.subr.bf16.mxu0 %v7583_v0  ;;  %v7655_v0 = vld [vmem:[#allocation3 + $0x54c] ss:$28 sps:$4 sm:$0xff]  }
 0x46b   :  { %5809 = vmatpush1.bf16.msra.mxu1 %v7578_v25  ;;  %v7650_v25 = vld [vmem:[#allocation3 + $0x1c8] ss:$28 sps:$4 sm:$0xff]  }
 0x46c   :  { %5852 = vmatpush1.bf16.msra.mxu0 %v7581_v36  ;;  %5810 = vmatprep.subr.bf16.mxu1 %v7586_v37  ;;  %v7653_v36 = vld [vmem:[#allocation3 + $0x548] ss:$28 sps:$4 sm:$0xff]   ;;  %v7658_v37 = vld [vmem:[#allocation3 + $0x894] ss:$28 sps:$4 sm:$0xff]  }
 0x46d   :  { %5853 = vmatprep.subr.bf16.mxu0 %v7589_v52  ;;  %v7661_v52 = vld [vmem:[#allocation3 + $0xc14] ss:$28 sps:$4 sm:$0xff]  }
 0x46f   :  { %5811 = vmatpush1.bf16.msra.mxu1 %v7584_v62  ;;  %v7656_v62 = vld [vmem:[#allocation3 + $0x890] ss:$28 sps:$4 sm:$0xff]  }
 0x470   :  { %5854 = vmatpush1.bf16.msra.mxu0 %v7587_v18  ;;  %5812 = vmatprep.subr.bf16.mxu1 %v7592_v22  ;;  %v7659_v18 = vld [vmem:[#allocation3 + $0xc10] ss:$28 sps:$4 sm:$0xff]   ;;  %v7664_v22 = vld [vmem:[#allocation3 + $0x85c] ss:$28 sps:$4 sm:$0xff]  }
 0x471   :  { %5855 = vmatprep.subr.bf16.mxu0 %v7595_v29  ;;  %v7667_v29 = vld [vmem:[#allocation3 + $0xbdc] ss:$28 sps:$4 sm:$0xff]  }
 0x473   :  { %5813 = vmatpush1.bf16.msra.mxu1 %v7590_v35  ;;  %v7662_v35 = vld [vmem:[#allocation3 + $0x858] ss:$28 sps:$4 sm:$0xff]  }
 0x474   :  { %5856 = vmatpush1.bf16.msra.mxu0 %v7593_v40  ;;  %5814 = vmatprep.subr.bf16.mxu1 %v7598_v7  ;;  %v7665_v40 = vld [vmem:[#allocation3 + $0xbd8] ss:$28 sps:$4 sm:$0xff]   ;;  %v7670_v7 = vld [vmem:[#allocation3 + $0x824] ss:$28 sps:$4 sm:$0xff]  }
 0x475   :  { %5857 = vmatprep.subr.bf16.mxu0 %v7601_v8  ;;  %v7673_v8 = vld [vmem:[#allocation3 + $0xba4] ss:$28 sps:$4 sm:$0xff]  }
 0x477   :  { %5815 = vmatpush1.bf16.msra.mxu1 %v7596_v26  ;;  %v7668_v26 = vld [vmem:[#allocation3 + $0x820] ss:$28 sps:$4 sm:$0xff]  }
 0x478   :  { %5858 = vmatpush1.bf16.msra.mxu0 %v7599_v9  ;;  %5816 = vmatprep.subr.bf16.mxu1 %v7604_v27  ;;  %v7671_v9 = vld [vmem:[#allocation3 + $0xba0] ss:$28 sps:$4 sm:$0xff]   ;;  %v7676_v27 = vld [vmem:[#allocation3 + $0x7ec] ss:$28 sps:$4 sm:$0xff]  }
 0x479   :  { %5859 = vmatprep.subr.bf16.mxu0 %v7607_v10  ;;  %v7679_v10 = vld [vmem:[#allocation3 + $0xb6c] ss:$28 sps:$4 sm:$0xff]  }
 0x47b   :  { %5817 = vmatpush1.bf16.msra.mxu1 %v7602_v14  ;;  %v7674_v14 = vld [vmem:[#allocation3 + $0x7e8] ss:$28 sps:$4 sm:$0xff]  }
 0x47c   :  { %5860 = vmatpush1.bf16.msra.mxu0 %v7605_v30  ;;  %5818 = vmatprep.subr.bf16.mxu1 %v7610_v34  ;;  %v7677_v30 = vld [vmem:[#allocation3 + $0xb68] ss:$28 sps:$4 sm:$0xff]   ;;  %v7682_v34 = vld [vmem:[#allocation3 + $0x7b4] ss:$28 sps:$4 sm:$0xff]  }
 0x47d   :  { %5861 = vmatprep.subr.bf16.mxu0 %v7613_v39  ;;  %v7685_v39 = vld [vmem:[#allocation3 + $0xb34] ss:$28 sps:$4 sm:$0xff]  }
 0x47f   :  { %5819 = vmatpush2.bf16.msra.mxu1 %v7608_v41  ;;  %v7680_v41 = vld [vmem:[#allocation3 + $0x7b0] ss:$28 sps:$4 sm:$0xff]  }
 0x480   :  { %5862 = vmatpush2.bf16.msra.mxu0 %v7611_v47  ;;  %5820 = vmatprep.subr.bf16.mxu1 %v7616_v49  ;;  %v7683_v47 = vld [vmem:[#allocation3 + $0xb30] ss:$28 sps:$4 sm:$0xff]   ;;  %v7688_v49 = vld [vmem:[#allocation3 + $0x77c] ss:$28 sps:$4 sm:$0xff]  }
 0x481   :  { %5863 = vmatprep.subr.bf16.mxu0 %v7619_v13  ;;  %v7691_v13 = vld [vmem:[#allocation3 + $0xafc] ss:$28 sps:$4 sm:$0xff]  }
 0x483   :  { %5821 = vmatpush2.bf16.msra.mxu1 %v7614_v56  ;;  %v7686_v56 = vld [vmem:[#allocation3 + $0x778] ss:$28 sps:$4 sm:$0xff]  }
 0x484   :  { %5864 = vmatpush2.bf16.msra.mxu0 %v7617_v63  ;;  %5822 = vmatprep.subr.bf16.mxu1 %v7622_v11  ;;  %v7689_v63 = vld [vmem:[#allocation3 + $0xaf8] ss:$28 sps:$4 sm:$0xff]   ;;  %v7694_v11 = vld [vmem:[#allocation3 + $0x744] ss:$28 sps:$4 sm:$0xff]  }
 0x485   :  { %5865 = vmatprep.subr.bf16.mxu0 %v7625_v31  ;;  %v7697_v31 = vld [vmem:[#allocation3 + $0xac4] ss:$28 sps:$4 sm:$0xff]  }
 0x487   :  { %5823 = vmatpush2.bf16.msra.mxu1 %v7620_v32  ;;  %v7692_v32 = vld [vmem:[#allocation3 + $0x740] ss:$28 sps:$4 sm:$0xff]  }
 0x488   :  { %5866 = vmatpush2.bf16.msra.mxu0 %v7623_v4  ;;  %5824 = vmatprep.subr.bf16.mxu1 %v7628_v16  ;;  %v7695_v4 = vld [vmem:[#allocation3 + $0xac0] ss:$28 sps:$4 sm:$0xff]   ;;  %v7700_v16 = vld [vmem:[#allocation3 + $0x70c] ss:$28 sps:$4 sm:$0xff]  }
 0x489   :  { %5867 = vmatprep.subr.bf16.mxu0 %v7631_v57  ;;  %v7703_v57 = vld [vmem:[#allocation3 + $0xa8c] ss:$28 sps:$4 sm:$0xff]  }
 0x48b   :  { %5825 = vmatpush2.bf16.msra.mxu1 %v7626_v42  ;;  %v7698_v42 = vld [vmem:[#allocation3 + $0x708] ss:$28 sps:$4 sm:$0xff]  }
 0x48c   :  { %5868 = vmatpush2.bf16.msra.mxu0 %v7629_v44  ;;  %5826 = vmatprep.subr.bf16.mxu1 %v7634_v48  ;;  %v7701_v44 = vld [vmem:[#allocation3 + $0xa88] ss:$28 sps:$4 sm:$0xff]   ;;  %v7706_v48 = vld [vmem:[#allocation3 + $0xa54] ss:$28 sps:$4 sm:$0xff]  }
 0x48d   :  { %5869 = vmatprep.subr.bf16.mxu0 %v7637_v53  ;;  %v7709_v53 = vld [vmem:[#allocation3 + $0xdd4] ss:$28 sps:$4 sm:$0xff]  }
 0x48f   :  { %5827 = vmatpush2.bf16.msra.mxu1 %v7632_v61  ;;  %v7704_v61 = vld [vmem:[#allocation3 + $0xa50] ss:$28 sps:$4 sm:$0xff]  }
 0x490   :  { %5870 = vmatpush2.bf16.msra.mxu0 %v7635_v6  ;;  %5828 = vmatprep.subr.bf16.mxu1 %v7640_v23  ;;  %v7707_v6 = vld [vmem:[#allocation3 + $0xdd0] ss:$28 sps:$4 sm:$0xff]   ;;  %v7712_v23 = vld [vmem:[#allocation3 + $0xa1c] ss:$28 sps:$4 sm:$0xff]  }
 0x491   :  { %5871 = vmatprep.subr.bf16.mxu0 %v7643_v5  ;;  %v7715_v5 = vld [vmem:[#allocation3 + $0xd9c] ss:$28 sps:$4 sm:$0xff]  }
 0x493   :  { %5829 = vmatpush2.bf16.msra.mxu1 %v7638_v12  ;;  %v7710_v12 = vld [vmem:[#allocation3 + $0xa18] ss:$28 sps:$4 sm:$0xff]  }
 0x494   :  { %5872 = vmatpush2.bf16.msra.mxu0 %v7641_v28  ;;  %5830 = vmatprep.subr.bf16.mxu1 %v7646_v2  ;;  %v7713_v28 = vld [vmem:[#allocation3 + $0xd98] ss:$28 sps:$4 sm:$0xff]   ;;  %v7718_v2 = vld [vmem:[#allocation3 + $0x9e4] ss:$28 sps:$4 sm:$0xff]  }
 0x495   :  { %5873 = vmatprep.subr.bf16.mxu0 %v7649_v3  ;;  %v7721_v3 = vld [vmem:[#allocation3 + $0xd64] ss:$28 sps:$4 sm:$0xff]  }
 0x497   :  { %5831 = vmatpush2.bf16.msra.mxu1 %v7644_v15  ;;  %v7716_v15 = vld [vmem:[#allocation3 + $0x9e0] ss:$28 sps:$4 sm:$0xff]  }
 0x498   :  { %5874 = vmatpush2.bf16.msra.mxu0 %v7647_v58  ;;  %5832 = vmatprep.subr.bf16.mxu1 %v7652_v1  ;;  %v7719_v58 = vld [vmem:[#allocation3 + $0xd60] ss:$28 sps:$4 sm:$0xff]   ;;  %v7724_v1 = vld [vmem:[#allocation3 + $0x9ac] ss:$28 sps:$4 sm:$0xff]  }
 0x499   :  { %5875 = vmatprep.subr.bf16.mxu0 %v7655_v0  ;;  %v7727_v0 = vld [vmem:[#allocation3 + $0xd2c] ss:$28 sps:$4 sm:$0xff]  }
 0x49b   :  { %5833 = vmatpush2.bf16.msra.mxu1 %v7650_v25  ;;  %v7722_v25 = vld [vmem:[#allocation3 + $0x9a8] ss:$28 sps:$4 sm:$0xff]  }
 0x49c   :  { %5876 = vmatpush2.bf16.msra.mxu0 %v7653_v36  ;;  %5888 = vmatprep.subr.bf16.mxu1 %v7658_v37  ;;  %v7725_v36 = vld [vmem:[#allocation3 + $0xd28] ss:$28 sps:$4 sm:$0xff]   ;;  %v7730_v37 = vld [vmem:[#allocation3 + $0x974] ss:$28 sps:$4 sm:$0xff]  }
 0x49d   :  { %5931 = vmatprep.subr.bf16.mxu0 %v7661_v52  ;;  %v7733_v52 = vld [vmem:[#allocation3 + $0xcf4] ss:$28 sps:$4 sm:$0xff]  }
 0x49e   :  { %5835 = vmatmul.mubr.bf16.vlgmr.msra.gmra.mxu1 %v8536_v46 }
 0x49f   :  { %5878 = vmatmul.mubr.bf16.vlgmr.msra.gmra.mxu0 %v8544_v51  ;;  %5889 = vmatpush1.bf16.msra.mxu1 %v7656_v62  ;;  %v7728_v62 = vld [vmem:[#allocation3 + $0x970] ss:$28 sps:$4 sm:$0xff]  }
 0x4a0   :  { %5932 = vmatpush1.bf16.msra.mxu0 %v7659_v18  ;;  %5890 = vmatprep.subr.bf16.mxu1 %v7664_v22  ;;  %v7731_v18 = vld [vmem:[#allocation3 + $0xcf0] ss:$28 sps:$4 sm:$0xff]   ;;  %v7736_v22 = vld [vmem:[#allocation3 + $0x93c] ss:$28 sps:$4 sm:$0xff]  }
 0x4a1   :  { %5933 = vmatprep.subr.bf16.mxu0 %v7667_v29  ;;  %5920 = vmatprep.mubr.bf16.mxu1 %v8552_v17  ;;  %v7739_v29 = vld [vmem:[#allocation3 + $0xcbc] ss:$28 sps:$4 sm:$0xff]  }
 0x4a2   :  { %5963 = vmatprep.mubr.bf16.mxu0 %v8560_v24 }
 0x4a3   :  { %5891 = vmatpush1.bf16.msra.mxu1 %v7662_v35  ;;  %v7734_v35 = vld [vmem:[#allocation3 + $0x938] ss:$28 sps:$4 sm:$0xff]  }
 0x4a4   :  { %5934 = vmatpush1.bf16.msra.mxu0 %v7665_v40  ;;  %5892 = vmatprep.subr.bf16.mxu1 %v7670_v7  ;;  %v7737_v40 = vld [vmem:[#allocation3 + $0xcb8] ss:$28 sps:$4 sm:$0xff]   ;;  %v7742_v7 = vld [vmem:[#allocation3 + $0x904] ss:$28 sps:$4 sm:$0xff]  }
 0x4a5   :  { %5935 = vmatprep.subr.bf16.mxu0 %v7673_v8  ;;  %v7745_v8 = vld [vmem:[#allocation3 + $0xc84] ss:$28 sps:$4 sm:$0xff]  }
 0x4a7   :  { %5893 = vmatpush1.bf16.msra.mxu1 %v7668_v26  ;;  %v7740_v26 = vld [vmem:[#allocation3 + $0x900] ss:$28 sps:$4 sm:$0xff]  }
 0x4a8   :  { %5936 = vmatpush1.bf16.msra.mxu0 %v7671_v9  ;;  %5894 = vmatprep.subr.bf16.mxu1 %v7676_v27  ;;  %v7743_v9 = vld [vmem:[#allocation3 + $0xc80] ss:$28 sps:$4 sm:$0xff]   ;;  %v7748_v27 = vld [vmem:[#allocation3 + $0x8cc] ss:$28 sps:$4 sm:$0xff]  }
 0x4a9   :  { %5937 = vmatprep.subr.bf16.mxu0 %v7679_v10  ;;  %v7751_v10 = vld [vmem:[#allocation3 + $0xc4c] ss:$28 sps:$4 sm:$0xff]  }
 0x4ab   :  { %5895 = vmatpush1.bf16.msra.mxu1 %v7674_v14  ;;  %v7746_v14 = vld [vmem:[#allocation3 + $0x8c8] ss:$28 sps:$4 sm:$0xff]  }
 0x4ac   :  { %5938 = vmatpush1.bf16.msra.mxu0 %v7677_v30  ;;  %5896 = vmatprep.subr.bf16.mxu1 %v7682_v34  ;;  %v7749_v30 = vld [vmem:[#allocation3 + $0xc48] ss:$28 sps:$4 sm:$0xff]   ;;  %v7754_v34 = vld [vmem:[#allocation3 + $0x19c] ss:$28 sps:$4 sm:$0xff]  }
 0x4ad   :  { %5939 = vmatprep.subr.bf16.mxu0 %v7685_v39  ;;  %v7757_v39 = vld [vmem:[#allocation3 + $0x51c] ss:$28 sps:$4 sm:$0xff]  }
 0x4af   :  { %5897 = vmatpush1.bf16.msra.mxu1 %v7680_v41  ;;  %v7752_v41 = vld [vmem:[#allocation3 + $0x198] ss:$28 sps:$4 sm:$0xff]  }
 0x4b0   :  { %5940 = vmatpush1.bf16.msra.mxu0 %v7683_v47  ;;  %5898 = vmatprep.subr.bf16.mxu1 %v7688_v49  ;;  %v7755_v47 = vld [vmem:[#allocation3 + $0x518] ss:$28 sps:$4 sm:$0xff]   ;;  %v7760_v49 = vld [vmem:[#allocation3 + $0x164] ss:$28 sps:$4 sm:$0xff]  }
 0x4b1   :  { %5941 = vmatprep.subr.bf16.mxu0 %v7691_v13  ;;  %v7763_v13 = vld [vmem:[#allocation3 + $0x4e4] ss:$28 sps:$4 sm:$0xff]  }
 0x4b3   :  { %5899 = vmatpush1.bf16.msra.mxu1 %v7686_v56  ;;  %v7758_v56 = vld [vmem:[#allocation3 + $0x160] ss:$28 sps:$4 sm:$0xff]  }
 0x4b4   :  { %5942 = vmatpush1.bf16.msra.mxu0 %v7689_v63  ;;  %5900 = vmatprep.subr.bf16.mxu1 %v7694_v11  ;;  %v7761_v63 = vld [vmem:[#allocation3 + $0x4e0] ss:$28 sps:$4 sm:$0xff]   ;;  %v7766_v11 = vld [vmem:[#allocation3 + $0x12c] ss:$28 sps:$4 sm:$0xff]  }
 0x4b5   :  { %5943 = vmatprep.subr.bf16.mxu0 %v7697_v31  ;;  %v7769_v31 = vld [vmem:[#allocation3 + $0x4ac] ss:$28 sps:$4 sm:$0xff]  }
 0x4b7   :  { %5901 = vmatpush1.bf16.msra.mxu1 %v7692_v32  ;;  %v7764_v32 = vld [vmem:[#allocation3 + $0x128] ss:$28 sps:$4 sm:$0xff]  }
 0x4b8   :  { %5944 = vmatpush1.bf16.msra.mxu0 %v7695_v4  ;;  %5902 = vmatprep.subr.bf16.mxu1 %v7700_v16  ;;  %v7767_v4 = vld [vmem:[#allocation3 + $0x4a8] ss:$28 sps:$4 sm:$0xff]   ;;  %v7772_v16 = vld [vmem:[#allocation3 + $0xf4] ss:$28 sps:$4 sm:$0xff]  }
 0x4b9   :  { %5945 = vmatprep.subr.bf16.mxu0 %v7703_v57  ;;  %v7775_v57 = vld [vmem:[#allocation3 + $0x474] ss:$28 sps:$4 sm:$0xff]  }
 0x4bb   :  { %5903 = vmatpush1.bf16.msra.mxu1 %v7698_v42  ;;  %v7770_v42 = vld [vmem:[#allocation3 + $0xf0] ss:$28 sps:$4 sm:$0xff]  }
 0x4bc   :  { %5946 = vmatpush1.bf16.msra.mxu0 %v7701_v44  ;;  %5904 = vmatprep.subr.bf16.mxu1 %v7706_v48  ;;  %v7773_v44 = vld [vmem:[#allocation3 + $0x470] ss:$28 sps:$4 sm:$0xff]   ;;  %v7778_v48 = vld [vmem:[#allocation3 + $0xbc] ss:$28 sps:$4 sm:$0xff]  }
 0x4bd   :  { %5947 = vmatprep.subr.bf16.mxu0 %v7709_v53  ;;  %v7781_v53 = vld [vmem:[#allocation3 + $0x43c] ss:$28 sps:$4 sm:$0xff]  }
 0x4bf   :  { %5905 = vmatpush2.bf16.msra.mxu1 %v7704_v61  ;;  %v7776_v61 = vld [vmem:[#allocation3 + $0xb8] ss:$28 sps:$4 sm:$0xff]  }
 0x4c0   :  { %5948 = vmatpush2.bf16.msra.mxu0 %v7707_v6  ;;  %5906 = vmatprep.subr.bf16.mxu1 %v7712_v23  ;;  %v7779_v6 = vld [vmem:[#allocation3 + $0x438] ss:$28 sps:$4 sm:$0xff]   ;;  %v7784_v23 = vld [vmem:[#allocation3 + $0x84] ss:$28 sps:$4 sm:$0xff]  }
 0x4c1   :  { %5949 = vmatprep.subr.bf16.mxu0 %v7715_v5  ;;  %v7787_v5 = vld [vmem:[#allocation3 + $0x404] ss:$28 sps:$4 sm:$0xff]  }
 0x4c3   :  { %5907 = vmatpush2.bf16.msra.mxu1 %v7710_v12  ;;  %v7782_v12 = vld [vmem:[#allocation3 + $0x80] ss:$28 sps:$4 sm:$0xff]  }
 0x4c4   :  { %5950 = vmatpush2.bf16.msra.mxu0 %v7713_v28  ;;  %5908 = vmatprep.subr.bf16.mxu1 %v7718_v2  ;;  %v7785_v28 = vld [vmem:[#allocation3 + $0x400] ss:$28 sps:$4 sm:$0xff]   ;;  %v7790_v2 = vld [vmem:[#allocation3 + $0x4c] ss:$28 sps:$4 sm:$0xff]  }
 0x4c5   :  { %5951 = vmatprep.subr.bf16.mxu0 %v7721_v3  ;;  %v7793_v3 = vld [vmem:[#allocation3 + $0x3cc] ss:$28 sps:$4 sm:$0xff]  }
 0x4c7   :  { %5909 = vmatpush2.bf16.msra.mxu1 %v7716_v15  ;;  %v7788_v15 = vld [vmem:[#allocation3 + $0x48] ss:$28 sps:$4 sm:$0xff]  }
 0x4c8   :  { %5952 = vmatpush2.bf16.msra.mxu0 %v7719_v58  ;;  %5910 = vmatprep.subr.bf16.mxu1 %v7724_v1  ;;  %v7791_v58 = vld [vmem:[#allocation3 + $0x3c8] ss:$28 sps:$4 sm:$0xff]   ;;  %v7796_v1 = vld [vmem:[#allocation3 + $0x14] ss:$28 sps:$4 sm:$0xff]  }
 0x4c9   :  { %5953 = vmatprep.subr.bf16.mxu0 %v7727_v0  ;;  %v7799_v0 = vld [vmem:[#allocation3 + $0x394] ss:$28 sps:$4 sm:$0xff]  }
 0x4cb   :  { %5911 = vmatpush2.bf16.msra.mxu1 %v7722_v25  ;;  %v7794_v25 = vld [vmem:[#allocation3 + $0x10] ss:$28 sps:$4 sm:$0xff]  }
 0x4cc   :  { %5954 = vmatpush2.bf16.msra.mxu0 %v7725_v36  ;;  %5912 = vmatprep.subr.bf16.mxu1 %v7730_v37  ;;  %v7797_v36 = vld [vmem:[#allocation3 + $0x390] ss:$28 sps:$4 sm:$0xff]   ;;  %v7802_v37 = vld [vmem:[#allocation3 + $0x35c] ss:$28 sps:$4 sm:$0xff]  }
 0x4cd   :  { %5955 = vmatprep.subr.bf16.mxu0 %v7733_v52  ;;  %v7805_v52 = vld [vmem:[#allocation3 + $0x6dc] ss:$28 sps:$4 sm:$0xff]  }
 0x4cf   :  { %5913 = vmatpush2.bf16.msra.mxu1 %v7728_v62  ;;  %v7800_v62 = vld [vmem:[#allocation3 + $0x358] ss:$28 sps:$4 sm:$0xff]  }
 0x4d0   :  { %5956 = vmatpush2.bf16.msra.mxu0 %v7731_v18  ;;  %5914 = vmatprep.subr.bf16.mxu1 %v7736_v22  ;;  %v7803_v18 = vld [vmem:[#allocation3 + $0x6d8] ss:$28 sps:$4 sm:$0xff]   ;;  %v7808_v22 = vld [vmem:[#allocation3 + $0x324] ss:$28 sps:$4 sm:$0xff]  }
 0x4d1   :  { %5957 = vmatprep.subr.bf16.mxu0 %v7739_v29  ;;  %v7811_v29 = vld [vmem:[#allocation3 + $0x6a4] ss:$28 sps:$4 sm:$0xff]  }
 0x4d3   :  { %5915 = vmatpush2.bf16.msra.mxu1 %v7734_v35  ;;  %v7806_v35 = vld [vmem:[#allocation3 + $0x320] ss:$28 sps:$4 sm:$0xff]  }
 0x4d4   :  { %5958 = vmatpush2.bf16.msra.mxu0 %v7737_v40  ;;  %5916 = vmatprep.subr.bf16.mxu1 %v7742_v7  ;;  %v7809_v40 = vld [vmem:[#allocation3 + $0x6a0] ss:$28 sps:$4 sm:$0xff]   ;;  %v7814_v7 = vld [vmem:[#allocation3 + $0x2ec] ss:$28 sps:$4 sm:$0xff]  }
 0x4d5   :  { %5959 = vmatprep.subr.bf16.mxu0 %v7745_v8  ;;  %v7817_v8 = vld [vmem:[#allocation3 + $0x66c] ss:$28 sps:$4 sm:$0xff]  }
 0x4d7   :  { %5917 = vmatpush2.bf16.msra.mxu1 %v7740_v26  ;;  %v7812_v26 = vld [vmem:[#allocation3 + $0x2e8] ss:$28 sps:$4 sm:$0xff]  }
 0x4d8   :  { %5960 = vmatpush2.bf16.msra.mxu0 %v7743_v9  ;;  %5918 = vmatprep.subr.bf16.mxu1 %v7748_v27  ;;  %v7815_v9 = vld [vmem:[#allocation3 + $0x668] ss:$28 sps:$4 sm:$0xff]   ;;  %v7820_v27 = vld [vmem:[#allocation3 + $0x2b4] ss:$28 sps:$4 sm:$0xff]  }
 0x4d9   :  { %5961 = vmatprep.subr.bf16.mxu0 %v7751_v10  ;;  %v7823_v10 = vld [vmem:[#allocation3 + $0x634] ss:$28 sps:$4 sm:$0xff]  }
 0x4db   :  { %5919 = vmatpush2.bf16.msra.mxu1 %v7746_v14  ;;  %v7818_v14 = vld [vmem:[#allocation3 + $0x2b0] ss:$28 sps:$4 sm:$0xff]  }
 0x4dc   :  { %5962 = vmatpush2.bf16.msra.mxu0 %v7749_v30  ;;  %5974 = vmatprep.subr.bf16.mxu1 %v7754_v34  ;;  %v7821_v30 = vld [vmem:[#allocation3 + $0x630] ss:$28 sps:$4 sm:$0xff]   ;;  %v7826_v34 = vld [vmem:[#allocation3 + $0x27c] ss:$28 sps:$4 sm:$0xff]  }
 0x4dd   :  { %6017 = vmatprep.subr.bf16.mxu0 %v7757_v39  ;;  %v7829_v39 = vld [vmem:[#allocation3 + $0x5fc] ss:$28 sps:$4 sm:$0xff]  }
 0x4de   :  { %5921 = vmatmul.mubr.bf16.vlgmr.msra.gmra.mxu1 %v8572_v59 }
 0x4df   :  { %5964 = vmatmul.mubr.bf16.vlgmr.msra.gmra.mxu0 %v8580_v60  ;;  %5975 = vmatpush1.bf16.msra.mxu1 %v7752_v41  ;;  %v7824_v41 = vld [vmem:[#allocation3 + $0x278] ss:$28 sps:$4 sm:$0xff]  }
 0x4e0   :  { %6018 = vmatpush1.bf16.msra.mxu0 %v7755_v47  ;;  %5976 = vmatprep.subr.bf16.mxu1 %v7760_v49  ;;  %v7827_v47 = vld [vmem:[#allocation3 + $0x5f8] ss:$28 sps:$4 sm:$0xff]   ;;  %v7832_v49 = vld [vmem:[#allocation3 + $0x244] ss:$28 sps:$4 sm:$0xff]  }
 0x4e1   :  { %6019 = vmatprep.subr.bf16.mxu0 %v7763_v13  ;;  %6006 = vmatprep.mubr.bf16.mxu1 %v8521_v38  ;;  %v7835_v13 = vld [vmem:[#allocation3 + $0x5c4] ss:$28 sps:$4 sm:$0xff]  }
 0x4e2   :  { %6049 = vmatprep.mubr.bf16.mxu0 %v8526_v50 }
 0x4e3   :  { %5977 = vmatpush1.bf16.msra.mxu1 %v7758_v56  ;;  %v7830_v56 = vld [vmem:[#allocation3 + $0x240] ss:$28 sps:$4 sm:$0xff]  }
 0x4e4   :  { %6020 = vmatpush1.bf16.msra.mxu0 %v7761_v63  ;;  %5978 = vmatprep.subr.bf16.mxu1 %v7766_v11  ;;  %v7833_v63 = vld [vmem:[#allocation3 + $0x5c0] ss:$28 sps:$4 sm:$0xff]   ;;  %v7838_v11 = vld [vmem:[#allocation3 + $0x20c] ss:$28 sps:$4 sm:$0xff]  }
 0x4e5   :  { %6021 = vmatprep.subr.bf16.mxu0 %v7769_v31  ;;  %v8594_v31 = vld [vmem:[#allocation13] sm:$0xff] }
 0x4e7   :  { %5979 = vmatpush1.bf16.msra.mxu1 %v7764_v32  ;;  %v5664_v32 = vpop.f32.mrf.mxu1 }
 0x4e8   :  { %6022 = vmatpush1.bf16.msra.mxu0 %v7767_v4  ;;  %5980 = vmatprep.subr.bf16.mxu1 %v7772_v16  ;;  %v5707_v4 = vpop.f32.mrf.mxu0  ;;  %v7841_v16 = vld [vmem:[#allocation3 + $0x58c] ss:$28 sps:$4 sm:$0xff]  }
 0x4e9   :  { %6023 = vmatprep.subr.bf16.mxu0 %v7775_v57  ;;  %v7836_v57 = vld [vmem:[#allocation3 + $0x208] ss:$28 sps:$4 sm:$0xff]  }
 0x4eb   :  { %5981 = vmatpush1.bf16.msra.mxu1 %v7770_v42  ;;  %v7839_v42 = vld [vmem:[#allocation3 + $0x588] ss:$28 sps:$4 sm:$0xff]  }
 0x4ec   :  { %6024 = vmatpush1.bf16.msra.mxu0 %v7773_v44  ;;  %5982 = vmatprep.subr.bf16.mxu1 %v7778_v48  ;;  %v7844_v44 = vld [vmem:[#allocation3 + $0x1d4] ss:$28 sps:$4 sm:$0xff]   ;;  %v5666_v48 = vpop.f32.mrf.mxu1 }
 0x4ed   :  { %6025 = vmatprep.subr.bf16.mxu0 %v7781_v53  ;;  %v5709_v53 = vpop.f32.mrf.mxu0 }
 0x4ef   :  { %5983 = vmatpush1.bf16.msra.mxu1 %v7776_v61  ;;  %v7847_v61 = vld [vmem:[#allocation3 + $0x554] ss:$28 sps:$4 sm:$0xff]  }
 0x4f0   :  { %6026 = vmatpush1.bf16.msra.mxu0 %v7779_v6  ;;  %5984 = vmatprep.subr.bf16.mxu1 %v7784_v23  ;;  %v3294_v6 = vrot.slane %v8594_v31, %v8298_v21  ;;  %v7842_v23 = vld [vmem:[#allocation3 + $0x1d0] ss:$28 sps:$4 sm:$0xff]  }
 0x4f1   :  { %6027 = vmatprep.subr.bf16.mxu0 %v7787_v5  ;;  %v7845_v5 = vld [vmem:[#allocation3 + $0x550] ss:$28 sps:$4 sm:$0xff]  }
 0x4f3   :  { %5985 = vmatpush1.bf16.msra.mxu1 %v7782_v12  ;;  %v3298_v12 = vrot.slane %v8594_v31, %v8295_v20  ;;  %v7859_v20 = vld [vmem:[#allocation3 + $0xbe4] ss:$28 sps:$4 sm:$0xff]  }
 0x4f4   :  { %6028 = vmatpush1.bf16.msra.mxu0 %v7785_v28  ;;  %5986 = vmatprep.subr.bf16.mxu1 %v7790_v2  ;;  %v7850_v28 = vld [vmem:[#allocation3 + $0x89c] ss:$28 sps:$4 sm:$0xff]   ;;  %v5668_v2 = vpop.f32.mrf.mxu1 }
 0x4f5   :  { %6029 = vmatprep.subr.bf16.mxu0 %v7793_v3  ;;  %v5711_v3 = vpop.f32.mrf.mxu0 }
 0x4f6   :  { %v5670_v21 = vpop.f32.mrf.mxu1 }
 0x4f7   :  { %5987 = vmatpush1.bf16.msra.mxu1 %v7788_v15  ;;  %v7853_v15 = vld [vmem:[#allocation3 + $0xc1c] ss:$28 sps:$4 sm:$0xff]  }
 0x4f8   :  { %6030 = vmatpush1.bf16.msra.mxu0 %v7791_v58  ;;  %5988 = vmatprep.subr.bf16.mxu1 %v7796_v1  ;;  %v5665_v58 = vadd.f32 %v5664_v32, %v3294_v6  ;;  %v5667_v1 = vadd.f32 %v5666_v48, %v3298_v12  ;;  %v7868_v32 = vld [vmem:[#allocation3 + $0x7f4] ss:$28 sps:$4 sm:$0xff]  }
 0x4f9   :  { %6031 = vmatprep.subr.bf16.mxu0 %v7799_v0  ;;  %v7848_v0 = vld [vmem:[#allocation3 + $0x898] ss:$28 sps:$4 sm:$0xff]   ;;  %v7866_v48 = vld [vmem:[#allocation3 + $0x7f0] ss:$28 sps:$4 sm:$0xff]  }
 0x4fb   :  { %5989 = vmatpush1.bf16.msra.mxu1 %v7794_v25  ;;  %v7851_v25 = vld [vmem:[#allocation3 + $0xc18] ss:$28 sps:$4 sm:$0xff]  }
 0x4fc   :  { %6032 = vmatpush1.bf16.msra.mxu0 %v7797_v36  ;;  %5990 = vmatprep.subr.bf16.mxu1 %v7802_v37  ;;  %v5713_v36 = vpop.f32.mrf.mxu0  ;;  %v7856_v37 = vld [vmem:[#allocation3 + $0x864] ss:$28 sps:$4 sm:$0xff]  }
 0x4fd   :  { %6033 = vmatprep.subr.bf16.mxu0 %v7805_v52  ;;  %v5708_v52 = vadd.f32 %v5707_v4, %v5665_v58  ;;  %v7871_v4 = vld [vmem:[#allocation3 + $0xb74] ss:$28 sps:$4 sm:$0xff]   ;;  %v7886_v58 = vld [vmem:[#allocation3 + $0x74c] ss:$28 sps:$4 sm:$0xff]  }
 0x4ff   :  { %5991 = vmatpush2.bf16.msra.mxu1 %v7800_v62  ;;  %v5669_v62 = vadd.f32 %v5668_v2, %v3294_v6  ;;  %v7877_v6 = vld [vmem:[#allocation3 + $0xb3c] ss:$28 sps:$4 sm:$0xff]  }
 0x500   :  { %6034 = vmatpush2.bf16.msra.mxu0 %v7803_v18  ;;  %5992 = vmatprep.subr.bf16.mxu1 %v7808_v22  ;;  %v7878_v2 = vld [vmem:[#allocation3 + $0x780] ss:$28 sps:$4 sm:$0xff]  }
 0x501   :  { %6035 = vmatprep.subr.bf16.mxu0 %v7811_v29  ;;  %v5710_v29 = vadd.f32 %v5709_v53, %v5667_v1  ;;  %v7869_v53 = vld [vmem:[#allocation3 + $0xb70] ss:$28 sps:$4 sm:$0xff]  }
 0x502   :  { %v7889_v1 = vld [vmem:[#allocation3 + $0xacc] ss:$28 sps:$4 sm:$0xff]  }
 0x503   :  { %5993 = vmatpush2.bf16.msra.mxu1 %v7806_v35  ;;  %v5671_v35 = vadd.f32 %v5670_v21, %v3298_v12  ;;  %v7880_v12 = vld [vmem:[#allocation3 + $0x784] ss:$28 sps:$4 sm:$0xff]  }
 0x504   :  { %6036 = vmatpush2.bf16.msra.mxu0 %v7809_v40  ;;  %5994 = vmatprep.subr.bf16.mxu1 %v7814_v7  ;;  %v7854_v7 = vld [vmem:[#allocation3 + $0x860] ss:$28 sps:$4 sm:$0xff]   ;;  %v7887_v21 = vld [vmem:[#allocation3 + $0xac8] ss:$28 sps:$4 sm:$0xff]  }
 0x505   :  { %6037 = vmatprep.subr.bf16.mxu0 %v7817_v8  ;;  %v7857_v8 = vld [vmem:[#allocation3 + $0xbe0] ss:$28 sps:$4 sm:$0xff]  }
 0x507   :  { %5995 = vmatpush2.bf16.msra.mxu1 %v7812_v26 }
 0x508   :  { %6038 = vmatpush2.bf16.msra.mxu0 %v7815_v9  ;;  %5996 = vmatprep.subr.bf16.mxu1 %v7820_v27  ;;  %v7862_v27 = vld [vmem:[#allocation3 + $0x82c] ss:$28 sps:$4 sm:$0xff]  }
 0x509   :  { %6039 = vmatprep.subr.bf16.mxu0 %v7823_v10  ;;  %v7865_v10 = vld [vmem:[#allocation3 + $0xbac] ss:$28 sps:$4 sm:$0xff]  }
 0x50b   :  { %5997 = vmatpush2.bf16.msra.mxu1 %v7818_v14  ;;  %v5712_v14 = vadd.f32 %v5711_v3, %v5669_v62  ;;  %v7881_v3 = vld [vmem:[#allocation3 + $0xb00] ss:$28 sps:$4 sm:$0xff]   ;;  %v7890_v62 = vld [vmem:[#allocation3 + $0x710] ss:$28 sps:$4 sm:$0xff]  }
 0x50c   :  { %6040 = vmatpush2.bf16.msra.mxu0 %v7821_v30  ;;  %5998 = vmatprep.subr.bf16.mxu1 %v7826_v34 }
 0x50d   :  { %6041 = vmatprep.subr.bf16.mxu0 %v7829_v39 }
 0x50f   :  { %5999 = vmatpush2.bf16.msra.mxu1 %v7824_v41 }
 0x510   :  { %6042 = vmatpush2.bf16.msra.mxu0 %v7827_v47  ;;  %6000 = vmatprep.subr.bf16.mxu1 %v7832_v49  ;;  %v5714_v47 = vadd.f32 %v5713_v36, %v5671_v35  ;;  %v7896_v35 = vld [vmem:[#allocation3 + $0xa58] ss:$28 sps:$4 sm:$0xff]  }
 0x511   :  { %6043 = vmatprep.subr.bf16.mxu0 %v7835_v13 }
 0x513   :  { %6001 = vmatpush2.bf16.msra.mxu1 %v7830_v56  ;;  %v7860_v56 = vld [vmem:[#allocation3 + $0x828] ss:$28 sps:$4 sm:$0xff]  }
 0x514   :  { %6044 = vmatpush2.bf16.msra.mxu0 %v7833_v63  ;;  %6002 = vmatprep.subr.bf16.mxu1 %v7838_v11  ;;  %v7863_v63 = vld [vmem:[#allocation3 + $0xba8] ss:$28 sps:$4 sm:$0xff]  }
 0x515   :  { %6045 = vmatprep.subr.bf16.mxu0 %v7841_v16 }
 0x517   :  { %6003 = vmatpush2.bf16.msra.mxu1 %v7836_v57 }
 0x518   :  { %6046 = vmatpush2.bf16.msra.mxu0 %v7839_v42  ;;  %6004 = vmatprep.subr.bf16.mxu1 %v7844_v44 }
 0x519   :  { %6047 = vmatprep.subr.bf16.mxu0 %v7847_v61  ;;  %v7874_v61 = vld [vmem:[#allocation3 + $0x7bc] ss:$28 sps:$4 sm:$0xff]  }
 0x51b   :  { %6005 = vmatpush2.bf16.msra.mxu1 %v7842_v23  ;;  %v7872_v23 = vld [vmem:[#allocation3 + $0x7b8] ss:$28 sps:$4 sm:$0xff]  }
 0x51c   :  { %6048 = vmatpush2.bf16.msra.mxu0 %v7845_v5  ;;  %6060 = vmatprep.subr.bf16.mxu1 %v7850_v28  ;;  %v7875_v5 = vld [vmem:[#allocation3 + $0xb38] ss:$28 sps:$4 sm:$0xff]   ;;  %v7883_v28 = vld [vmem:[#allocation3 + $0xb04] ss:$28 sps:$4 sm:$0xff]  }
 0x51d   :  { %6103 = vmatprep.subr.bf16.mxu0 %v7853_v15 }
 0x51e   :  { %v5750_v18 = vpop.f32.mrf.mxu1  ;;  %6007 = vmatmul.mubr.bf16.vlgmr.msra.gmra.mxu1 %v8536_v46 }
 0x51f   :  { %v5793_v22 = vpop.f32.mrf.mxu0  ;;  %6050 = vmatmul.mubr.bf16.vlgmr.msra.gmra.mxu0 %v8544_v51  ;;  %v5751_v40 = vadd.f32 %v5750_v18, %v5708_v52  ;;  %6061 = vmatpush1.bf16.msra.mxu1 %v7848_v0  ;;  %v7893_v18 = vld [vmem:[#allocation3 + $0xa90] ss:$28 sps:$4 sm:$0xff]  }
 0x520   :  { %6104 = vmatpush1.bf16.msra.mxu0 %v7851_v25  ;;  %v5752_v26 = vpop.f32.mrf.mxu1  ;;  %6062 = vmatprep.subr.bf16.mxu1 %v7856_v37  ;;  %v7884_v25 = vld [vmem:[#allocation3 + $0x748] ss:$28 sps:$4 sm:$0xff]   ;;  %v7892_v37 = vld [vmem:[#allocation3 + $0x714] ss:$28 sps:$4 sm:$0xff]  }
 0x521   :  { %v5795_v9 = vpop.f32.mrf.mxu0  ;;  %6105 = vmatprep.subr.bf16.mxu0 %v7859_v20  ;;  %v5794_v30 = vadd.f32 %v5793_v22, %v5751_v40  ;;  %v5753_v34 = vadd.f32 %v5752_v26, %v5710_v29  ;;  %6092 = vmatprep.mubr.bf16.mxu1 %v8552_v17  ;;  %v7895_v20 = vld [vmem:[#allocation3 + $0xa94] ss:$28 sps:$4 sm:$0xff]   ;;  %v7898_v22 = vld [vmem:[#allocation3 + $0xa5c] ss:$28 sps:$4 sm:$0xff]  }
 0x522   :  { %6135 = vmatprep.mubr.bf16.mxu0 %v8560_v24  ;;  %v5754_v39 = vpop.f32.mrf.mxu1  ;;  %v7901_v29 = vld [vmem:[#allocation3 + $0xddc] ss:$28 sps:$4 sm:$0xff]  }
 0x523   :  { %v5797_v41 = vpop.f32.mrf.mxu0  ;;  %8008 = vtanh.f32 %v5794_v30  ;;  %v5796_v49 = vadd.f32 %v5795_v9, %v5753_v34  ;;  %v5755_v13 = vadd.f32 %v5754_v39, %v5712_v14  ;;  %6063 = vmatpush1.bf16.msra.mxu1 %v7854_v7  ;;  %v7899_v40 = vld [vmem:[#allocation3 + $0xdd8] ss:$28 sps:$4 sm:$0xff]   ;;  %v7904_v7 = vld [vmem:[#allocation3 + $0xa24] ss:$28 sps:$4 sm:$0xff]  }
 0x524   :  { %6106 = vmatpush1.bf16.msra.mxu0 %v7857_v8  ;;  %v5756_v11 = vpop.f32.mrf.mxu1  ;;  %6064 = vmatprep.subr.bf16.mxu1 %v7862_v27  ;;  %v7907_v8 = vld [vmem:[#allocation3 + $0xda4] ss:$28 sps:$4 sm:$0xff]   ;;  %v7910_v27 = vld [vmem:[#allocation3 + $0x9ec] ss:$28 sps:$4 sm:$0xff]   ;;  %v7916_v34 = vld [vmem:[#allocation3 + $0x9b4] ss:$28 sps:$4 sm:$0xff]  }
 0x525   :  { %6107 = vmatprep.subr.bf16.mxu0 %v7865_v10  ;;  %8010 = vtanh.f32 %v5796_v49  ;;  %v5798_v16 = vadd.f32 %v5797_v41, %v5755_v13  ;;  %v5757_v57 = vadd.f32 %v5756_v11, %v5714_v47  ;;  %v5799_v42 = vpop.f32.mrf.mxu0  ;;  %v7902_v26 = vld [vmem:[#allocation3 + $0xa20] ss:$28 sps:$4 sm:$0xff]   ;;  %v7913_v10 = vld [vmem:[#allocation3 + $0xd6c] ss:$28 sps:$4 sm:$0xff]   ;;  %v7919_v39 = vld [vmem:[#allocation3 + $0xd34] ss:$28 sps:$4 sm:$0xff]  }
 0x526   :  { %v7905_v9 = vld [vmem:[#allocation3 + $0xda0] ss:$28 sps:$4 sm:$0xff]   ;;  %v7908_v14 = vld [vmem:[#allocation3 + $0x9e8] ss:$28 sps:$4 sm:$0xff]   ;;  %v7914_v41 = vld [vmem:[#allocation3 + $0x9b0] ss:$28 sps:$4 sm:$0xff]  }
 0x527   :  { %8012 = vtanh.f32 %v5798_v16  ;;  %v5800_v44 = vadd.f32 %v5799_v42, %v5757_v57  ;;  %6065 = vmatpush1.bf16.msra.mxu1 %v7860_v56  ;;  %v7911_v30 = vld [vmem:[#allocation3 + $0xd68] ss:$28 sps:$4 sm:$0xff]   ;;  %v7917_v47 = vld [vmem:[#allocation3 + $0xd30] ss:$28 sps:$4 sm:$0xff]   ;;  %v7922_v49 = vld [vmem:[#allocation3 + $0x97c] ss:$28 sps:$4 sm:$0xff]  }
 0x528   :  { %6108 = vmatpush1.bf16.msra.mxu0 %v7863_v63  ;;  %6066 = vmatprep.subr.bf16.mxu1 %v7868_v32  ;;  %v7925_v13 = vld [vmem:[#allocation3 + $0xcfc] ss:$28 sps:$4 sm:$0xff]   ;;  %v7928_v11 = vld [vmem:[#allocation3 + $0x944] ss:$28 sps:$4 sm:$0xff]   ;;  %v7934_v57 = vld [vmem:[#allocation3 + $0x90c] ss:$28 sps:$4 sm:$0xff]  }
 0x529   :  { %6109 = vmatprep.subr.bf16.mxu0 %v7871_v4  ;;  %8014 = vtanh.f32 %v5800_v44  ;;  %v7920_v56 = vld [vmem:[#allocation3 + $0x978] ss:$28 sps:$4 sm:$0xff]   ;;  %v7931_v32 = vld [vmem:[#allocation3 + $0xcc4] ss:$28 sps:$4 sm:$0xff]   ;;  %v7937_v42 = vld [vmem:[#allocation3 + $0xc8c] ss:$28 sps:$4 sm:$0xff]  }
 0x52a   :  { %v7923_v63 = vld [vmem:[#allocation3 + $0xcf8] ss:$28 sps:$4 sm:$0xff]   ;;  %v7926_v4 = vld [vmem:[#allocation3 + $0x940] ss:$28 sps:$4 sm:$0xff]   ;;  %v7932_v44 = vld [vmem:[#allocation3 + $0x908] ss:$28 sps:$4 sm:$0xff]  }
 0x52b   :  { %6067 = vmatpush1.bf16.msra.mxu1 %v7866_v48  ;;  %v7929_v16 = vld [vmem:[#allocation3 + $0xcc0] ss:$28 sps:$4 sm:$0xff]   ;;  %v7935_v48 = vld [vmem:[#allocation3 + $0xc88] ss:$28 sps:$4 sm:$0xff]  }
 0x52c   :  { %6110 = vmatpush1.bf16.msra.mxu0 %v7869_v53  ;;  %6068 = vmatprep.subr.bf16.mxu1 %v7874_v61  ;;  %v7940_v53 = vld [vmem:[#allocation3 + $0x8d4] ss:$28 sps:$4 sm:$0xff]  }
 0x52d   :  { %6111 = vmatprep.subr.bf16.mxu0 %v7877_v6  ;;  %v7943_v61 = vld [vmem:[#allocation3 + $0xc54] ss:$28 sps:$4 sm:$0xff]  }
 0x52e   :  { %v7938_v6 = vld [vmem:[#allocation3 + $0x8d0] ss:$28 sps:$4 sm:$0xff]  }
 0x52f   :  { %6069 = vmatpush1.bf16.msra.mxu1 %v7872_v23  ;;  %v7941_v23 = vld [vmem:[#allocation3 + $0xc50] ss:$28 sps:$4 sm:$0xff]  }
 0x530   :  { %6112 = vmatpush1.bf16.msra.mxu0 %v7875_v5  ;;  %v8009_v15 = vpop.eup %8008  ;;  %6070 = vmatprep.subr.bf16.mxu1 %v7880_v12  ;;  %v7944_v5 = vld [vmem:[#allocation3 + $0x360] ss:$28 sps:$4 sm:$0xff]  }
 0x531   :  { %6113 = vmatprep.subr.bf16.mxu0 %v7883_v28  ;;  %6324 = vst [vmem:[%s8678_s9] sm:$0xff] %v8009_v15  ;;  %v7945_v12 = vld [vmem:[#allocation3 + $0x6e0] ss:$28 sps:$4 sm:$0xff]   ;;  %v7949_v15 = vld [vmem:[#allocation3 + $0x6a8] ss:$28 sps:$4 sm:$0xff]  }
 0x532   :  { %v8011_v0 = vpop.eup %8010  ;;  %v7946_v28 = vld [vmem:[#allocation3 + $0x1a0] ss:$28 sps:$4 sm:$0xff]  }
 0x533   :  { %6325 = vst [vmem:[%s8678_s9 + $0x8] sm:$0xff] %v8011_v0  ;;  %6071 = vmatpush1.bf16.msra.mxu1 %v7878_v2  ;;  %v7947_v2 = vld [vmem:[#allocation3 + $0x520] ss:$28 sps:$4 sm:$0xff]   ;;  %v7952_v0 = vld [vmem:[#allocation3 + $0x2f0] ss:$28 sps:$4 sm:$0xff]  }
 0x534   :  { %6114 = vmatpush1.bf16.msra.mxu0 %v7881_v3  ;;  %v8013_v36 = vpop.eup %8012  ;;  %6072 = vmatprep.subr.bf16.mxu1 %v7886_v58  ;;  %v7948_v3 = vld [vmem:[#allocation3 + $0x328] ss:$28 sps:$4 sm:$0xff]  }
 0x535   :  { %6115 = vmatprep.subr.bf16.mxu0 %v7889_v1  ;;  %6331 = vst [vmem:[%s8678_s9 + $0x38] sm:$0xff] %v8013_v36  ;;  %v7950_v58 = vld [vmem:[#allocation3 + $0x168] ss:$28 sps:$4 sm:$0xff]   ;;  %v7955_v36 = vld [vmem:[#allocation3 + $0x4b0] ss:$28 sps:$4 sm:$0xff]  }
 0x536   :  { %v8015_v52 = vpop.eup %8014  ;;  %v7951_v1 = vld [vmem:[#allocation3 + $0x4e8] ss:$28 sps:$4 sm:$0xff]  }
 0x537   :  { %6332 = vst [vmem:[%s8678_s9 + $0x40] sm:$0xff] %v8015_v52  ;;  %6073 = vmatpush1.bf16.msra.mxu1 %v7884_v25  ;;  %v7953_v25 = vld [vmem:[#allocation3 + $0x670] ss:$28 sps:$4 sm:$0xff]   ;;  %v7958_v52 = vld [vmem:[#allocation3 + $0xf8] ss:$28 sps:$4 sm:$0xff]  }
 0x538   :  { %6116 = vmatpush1.bf16.msra.mxu0 %v7887_v21  ;;  %6074 = vmatprep.subr.bf16.mxu1 %v7892_v37  ;;  %v7954_v21 = vld [vmem:[#allocation3 + $0x130] ss:$28 sps:$4 sm:$0xff]   ;;  %v7956_v37 = vld [vmem:[#allocation3 + $0x2b8] ss:$28 sps:$4 sm:$0xff]  }
 0x539   :  { %6117 = vmatprep.subr.bf16.mxu0 %v7895_v20  ;;  %v7957_v20 = vld [vmem:[#allocation3 + $0x638] ss:$28 sps:$4 sm:$0xff]  }
 0x53b   :  { %6075 = vmatpush1.bf16.msra.mxu1 %v7890_v62  ;;  %v7959_v62 = vld [vmem:[#allocation3 + $0x478] ss:$28 sps:$4 sm:$0xff]  }
 0x53c   :  { %6118 = vmatpush1.bf16.msra.mxu0 %v7893_v18  ;;  %6076 = vmatprep.subr.bf16.mxu1 %v7898_v22  ;;  %v7960_v18 = vld [vmem:[#allocation3 + $0x280] ss:$28 sps:$4 sm:$0xff]  }
 0x53d   :  { %6119 = vmatprep.subr.bf16.mxu0 %v7901_v29  ;;  %v7961_v22 = vld [vmem:[#allocation3 + $0x600] ss:$28 sps:$4 sm:$0xff]   ;;  %v7964_v29 = vld [vmem:[#allocation3 + $0x248] ss:$28 sps:$4 sm:$0xff]  }
 0x53f   :  { %6077 = vmatpush2.bf16.msra.mxu1 %v7896_v35  ;;  %v7965_v35 = vld [vmem:[#allocation3 + $0x5c8] ss:$28 sps:$4 sm:$0xff]  }
 0x540   :  { %6120 = vmatpush2.bf16.msra.mxu0 %v7899_v40  ;;  %6078 = vmatprep.subr.bf16.mxu1 %v7904_v7  ;;  %v7966_v40 = vld [vmem:[#allocation3 + $0x88] ss:$28 sps:$4 sm:$0xff]  }
 0x541   :  { %6121 = vmatprep.subr.bf16.mxu0 %v7907_v8  ;;  %v7967_v7 = vld [vmem:[#allocation3 + $0x408] ss:$28 sps:$4 sm:$0xff]   ;;  %v7968_v8 = vld [vmem:[#allocation3 + $0x210] ss:$28 sps:$4 sm:$0xff]  }
 0x543   :  { %6079 = vmatpush2.bf16.msra.mxu1 %v7902_v26  ;;  %v7969_v26 = vld [vmem:[#allocation3 + $0x590] ss:$28 sps:$4 sm:$0xff]  }
 0x544   :  { %6122 = vmatpush2.bf16.msra.mxu0 %v7905_v9  ;;  %6080 = vmatprep.subr.bf16.mxu1 %v7910_v27  ;;  %v7970_v9 = vld [vmem:[#allocation3 + $0x50] ss:$28 sps:$4 sm:$0xff]  }
 0x545   :  { %6123 = vmatprep.subr.bf16.mxu0 %v7913_v10  ;;  %v7971_v27 = vld [vmem:[#allocation3 + $0x3d0] ss:$28 sps:$4 sm:$0xff]   ;;  %v7972_v10 = vld [vmem:[#allocation3 + $0x1d8] ss:$28 sps:$4 sm:$0xff]  }
 0x547   :  { %6081 = vmatpush2.bf16.msra.mxu1 %v7908_v14  ;;  %v7973_v14 = vld [vmem:[#allocation3 + $0x558] ss:$28 sps:$4 sm:$0xff]  }
 0x548   :  { %6124 = vmatpush2.bf16.msra.mxu0 %v7911_v30  ;;  %6082 = vmatprep.subr.bf16.mxu1 %v7916_v34  ;;  %v7974_v30 = vld [vmem:[#allocation3 + $0x18] ss:$28 sps:$4 sm:$0xff]  }
 0x549   :  { %6125 = vmatprep.subr.bf16.mxu0 %v7919_v39  ;;  %v7975_v34 = vld [vmem:[#allocation3 + $0x398] ss:$28 sps:$4 sm:$0xff]   ;;  %v7976_v39 = vld [vmem:[#allocation3 + $0xa60] ss:$28 sps:$4 sm:$0xff]  }
 0x54b   :  { %6083 = vmatpush2.bf16.msra.mxu1 %v7914_v41  ;;  %v7977_v41 = vld [vmem:[#allocation3 + $0xde0] ss:$28 sps:$4 sm:$0xff]  }
 0x54c   :  { %6126 = vmatpush2.bf16.msra.mxu0 %v7917_v47  ;;  %6084 = vmatprep.subr.bf16.mxu1 %v7922_v49  ;;  %v7978_v47 = vld [vmem:[#allocation3 + $0x8a0] ss:$28 sps:$4 sm:$0xff]  }
 0x54d   :  { %6127 = vmatprep.subr.bf16.mxu0 %v7925_v13  ;;  %v7979_v49 = vld [vmem:[#allocation3 + $0xc20] ss:$28 sps:$4 sm:$0xff]   ;;  %v7980_v13 = vld [vmem:[#allocation3 + $0xa28] ss:$28 sps:$4 sm:$0xff]  }
 0x54f   :  { %6085 = vmatpush2.bf16.msra.mxu1 %v7920_v56  ;;  %v7981_v56 = vld [vmem:[#allocation3 + $0xda8] ss:$28 sps:$4 sm:$0xff]  }
 0x550   :  { %6128 = vmatpush2.bf16.msra.mxu0 %v7923_v63  ;;  %6086 = vmatprep.subr.bf16.mxu1 %v7928_v11  ;;  %v7982_v63 = vld [vmem:[#allocation3 + $0x868] ss:$28 sps:$4 sm:$0xff]  }
 0x551   :  { %6129 = vmatprep.subr.bf16.mxu0 %v7931_v32  ;;  %v7983_v11 = vld [vmem:[#allocation3 + $0xbe8] ss:$28 sps:$4 sm:$0xff]   ;;  %v7984_v32 = vld [vmem:[#allocation3 + $0x9f0] ss:$28 sps:$4 sm:$0xff]  }
 0x553   :  { %6087 = vmatpush2.bf16.msra.mxu1 %v7926_v4  ;;  %v7985_v4 = vld [vmem:[#allocation3 + $0xd70] ss:$28 sps:$4 sm:$0xff]  }
 0x554   :  { %6130 = vmatpush2.bf16.msra.mxu0 %v7929_v16  ;;  %6088 = vmatprep.subr.bf16.mxu1 %v7934_v57  ;;  %v7986_v16 = vld [vmem:[#allocation3 + $0x830] ss:$28 sps:$4 sm:$0xff]  }
 0x555   :  { %6131 = vmatprep.subr.bf16.mxu0 %v7937_v42  ;;  %v7987_v57 = vld [vmem:[#allocation3 + $0xbb0] ss:$28 sps:$4 sm:$0xff]   ;;  %v7990_v42 = vld [vmem:[#allocation3 + $0x7f8] ss:$28 sps:$4 sm:$0xff]  }
 0x557   :  { %6089 = vmatpush2.bf16.msra.mxu1 %v7932_v44  ;;  %v7991_v44 = vld [vmem:[#allocation3 + $0xb78] ss:$28 sps:$4 sm:$0xff]  }
 0x558   :  { %6132 = vmatpush2.bf16.msra.mxu0 %v7935_v48  ;;  %6090 = vmatprep.subr.bf16.mxu1 %v7940_v53  ;;  %v7992_v48 = vld [vmem:[#allocation3 + $0x980] ss:$28 sps:$4 sm:$0xff]  }
 0x559   :  { %6133 = vmatprep.subr.bf16.mxu0 %v7943_v61  ;;  %v7993_v53 = vld [vmem:[#allocation3 + $0xd00] ss:$28 sps:$4 sm:$0xff]   ;;  %v7996_v61 = vld [vmem:[#allocation3 + $0x948] ss:$28 sps:$4 sm:$0xff]  }
 0x55b   :  { %6091 = vmatpush2.bf16.msra.mxu1 %v7938_v6  ;;  %v7997_v6 = vld [vmem:[#allocation3 + $0xcc8] ss:$28 sps:$4 sm:$0xff]  }
 0x55c   :  { %6134 = vmatpush2.bf16.msra.mxu0 %v7941_v23  ;;  %7146 = vmatprep.subr.bf16.mxu1 %v7944_v5  ;;  %v7998_v23 = vld [vmem:[#allocation3 + $0x788] ss:$28 sps:$4 sm:$0xff]  }
 0x55d   :  { %7168 = vmatprep.subr.bf16.mxu0 %v7945_v12  ;;  %v7999_v5 = vld [vmem:[#allocation3 + $0xb08] ss:$28 sps:$4 sm:$0xff]  }
 0x55e   :  { %6093 = vmatmul.mubr.bf16.vlgmr.msra.gmra.mxu1 %v8572_v59  ;;  %v5836_v12 = vpop.f32.mrf.mxu1 }
 0x55f   :  { %6136 = vmatmul.mubr.bf16.vlgmr.msra.gmra.mxu0 %v8580_v60  ;;  %7147 = vmatpush3.bf16.msra.mxu1 %v7946_v28  ;;  %v5879_v28 = vpop.f32.mrf.mxu0 }
 0x560   :  { %7169 = vmatpush3.bf16.msra.mxu0 %v7947_v2  ;;  %7148 = vmatprep.subr.bf16.mxu1 %v7948_v3  ;;  %v8000_v2 = vld [vmem:[#allocation3 + $0x910] ss:$28 sps:$4 sm:$0xff]  }
 0x561   :  { %7170 = vmatprep.subr.bf16.mxu0 %v7949_v15  ;;  %6178 = vmatprep.mubr.bf16.mxu1 %v8521_v38  ;;  %v7962_v38 = vld [vmem:[#allocation3 + $0xc0] ss:$28 sps:$4 sm:$0xff]   ;;  %v8001_v3 = vld [vmem:[#allocation3 + $0xc90] ss:$28 sps:$4 sm:$0xff]  }
 0x562   :  { %6219 = vmatprep.mubr.bf16.mxu0 %v8526_v50  ;;  %v7963_v50 = vld [vmem:[#allocation3 + $0x440] ss:$28 sps:$4 sm:$0xff]   ;;  %v8002_v15 = vld [vmem:[#allocation3 + $0x750] ss:$28 sps:$4 sm:$0xff]  }
 0x563   :  { %7149 = vmatpush3.bf16.msra.mxu1 %v7950_v58  ;;  %v8003_v58 = vld [vmem:[#allocation3 + $0xad0] ss:$28 sps:$4 sm:$0xff]  }
 0x564   :  { %7171 = vmatpush3.bf16.msra.mxu0 %v7951_v1  ;;  %7150 = vmatprep.subr.bf16.mxu1 %v7952_v0  ;;  %v5838_v1 = vpop.f32.mrf.mxu1  ;;  %v5881_v0 = vpop.f32.mrf.mxu0 }
 0x565   :  { %7172 = vmatprep.subr.bf16.mxu0 %v7953_v25  ;;  %v8004_v25 = vld [vmem:[#allocation3 + $0x8d8] ss:$28 sps:$4 sm:$0xff]  }
 0x567   :  { %7151 = vmatpush3.bf16.msra.mxu1 %v7954_v21  ;;  %v8005_v21 = vld [vmem:[#allocation3 + $0xc58] ss:$28 sps:$4 sm:$0xff]  }
 0x568   :  { %7173 = vmatpush3.bf16.msra.mxu0 %v7955_v36  ;;  %7152 = vmatprep.subr.bf16.mxu1 %v7956_v37  ;;  %v3302_v36 = vrot.slane %v8594_v31, %v8309_v43  ;;  %v3306_v37 = vrot.slane %v8594_v31, %v8312_v45 }
 0x569   :  { %7174 = vmatprep.subr.bf16.mxu0 %v7957_v20  ;;  %v8006_v20 = vld [vmem:[#allocation3 + $0x718] ss:$28 sps:$4 sm:$0xff]  }
 0x56b   :  { %7153 = vmatpush3.bf16.msra.mxu1 %v7958_v52  ;;  %v8007_v52 = vld [vmem:[#allocation3 + $0xa98] ss:$28 sps:$4 sm:$0xff]  }
 0x56c   :  { %7175 = vmatpush3.bf16.msra.mxu0 %v7959_v62  ;;  %7154 = vmatprep.subr.bf16.mxu1 %v7960_v18  ;;  %v5840_v62 = vpop.f32.mrf.mxu1  ;;  %v5883_v18 = vpop.f32.mrf.mxu0 }
 0x56d   :  { %7176 = vmatprep.subr.bf16.mxu0 %v7961_v22  ;;  %v5837_v22 = vadd.f32 %v5836_v12, %v3302_v36 }
 0x56f   :  { %7155 = vmatpush3.bf16.msra.mxu1 %v7962_v38  ;;  %v5839_v38 = vadd.f32 %v5838_v1, %v3306_v37 }
 0x570   :  { %7177 = vmatpush3.bf16.msra.mxu0 %v7963_v50  ;;  %7156 = vmatprep.subr.bf16.mxu1 %v7964_v29  ;;  %v5842_v50 = vpop.f32.mrf.mxu1  ;;  %v5885_v29 = vpop.f32.mrf.mxu0 }
 0x571   :  { %7178 = vmatprep.subr.bf16.mxu0 %v7965_v35  ;;  %v5880_v35 = vadd.f32 %v5879_v28, %v5837_v22  ;;  %v5882_v45 = vadd.f32 %v5881_v0, %v5839_v38 }
 0x573   :  { %7157 = vmatpush3.bf16.msra.mxu1 %v7966_v40  ;;  %v5841_v40 = vadd.f32 %v5840_v62, %v3302_v36 }
 0x574   :  { %7179 = vmatpush3.bf16.msra.mxu0 %v7967_v7  ;;  %7158 = vmatprep.subr.bf16.mxu1 %v7968_v8  ;;  %v5843_v8 = vadd.f32 %v5842_v50, %v3306_v37 }
 0x575   :  { %7180 = vmatprep.subr.bf16.mxu0 %v7969_v26 }
 0x577   :  { %7159 = vmatpush3.bf16.msra.mxu1 %v7970_v9 }
 0x578   :  { %7181 = vmatpush3.bf16.msra.mxu0 %v7971_v27  ;;  %7160 = vmatprep.subr.bf16.mxu1 %v7972_v10  ;;  %v5884_v10 = vadd.f32 %v5883_v18, %v5841_v40 }
 0x579   :  { %7182 = vmatprep.subr.bf16.mxu0 %v7973_v14 }
 0x57b   :  { %7161 = vmatpush3.bf16.msra.mxu1 %v7974_v30 }
 0x57c   :  { %7183 = vmatpush3.bf16.msra.mxu0 %v7975_v34  ;;  %7190 = vmatprep.subr.bf16.mxu1 %v7976_v39 }
 0x57d   :  { %7212 = vmatprep.subr.bf16.mxu0 %v7977_v41  ;;  %v5886_v41 = vadd.f32 %v5885_v29, %v5843_v8 }
 0x57e   :  { %6179 = vmatmul.mubr.bf16.vlgmr.msra.gmra.mxu1 %v8536_v46  ;;  %v7988_v46 = vld [vmem:[#allocation3 + $0x9b8] ss:$28 sps:$4 sm:$0xff]  }
 0x57f   :  { %6220 = vmatmul.mubr.bf16.vlgmr.msra.gmra.mxu0 %v8544_v51  ;;  %7191 = vmatpush3.bf16.msra.mxu1 %v7978_v47  ;;  %v7989_v51 = vld [vmem:[#allocation3 + $0xd38] ss:$28 sps:$4 sm:$0xff]  }
 0x580   :  { %7213 = vmatpush3.bf16.msra.mxu0 %v7979_v49  ;;  %7192 = vmatprep.subr.bf16.mxu1 %v7980_v13 }
 0x581   :  { %7214 = vmatprep.subr.bf16.mxu0 %v7981_v56  ;;  %6260 = vmatprep.mubr.bf16.mxu1 %v8552_v17  ;;  %v7994_v17 = vld [vmem:[#allocation3 + $0x7c0] ss:$28 sps:$4 sm:$0xff]  }
 0x582   :  { %6301 = vmatprep.mubr.bf16.mxu0 %v8560_v24  ;;  %v7995_v24 = vld [vmem:[#allocation3 + $0xb40] ss:$28 sps:$4 sm:$0xff]  }
 0x583   :  { %7193 = vmatpush3.bf16.msra.mxu1 %v7982_v63 }
 0x584   :  { %7215 = vmatpush3.bf16.msra.mxu0 %v7983_v11  ;;  %7194 = vmatprep.subr.bf16.mxu1 %v7984_v32 }
 0x585   :  { %7216 = vmatprep.subr.bf16.mxu0 %v7985_v4 }
 0x587   :  { %7195 = vmatpush3.bf16.msra.mxu1 %v7986_v16 }
 0x588   :  { %7217 = vmatpush3.bf16.msra.mxu0 %v7987_v57  ;;  %7196 = vmatprep.subr.bf16.mxu1 %v7988_v46 }
 0x589   :  { %7218 = vmatprep.subr.bf16.mxu0 %v7989_v51 }
 0x58b   :  { %7197 = vmatpush3.bf16.msra.mxu1 %v7990_v42 }
 0x58c   :  { %7219 = vmatpush3.bf16.msra.mxu0 %v7991_v44  ;;  %7198 = vmatprep.subr.bf16.mxu1 %v7992_v48  ;;  %v3310_v44 = vrot.slane %v8594_v31, %v1087_v54  ;;  %v3314_v48 = vrot.slane %v8594_v31, %v1091_v55 }
 0x58d   :  { %7220 = vmatprep.subr.bf16.mxu0 %v7993_v53 }
 0x58f   :  { %7199 = vmatpush3.bf16.msra.mxu1 %v7994_v17 }
 0x590   :  { %7221 = vmatpush3.bf16.msra.mxu0 %v7995_v24  ;;  %7200 = vmatprep.subr.bf16.mxu1 %v7996_v61 }
 0x591   :  { %7222 = vmatprep.subr.bf16.mxu0 %v7997_v6 }
 0x593   :  { %7201 = vmatpush3.bf16.msra.mxu1 %v7998_v23 }
 0x594   :  { %7223 = vmatpush3.bf16.msra.mxu0 %v7999_v5  ;;  %7202 = vmatprep.subr.bf16.mxu1 %v8000_v2 }
 0x595   :  { %7224 = vmatprep.subr.bf16.mxu0 %v8001_v3 }
 0x597   :  { %7203 = vmatpush3.bf16.msra.mxu1 %v8002_v15 }
 0x598   :  { %7225 = vmatpush3.bf16.msra.mxu0 %v8003_v58  ;;  %7204 = vmatprep.subr.bf16.mxu1 %v8004_v25 }
 0x599   :  { %7226 = vmatprep.subr.bf16.mxu0 %v8005_v21 }
 0x59b   :  { %7205 = vmatpush3.bf16.msra.mxu1 %v8006_v20 }
 0x59c   :  { %7227 = vmatpush3.bf16.msra.mxu0 %v8007_v52 }
 0x59e   :  { %v5922_v43 = vpop.f32.mrf.mxu1  ;;  %6261 = vmatmul.mubr.bf16.vlgmr.msra.gmra.mxu1 %v8572_v59 }
 0x59f   :  { %v5965_v7 = vpop.f32.mrf.mxu0  ;;  %6302 = vmatmul.mubr.bf16.vlgmr.msra.gmra.mxu0 %v8580_v60  ;;  %v5923_v26 = vadd.f32 %v5922_v43, %v5880_v35 }
 0x5a0   :  { %v5924_v9 = vpop.f32.mrf.mxu1 }
 0x5a1   :  { %v5967_v27 = vpop.f32.mrf.mxu0  ;;  %v5966_v14 = vadd.f32 %v5965_v7, %v5923_v26  ;;  %v5925_v30 = vadd.f32 %v5924_v9, %v5882_v45 }
 0x5a2   :  { %v5926_v34 = vpop.f32.mrf.mxu1 }
 0x5a3   :  { %v5969_v39 = vpop.f32.mrf.mxu0  ;;  %8016 = vtanh.f32 %v5966_v14  ;;  %v5968_v47 = vadd.f32 %v5967_v27, %v5925_v30  ;;  %v5927_v49 = vadd.f32 %v5926_v34, %v5884_v10  ;;  %v3318_v10 = vrot.slane %v8594_v31, %v1095_v33 }
 0x5a4   :  { %v5928_v13 = vpop.f32.mrf.mxu1 }
 0x5a5   :  { %8018 = vtanh.f32 %v5968_v47  ;;  %v5970_v56 = vadd.f32 %v5969_v39, %v5927_v49  ;;  %v5929_v59 = vadd.f32 %v5928_v13, %v5886_v41  ;;  %v5971_v63 = vpop.f32.mrf.mxu0 }
 0x5a7   :  { %8020 = vtanh.f32 %v5970_v56  ;;  %v5972_v60 = vadd.f32 %v5971_v63, %v5929_v59 }
 0x5a9   :  { %8022 = vtanh.f32 %v5972_v60 }
 0x5b0   :  { %v8017_v11 = vpop.eup %8016 }
 0x5b1   :  { %6326 = vst [vmem:[%s8678_s9 + $0x10] sm:$0xff] %v8017_v11 }
 0x5b2   :  { %v8019_v32 = vpop.eup %8018 }
 0x5b3   :  { %6327 = vst [vmem:[%s8678_s9 + $0x18] sm:$0xff] %v8019_v32 }
 0x5b4   :  { %v8021_v4 = vpop.eup %8020 }
 0x5b5   :  { %6333 = vst [vmem:[%s8678_s9 + $0x48] sm:$0xff] %v8021_v4 }
 0x5b6   :  { %v8023_v16 = vpop.eup %8022 }
 0x5b7   :  { %6334 = vst [vmem:[%s8678_s9 + $0x50] sm:$0xff] %v8023_v16 }
 0x5de   :  { %v6008_v57 = vpop.f32.mrf.mxu1 }
 0x5df   :  { %v6051_v46 = vpop.f32.mrf.mxu0  ;;  %v6009_v24 = vadd.f32 %v6008_v57, %v3310_v44 }
 0x5e0   :  { %v6010_v51 = vpop.f32.mrf.mxu1 }
 0x5e1   :  { %v6053_v42 = vpop.f32.mrf.mxu0  ;;  %v6011_v61 = vadd.f32 %v6010_v51, %v3314_v48  ;;  %v6052_v5 = vadd.f32 %v6051_v46, %v6009_v24 }
 0x5e2   :  { %v6012_v53 = vpop.f32.mrf.mxu1 }
 0x5e3   :  { %v6055_v17 = vpop.f32.mrf.mxu0  ;;  %v6013_v12 = vadd.f32 %v6012_v53, %v3310_v44  ;;  %v6054_v3 = vadd.f32 %v6053_v42, %v6011_v61 }
 0x5e4   :  { %v6014_v6 = vpop.f32.mrf.mxu1 }
 0x5e5   :  { %v6057_v23 = vpop.f32.mrf.mxu0  ;;  %v6015_v15 = vadd.f32 %v6014_v6, %v3314_v48  ;;  %v6056_v54 = vadd.f32 %v6055_v17, %v6013_v12 }
 0x5e7   :  { %v6058_v37 = vadd.f32 %v6057_v23, %v6015_v15 }
 0x61e   :  { %v6094_v28 = vpop.f32.mrf.mxu1 }
 0x61f   :  { %v6137_v2 = vpop.f32.mrf.mxu0  ;;  %v6095_v58 = vadd.f32 %v6094_v28, %v6052_v5 }
 0x620   :  { %v6096_v1 = vpop.f32.mrf.mxu1 }
 0x621   :  { %v6139_v0 = vpop.f32.mrf.mxu0  ;;  %v6138_v25 = vadd.f32 %v6137_v2, %v6095_v58  ;;  %v6097_v21 = vadd.f32 %v6096_v1, %v6054_v3 }
 0x622   :  { %v6098_v36 = vpop.f32.mrf.mxu1 }
 0x623   :  { %v6141_v55 = vpop.f32.mrf.mxu0  ;;  %8024 = vtanh.f32 %v6138_v25  ;;  %v6140_v20 = vadd.f32 %v6139_v0, %v6097_v21  ;;  %v6099_v52 = vadd.f32 %v6098_v36, %v6056_v54 }
 0x624   :  { %v6100_v62 = vpop.f32.mrf.mxu1 }
 0x625   :  { %8026 = vtanh.f32 %v6140_v20  ;;  %v6142_v18 = vadd.f32 %v6141_v55, %v6099_v52  ;;  %v6101_v22 = vadd.f32 %v6100_v62, %v6058_v37  ;;  %v6143_v38 = vpop.f32.mrf.mxu0 }
 0x627   :  { %8028 = vtanh.f32 %v6142_v18  ;;  %v6144_v50 = vadd.f32 %v6143_v38, %v6101_v22 }
 0x629   :  { %8030 = vtanh.f32 %v6144_v50 }
 0x630   :  { %v8025_v29 = vpop.eup %8024 }
 0x631   :  { %6328 = vst [vmem:[%s8678_s9 + $0x20] sm:$0xff] %v8025_v29 }
 0x632   :  { %v8027_v35 = vpop.eup %8026 }
 0x633   :  { %6329 = vst [vmem:[%s8678_s9 + $0x28] sm:$0xff] %v8027_v35 }
 0x634   :  { %v8029_v40 = vpop.eup %8028 }
 0x635   :  { %6335 = vst [vmem:[%s8678_s9 + $0x58] sm:$0xff] %v8029_v40 }
 0x636   :  { %v8031_v43 = vpop.eup %8030 }
 0x637   :  { %6336 = vst [vmem:[%s8678_s9 + $0x60] sm:$0xff] %v8031_v43 }
 0x63e   :  { %v7162_v7 = vpop.f32.mrf.mxu1 }
 0x63f   :  { %v7184_v45 = vpop.f32.mrf.mxu0 }
 0x640   :  { %v7163_v8 = vpop.f32.mrf.mxu1 }
 0x641   :  { %v7185_v26 = vpop.f32.mrf.mxu0  ;;  %v7164_v14 = vadd.f32 %v7163_v8, %v7162_v7 }
 0x642   :  { %v7165_v9 = vpop.f32.mrf.mxu1  ;;  %v7186_v41 = vadd.f32 %v7185_v26, %v7184_v45 }
 0x643   :  { %v7187_v27 = vpop.f32.mrf.mxu0  ;;  %v6181_v39 = vadd.f32 %v7164_v14, %v3318_v10 }
 0x644   :  { %v7166_v30 = vpop.f32.mrf.mxu1 }
 0x645   :  { %v7188_v34 = vpop.f32.mrf.mxu0  ;;  %v7167_v47 = vadd.f32 %v7166_v30, %v7165_v9  ;;  %v6222_v63 = vadd.f32 %v7186_v41, %v6181_v39 }
 0x646   :  { %v7189_v16 = vadd.f32 %v7188_v34, %v7187_v27 }
 0x647   :  { %v6184_v60 = vadd.f32 %v7167_v47, %v3318_v10 }
 0x649   :  { %v6225_v31 = vadd.f32 %v7189_v16, %v6184_v60 }
 0x65e   :  { %v7206_v49 = vpop.f32.mrf.mxu1 }
 0x65f   :  { %v7228_v13 = vpop.f32.mrf.mxu0 }
 0x660   :  { %v7207_v56 = vpop.f32.mrf.mxu1 }
 0x661   :  { %v7229_v59 = vpop.f32.mrf.mxu0  ;;  %v7208_v11 = vadd.f32 %v7207_v56, %v7206_v49 }
 0x662   :  { %v7209_v32 = vpop.f32.mrf.mxu1  ;;  %v7230_v19 = vadd.f32 %v7229_v59, %v7228_v13 }
 0x663   :  { %v7231_v4 = vpop.f32.mrf.mxu0  ;;  %v6263_v57 = vadd.f32 %v7208_v11, %v6222_v63 }
 0x664   :  { %v7210_v46 = vpop.f32.mrf.mxu1 }
 0x665   :  { %v7232_v33 = vpop.f32.mrf.mxu0  ;;  %v6304_v51 = vadd.f32 %v7230_v19, %v6263_v57  ;;  %v7211_v42 = vadd.f32 %v7210_v46, %v7209_v32 }
 0x666   :  { %v7233_v48 = vadd.f32 %v7232_v33, %v7231_v4 }
 0x667   :  { %8032 = vtanh.f32 %v6304_v51  ;;  %v6266_v44 = vadd.f32 %v7211_v42, %v6225_v31 }
 0x669   :  { %v6307_v53 = vadd.f32 %v7233_v48, %v6266_v44 }
 0x66b   :  { %8034 = vtanh.f32 %v6307_v53 }
 0x674   :  { %v8033_v17 = vpop.eup %8032 }
 0x675   :  { %6330 = vst [vmem:[%s8678_s9 + $0x30] sm:$0xff] %v8033_v17 }
 0x678   :  { %v8035_v24 = vpop.eup %8034 }
 0x679   :  { %6337 = vst [vmem:[%s8678_s9 + $0x68] sm:$0xff] %v8035_v24 }
 0x67a   :  { %6342 = vsyncpa [#allocation6], 1 }
 0x67b   :  { %6343 = vsyncpa [#allocation8], 1 }
 0x67c   :  { %6344 = vsyncpa [#allocation11], 1 }
 0x67d   :  { %6345 = vsyncpa [#allocation14], 1 }
 0x67e   :  { %6346 = vsyncmov [#allocation4] }
 0x681   :  { %s6347_s25 = vpop.sfrf %6346 }
 0x682   :  { %p7144_p12 = scmp.ne.s32.totalorder %s6347_s25, 0 }
 0x684   :  { %6351 = shalt.err (%p7144_p12)  }
 0x685   :  { %6353 = vsyncmov [#allocation4 + $0x1] }
 0x688   :  { %s6354_s26 = vpop.sfrf %6353 }
 0x689   :  { %p7145_p13 = scmp.ne.s32.totalorder %s6354_s26, 0 }
 0x68b   :  { %6358 = shalt.err (%p7145_p13)  }

</bundles_post_ra>
